<compile_context>
chip_gen: v7x
topology: tpu7x:2x2x1
jax: 0.10.0
libtpu: 0.0.40
codegen_flags: <defaults>
</compile_context>

<pallas_src>
import jax
import jax.numpy as jnp
from jax.experimental import pallas as pl
from jax.experimental.pallas import tpu as pltpu

# Layer sizes of CustomNet
DIMS = [1, 4, 8, 16, 8, 4, 1]
NUM_LAYERS = len(DIMS) - 1

# Static offsets into the packed 1-D parameter array:
# per layer, row-major (in, out) weights followed by the bias vector.
_W_OFF, _B_OFF = [], []
_off = 0
for _l in range(NUM_LAYERS):
    _fi, _fo = DIMS[_l], DIMS[_l + 1]
    _W_OFF.append(_off); _off += _fi * _fo
    _B_OFF.append(_off); _off += _fo
TOTAL_PARAMS = _off  # 369 f32 scalars (~1.5 KB)


def _ceil_div(a, b):
    return -(-a // b)


def _ceil_to(a, b):
    return _ceil_div(a, b) * b


def mlp_kernel(p_ref, x_ref, o_ref):
    """Fused 6-layer MLP.

    Batch lives on the lane axis (last dim, exactly 128 wide) with extra batch
    folded onto the sublane axis: x_ref / o_ref blocks are (tile_r, 128).
    Activations are a Python list of per-feature (tile_r, 128) f32 tiles; every
    FMA is a VPU broadcast-multiply-accumulate driven by scalar weights/biases
    read from the packed SMEM array.  The MXU is never touched.
    """
    rows = [x_ref[...]]                                   # fan_in == 1 for fc1
    for layer in range(NUM_LAYERS):
        fi, fo = DIMS[layer], DIMS[layer + 1]
        woff, boff = _W_OFF[layer], _B_OFF[layer]
        new_rows = []
        for j in range(fo):                               # output features
            acc = rows[0] * p_ref[woff + j]               # i == 0 term
            for i in range(1, fi):                        # remaining inputs
                acc = acc + rows[i] * p_ref[woff + i * fo + j]
            acc = acc + p_ref[boff + j]                   # bias (scalar bcast)
            if layer < NUM_LAYERS - 1:
                acc = jnp.maximum(acc, 0.0)               # ReLU (fc1..fc5)
            new_rows.append(acc)
        rows = new_rows
    o_ref[...] = rows[0].astype(o_ref.dtype)              # fc6 output, 1 row


def init_params(key):
    """Deterministic init mirroring torch.nn.Linear (U(-1/sqrt(fan_in), +))."""
    params = []
    for i in range(NUM_LAYERS):
        fan_in, fan_out = DIMS[i], DIMS[i + 1]
        key, kw, kb = jax.random.split(key, 3)
        bound = 1.0 / jnp.sqrt(fan_in)
        w = jax.random.uniform(kw, (fan_in, fan_out), jnp.float32, -bound, bound)
        b = jax.random.uniform(kb, (1, fan_out), jnp.float32, -bound, bound)
        params.append((w, b))
    return params


def pack_params(params):
    """Flatten all weights/biases into one 1-D f32 array for SMEM."""
    parts = []
    for (w, b) in params:
        parts.append(jnp.asarray(w, jnp.float32).reshape(-1))   # (in*out,)
        parts.append(jnp.asarray(b, jnp.float32).reshape(-1))   # (out,)
    flat = jnp.concatenate(parts)
    assert flat.shape == (TOTAL_PARAMS,)
    return flat


# Row-tile cap: 28 live f32 tiles (24 activations + 2x in + 2x out buffers)
# * 512 rows * 128 lanes * 4 B ~= 7.3 MiB -> fits every generation's scoped
# VMEM default (v5e 16 MiB, v6e/v7x 32 MiB) with room to spare.
_MAX_TILE_R = 512
_LIVE_TILES = 28


def _choose_tiling(R):
    """Pick (tile_r, grid_steps) for R sublane rows.

    * tile_r capped at _MAX_TILE_R (live-activation working set bound),
    * >= 2 grid steps whenever a sublane-aligned (multiple-of-8) split exists,
      so v7x's two TensorCores are both used (near-neutral on v5e/v6e),
    * steps kept as large as possible to amortize the per-step scalar/splat
      prologue (~364 SMEM loads + splats) and ~0.35 us pipeline overhead.
    """
    if R <= 8:
        # Too few rows to split at sublane granularity: one block covering the
        # full row extent (block == array dim, so no 8-divisibility needed).
        return R, 1
    tile = min(_MAX_TILE_R, _ceil_to(_ceil_div(R, 2), 8))
    steps = _ceil_div(R, tile)
    return tile, steps


def custom_net_forward(x, params):
    B = x.shape[0]
    assert x.shape == (B, 1)

    L = 128  # exactly one vreg lane width: dense, unmasked full-width stores

    # Fold batch: lanes first (128 wide), remainder onto the sublane axis.
    # (B,1) -> (R,128) is a pure relabeling of independent samples.
    B_pad = _ceil_to(max(B, L), L)
    R = B_pad // L
    tile_r, steps = _choose_tiling(R)
    R_pad = tile_r * steps

    x_flat = x.reshape(B).astype(jnp.float32)
    if B_pad != B:
        x_flat = jnp.pad(x_flat, (0, B_pad - B))          # zero-pad ragged batch
    x2 = x_flat.reshape(R, L)
    if R_pad != R:
        x2 = jnp.pad(x2, ((0, R_pad - R), (0, 0)))        # pad rows to tile grid

    flat_params = pack_params(params)

    # Explicit VMEM budget from the working set (+25% headroom), floored at the
    # smallest per-generation default so we never tighten the compiler's hand.
    tile_bytes = tile_r * L * 4
    vmem_limit = int(_LIVE_TILES * tile_bytes * 1.25)
    vmem_limit = min(max(vmem_limit, 16 * 1024 * 1024), 48 * 1024 * 1024)

    out2 = pl.pallas_call(
        mlp_kernel,
        out_shape=jax.ShapeDtypeStruct((R_pad, L), jnp.float32),
        grid_spec=pltpu.PrefetchScalarGridSpec(
            num_scalar_prefetch=0,
            grid=(steps,),
            in_specs=[
                # all parameters in one small SMEM-resident array (scalar reads,
                # copied once and resident across all grid steps)
                pl.BlockSpec(memory_space=pltpu.MemorySpace.SMEM),
                # batch tile: full 128-lane width, rows tiled by the grid
                pl.BlockSpec((tile_r, L), lambda i: (i, 0)),
            ],
            out_specs=pl.BlockSpec((tile_r, L), lambda i: (i, 0)),
            # default double-buffering only: kernel is VALU-bound, DMA is hidden
        ),
        compiler_params=pltpu.CompilerParams(
            dimension_semantics=("parallel",),            # shard rows across TCs (v7x)
            vmem_limit_bytes=vmem_limit,
        ),
    )(flat_params, x2)

    return out2.reshape(R_pad * L)[:B].reshape(B, 1)


def custom_net_ref(x, params):
    h = x
    for i, (w, b) in enumerate(params):
        h = h @ w + b
        if i < NUM_LAYERS - 1:
            h = jnp.maximum(h, 0.0)
    return h


if __name__ == "__main__":
    key = jax.random.PRNGKey(0)
    kx, kp = jax.random.split(key)
    params = init_params(kp)

    # B=2048 exercises the multi-step sublane-tiled grid (R=16, tile_r=8, 2 steps);
    # B=200 exercises the zero-padding path for ragged batches.
    for B in (2048, 200):
        kx, k = jax.random.split(kx)
        x = jax.random.normal(k, (B, 1), dtype=jnp.float32)
        out = jax.block_until_ready(custom_net_forward(x, params))
        ref = custom_net_ref(x, params)
        assert out.shape == (B, 1)
        assert jnp.allclose(out, ref, atol=1e-5, rtol=1e-5), f"mismatch at B={B}"

    print("KERNEL_OK")
</pallas_src>

<mosaic_0001>
module attributes {stable_mosaic.version = 11 : i64} {
  func.func @mlp_kernel(%arg0: i32, %arg1: memref<369xf32, #tpu.memory_space<smem>>, %arg2: memref<8x128xf32, #tpu.memory_space<vmem>>, %arg3: memref<8x128xf32, #tpu.memory_space<vmem>>) attributes {dimension_semantics = [#tpu.dimension_semantics<parallel>], iteration_bounds = array<i64: 2>, scalar_prefetch = 0 : i64, scratch_operands = 0 : i64, tpu.core_type = #tpu.core_type<tc>, window_params = [{transform_indices = @transform_0, window_bounds = array<i64: 369>}, {transform_indices = @transform_1, window_bounds = array<i64: 8, 128>}, {transform_indices = @transform_2, window_bounds = array<i64: 8, 128>}]} {
    %c0 = arith.constant 0 : index
    %c0_0 = arith.constant 0 : index
    %0 = vector.load %arg2[%c0, %c0_0] : memref<8x128xf32, #tpu.memory_space<vmem>>, vector<8x128xf32>
    %c0_1 = arith.constant 0 : index
    %1 = memref.load %arg1[%c0_1] : memref<369xf32, #tpu.memory_space<smem>>
    %2 = vector.broadcast %1 : f32 to vector<8x128xf32>
    %3 = arith.mulf %0, %2 : vector<8x128xf32>
    %c4 = arith.constant 4 : index
    %4 = memref.load %arg1[%c4] : memref<369xf32, #tpu.memory_space<smem>>
    %5 = vector.broadcast %4 : f32 to vector<8x128xf32>
    %6 = arith.addf %3, %5 : vector<8x128xf32>
    %cst = arith.constant 0.000000e+00 : f32
    %7 = vector.broadcast %cst : f32 to vector<8x128xf32>
    %8 = arith.maximumf %6, %7 : vector<8x128xf32>
    %c1 = arith.constant 1 : index
    %9 = memref.load %arg1[%c1] : memref<369xf32, #tpu.memory_space<smem>>
    %10 = vector.broadcast %9 : f32 to vector<8x128xf32>
    %11 = arith.mulf %0, %10 : vector<8x128xf32>
    %c5 = arith.constant 5 : index
    %12 = memref.load %arg1[%c5] : memref<369xf32, #tpu.memory_space<smem>>
    %13 = vector.broadcast %12 : f32 to vector<8x128xf32>
    %14 = arith.addf %11, %13 : vector<8x128xf32>
    %cst_2 = arith.constant 0.000000e+00 : f32
    %15 = vector.broadcast %cst_2 : f32 to vector<8x128xf32>
    %16 = arith.maximumf %14, %15 : vector<8x128xf32>
    %c2 = arith.constant 2 : index
    %17 = memref.load %arg1[%c2] : memref<369xf32, #tpu.memory_space<smem>>
    %18 = vector.broadcast %17 : f32 to vector<8x128xf32>
    %19 = arith.mulf %0, %18 : vector<8x128xf32>
    %c6 = arith.constant 6 : index
    %20 = memref.load %arg1[%c6] : memref<369xf32, #tpu.memory_space<smem>>
    %21 = vector.broadcast %20 : f32 to vector<8x128xf32>
    %22 = arith.addf %19, %21 : vector<8x128xf32>
    %cst_3 = arith.constant 0.000000e+00 : f32
    %23 = vector.broadcast %cst_3 : f32 to vector<8x128xf32>
    %24 = arith.maximumf %22, %23 : vector<8x128xf32>
    %c3 = arith.constant 3 : index
    %25 = memref.load %arg1[%c3] : memref<369xf32, #tpu.memory_space<smem>>
    %26 = vector.broadcast %25 : f32 to vector<8x128xf32>
    %27 = arith.mulf %0, %26 : vector<8x128xf32>
    %c7 = arith.constant 7 : index
    %28 = memref.load %arg1[%c7] : memref<369xf32, #tpu.memory_space<smem>>
    %29 = vector.broadcast %28 : f32 to vector<8x128xf32>
    %30 = arith.addf %27, %29 : vector<8x128xf32>
    %cst_4 = arith.constant 0.000000e+00 : f32
    %31 = vector.broadcast %cst_4 : f32 to vector<8x128xf32>
    %32 = arith.maximumf %30, %31 : vector<8x128xf32>
    %c8 = arith.constant 8 : index
    %33 = memref.load %arg1[%c8] : memref<369xf32, #tpu.memory_space<smem>>
    %34 = vector.broadcast %33 : f32 to vector<8x128xf32>
    %35 = arith.mulf %8, %34 : vector<8x128xf32>
    %c16 = arith.constant 16 : index
    %36 = memref.load %arg1[%c16] : memref<369xf32, #tpu.memory_space<smem>>
    %37 = vector.broadcast %36 : f32 to vector<8x128xf32>
    %38 = arith.mulf %16, %37 : vector<8x128xf32>
    %39 = arith.addf %35, %38 : vector<8x128xf32>
    %c24 = arith.constant 24 : index
    %40 = memref.load %arg1[%c24] : memref<369xf32, #tpu.memory_space<smem>>
    %41 = vector.broadcast %40 : f32 to vector<8x128xf32>
    %42 = arith.mulf %24, %41 : vector<8x128xf32>
    %43 = arith.addf %39, %42 : vector<8x128xf32>
    %c32 = arith.constant 32 : index
    %44 = memref.load %arg1[%c32] : memref<369xf32, #tpu.memory_space<smem>>
    %45 = vector.broadcast %44 : f32 to vector<8x128xf32>
    %46 = arith.mulf %32, %45 : vector<8x128xf32>
    %47 = arith.addf %43, %46 : vector<8x128xf32>
    %c40 = arith.constant 40 : index
    %48 = memref.load %arg1[%c40] : memref<369xf32, #tpu.memory_space<smem>>
    %49 = vector.broadcast %48 : f32 to vector<8x128xf32>
    %50 = arith.addf %47, %49 : vector<8x128xf32>
    %cst_5 = arith.constant 0.000000e+00 : f32
    %51 = vector.broadcast %cst_5 : f32 to vector<8x128xf32>
    %52 = arith.maximumf %50, %51 : vector<8x128xf32>
    %c9 = arith.constant 9 : index
    %53 = memref.load %arg1[%c9] : memref<369xf32, #tpu.memory_space<smem>>
    %54 = vector.broadcast %53 : f32 to vector<8x128xf32>
    %55 = arith.mulf %8, %54 : vector<8x128xf32>
    %c17 = arith.constant 17 : index
    %56 = memref.load %arg1[%c17] : memref<369xf32, #tpu.memory_space<smem>>
    %57 = vector.broadcast %56 : f32 to vector<8x128xf32>
    %58 = arith.mulf %16, %57 : vector<8x128xf32>
    %59 = arith.addf %55, %58 : vector<8x128xf32>
    %c25 = arith.constant 25 : index
    %60 = memref.load %arg1[%c25] : memref<369xf32, #tpu.memory_space<smem>>
    %61 = vector.broadcast %60 : f32 to vector<8x128xf32>
    %62 = arith.mulf %24, %61 : vector<8x128xf32>
    %63 = arith.addf %59, %62 : vector<8x128xf32>
    %c33 = arith.constant 33 : index
    %64 = memref.load %arg1[%c33] : memref<369xf32, #tpu.memory_space<smem>>
    %65 = vector.broadcast %64 : f32 to vector<8x128xf32>
    %66 = arith.mulf %32, %65 : vector<8x128xf32>
    %67 = arith.addf %63, %66 : vector<8x128xf32>
    %c41 = arith.constant 41 : index
    %68 = memref.load %arg1[%c41] : memref<369xf32, #tpu.memory_space<smem>>
    %69 = vector.broadcast %68 : f32 to vector<8x128xf32>
    %70 = arith.addf %67, %69 : vector<8x128xf32>
    %cst_6 = arith.constant 0.000000e+00 : f32
    %71 = vector.broadcast %cst_6 : f32 to vector<8x128xf32>
    %72 = arith.maximumf %70, %71 : vector<8x128xf32>
    %c10 = arith.constant 10 : index
    %73 = memref.load %arg1[%c10] : memref<369xf32, #tpu.memory_space<smem>>
    %74 = vector.broadcast %73 : f32 to vector<8x128xf32>
    %75 = arith.mulf %8, %74 : vector<8x128xf32>
    %c18 = arith.constant 18 : index
    %76 = memref.load %arg1[%c18] : memref<369xf32, #tpu.memory_space<smem>>
    %77 = vector.broadcast %76 : f32 to vector<8x128xf32>
    %78 = arith.mulf %16, %77 : vector<8x128xf32>
    %79 = arith.addf %75, %78 : vector<8x128xf32>
    %c26 = arith.constant 26 : index
    %80 = memref.load %arg1[%c26] : memref<369xf32, #tpu.memory_space<smem>>
    %81 = vector.broadcast %80 : f32 to vector<8x128xf32>
    %82 = arith.mulf %24, %81 : vector<8x128xf32>
    %83 = arith.addf %79, %82 : vector<8x128xf32>
    %c34 = arith.constant 34 : index
    %84 = memref.load %arg1[%c34] : memref<369xf32, #tpu.memory_space<smem>>
    %85 = vector.broadcast %84 : f32 to vector<8x128xf32>
    %86 = arith.mulf %32, %85 : vector<8x128xf32>
    %87 = arith.addf %83, %86 : vector<8x128xf32>
    %c42 = arith.constant 42 : index
    %88 = memref.load %arg1[%c42] : memref<369xf32, #tpu.memory_space<smem>>
    %89 = vector.broadcast %88 : f32 to vector<8x128xf32>
    %90 = arith.addf %87, %89 : vector<8x128xf32>
    %cst_7 = arith.constant 0.000000e+00 : f32
    %91 = vector.broadcast %cst_7 : f32 to vector<8x128xf32>
    %92 = arith.maximumf %90, %91 : vector<8x128xf32>
    %c11 = arith.constant 11 : index
    %93 = memref.load %arg1[%c11] : memref<369xf32, #tpu.memory_space<smem>>
    %94 = vector.broadcast %93 : f32 to vector<8x128xf32>
    %95 = arith.mulf %8, %94 : vector<8x128xf32>
    %c19 = arith.constant 19 : index
    %96 = memref.load %arg1[%c19] : memref<369xf32, #tpu.memory_space<smem>>
    %97 = vector.broadcast %96 : f32 to vector<8x128xf32>
    %98 = arith.mulf %16, %97 : vector<8x128xf32>
    %99 = arith.addf %95, %98 : vector<8x128xf32>
    %c27 = arith.constant 27 : index
    %100 = memref.load %arg1[%c27] : memref<369xf32, #tpu.memory_space<smem>>
    %101 = vector.broadcast %100 : f32 to vector<8x128xf32>
    %102 = arith.mulf %24, %101 : vector<8x128xf32>
    %103 = arith.addf %99, %102 : vector<8x128xf32>
    %c35 = arith.constant 35 : index
    %104 = memref.load %arg1[%c35] : memref<369xf32, #tpu.memory_space<smem>>
    %105 = vector.broadcast %104 : f32 to vector<8x128xf32>
    %106 = arith.mulf %32, %105 : vector<8x128xf32>
    %107 = arith.addf %103, %106 : vector<8x128xf32>
    %c43 = arith.constant 43 : index
    %108 = memref.load %arg1[%c43] : memref<369xf32, #tpu.memory_space<smem>>
    %109 = vector.broadcast %108 : f32 to vector<8x128xf32>
    %110 = arith.addf %107, %109 : vector<8x128xf32>
    %cst_8 = arith.constant 0.000000e+00 : f32
    %111 = vector.broadcast %cst_8 : f32 to vector<8x128xf32>
    %112 = arith.maximumf %110, %111 : vector<8x128xf32>
    %c12 = arith.constant 12 : index
    %113 = memref.load %arg1[%c12] : memref<369xf32, #tpu.memory_space<smem>>
    %114 = vector.broadcast %113 : f32 to vector<8x128xf32>
    %115 = arith.mulf %8, %114 : vector<8x128xf32>
    %c20 = arith.constant 20 : index
    %116 = memref.load %arg1[%c20] : memref<369xf32, #tpu.memory_space<smem>>
    %117 = vector.broadcast %116 : f32 to vector<8x128xf32>
    %118 = arith.mulf %16, %117 : vector<8x128xf32>
    %119 = arith.addf %115, %118 : vector<8x128xf32>
    %c28 = arith.constant 28 : index
    %120 = memref.load %arg1[%c28] : memref<369xf32, #tpu.memory_space<smem>>
    %121 = vector.broadcast %120 : f32 to vector<8x128xf32>
    %122 = arith.mulf %24, %121 : vector<8x128xf32>
    %123 = arith.addf %119, %122 : vector<8x128xf32>
    %c36 = arith.constant 36 : index
    %124 = memref.load %arg1[%c36] : memref<369xf32, #tpu.memory_space<smem>>
    %125 = vector.broadcast %124 : f32 to vector<8x128xf32>
    %126 = arith.mulf %32, %125 : vector<8x128xf32>
    %127 = arith.addf %123, %126 : vector<8x128xf32>
    %c44 = arith.constant 44 : index
    %128 = memref.load %arg1[%c44] : memref<369xf32, #tpu.memory_space<smem>>
    %129 = vector.broadcast %128 : f32 to vector<8x128xf32>
    %130 = arith.addf %127, %129 : vector<8x128xf32>
    %cst_9 = arith.constant 0.000000e+00 : f32
    %131 = vector.broadcast %cst_9 : f32 to vector<8x128xf32>
    %132 = arith.maximumf %130, %131 : vector<8x128xf32>
    %c13 = arith.constant 13 : index
    %133 = memref.load %arg1[%c13] : memref<369xf32, #tpu.memory_space<smem>>
    %134 = vector.broadcast %133 : f32 to vector<8x128xf32>
    %135 = arith.mulf %8, %134 : vector<8x128xf32>
    %c21 = arith.constant 21 : index
    %136 = memref.load %arg1[%c21] : memref<369xf32, #tpu.memory_space<smem>>
    %137 = vector.broadcast %136 : f32 to vector<8x128xf32>
    %138 = arith.mulf %16, %137 : vector<8x128xf32>
    %139 = arith.addf %135, %138 : vector<8x128xf32>
    %c29 = arith.constant 29 : index
    %140 = memref.load %arg1[%c29] : memref<369xf32, #tpu.memory_space<smem>>
    %141 = vector.broadcast %140 : f32 to vector<8x128xf32>
    %142 = arith.mulf %24, %141 : vector<8x128xf32>
    %143 = arith.addf %139, %142 : vector<8x128xf32>
    %c37 = arith.constant 37 : index
    %144 = memref.load %arg1[%c37] : memref<369xf32, #tpu.memory_space<smem>>
    %145 = vector.broadcast %144 : f32 to vector<8x128xf32>
    %146 = arith.mulf %32, %145 : vector<8x128xf32>
    %147 = arith.addf %143, %146 : vector<8x128xf32>
    %c45 = arith.constant 45 : index
    %148 = memref.load %arg1[%c45] : memref<369xf32, #tpu.memory_space<smem>>
    %149 = vector.broadcast %148 : f32 to vector<8x128xf32>
    %150 = arith.addf %147, %149 : vector<8x128xf32>
    %cst_10 = arith.constant 0.000000e+00 : f32
    %151 = vector.broadcast %cst_10 : f32 to vector<8x128xf32>
    %152 = arith.maximumf %150, %151 : vector<8x128xf32>
    %c14 = arith.constant 14 : index
    %153 = memref.load %arg1[%c14] : memref<369xf32, #tpu.memory_space<smem>>
    %154 = vector.broadcast %153 : f32 to vector<8x128xf32>
    %155 = arith.mulf %8, %154 : vector<8x128xf32>
    %c22 = arith.constant 22 : index
    %156 = memref.load %arg1[%c22] : memref<369xf32, #tpu.memory_space<smem>>
    %157 = vector.broadcast %156 : f32 to vector<8x128xf32>
    %158 = arith.mulf %16, %157 : vector<8x128xf32>
    %159 = arith.addf %155, %158 : vector<8x128xf32>
    %c30 = arith.constant 30 : index
    %160 = memref.load %arg1[%c30] : memref<369xf32, #tpu.memory_space<smem>>
    %161 = vector.broadcast %160 : f32 to vector<8x128xf32>
    %162 = arith.mulf %24, %161 : vector<8x128xf32>
    %163 = arith.addf %159, %162 : vector<8x128xf32>
    %c38 = arith.constant 38 : index
    %164 = memref.load %arg1[%c38] : memref<369xf32, #tpu.memory_space<smem>>
    %165 = vector.broadcast %164 : f32 to vector<8x128xf32>
    %166 = arith.mulf %32, %165 : vector<8x128xf32>
    %167 = arith.addf %163, %166 : vector<8x128xf32>
    %c46 = arith.constant 46 : index
    %168 = memref.load %arg1[%c46] : memref<369xf32, #tpu.memory_space<smem>>
    %169 = vector.broadcast %168 : f32 to vector<8x128xf32>
    %170 = arith.addf %167, %169 : vector<8x128xf32>
    %cst_11 = arith.constant 0.000000e+00 : f32
    %171 = vector.broadcast %cst_11 : f32 to vector<8x128xf32>
    %172 = arith.maximumf %170, %171 : vector<8x128xf32>
    %c15 = arith.constant 15 : index
    %173 = memref.load %arg1[%c15] : memref<369xf32, #tpu.memory_space<smem>>
    %174 = vector.broadcast %173 : f32 to vector<8x128xf32>
    %175 = arith.mulf %8, %174 : vector<8x128xf32>
    %c23 = arith.constant 23 : index
    %176 = memref.load %arg1[%c23] : memref<369xf32, #tpu.memory_space<smem>>
    %177 = vector.broadcast %176 : f32 to vector<8x128xf32>
    %178 = arith.mulf %16, %177 : vector<8x128xf32>
    %179 = arith.addf %175, %178 : vector<8x128xf32>
    %c31 = arith.constant 31 : index
    %180 = memref.load %arg1[%c31] : memref<369xf32, #tpu.memory_space<smem>>
    %181 = vector.broadcast %180 : f32 to vector<8x128xf32>
    %182 = arith.mulf %24, %181 : vector<8x128xf32>
    %183 = arith.addf %179, %182 : vector<8x128xf32>
    %c39 = arith.constant 39 : index
    %184 = memref.load %arg1[%c39] : memref<369xf32, #tpu.memory_space<smem>>
    %185 = vector.broadcast %184 : f32 to vector<8x128xf32>
    %186 = arith.mulf %32, %185 : vector<8x128xf32>
    %187 = arith.addf %183, %186 : vector<8x128xf32>
    %c47 = arith.constant 47 : index
    %188 = memref.load %arg1[%c47] : memref<369xf32, #tpu.memory_space<smem>>
    %189 = vector.broadcast %188 : f32 to vector<8x128xf32>
    %190 = arith.addf %187, %189 : vector<8x128xf32>
    %cst_12 = arith.constant 0.000000e+00 : f32
    %191 = vector.broadcast %cst_12 : f32 to vector<8x128xf32>
    %192 = arith.maximumf %190, %191 : vector<8x128xf32>
    %c48 = arith.constant 48 : index
    %193 = memref.load %arg1[%c48] : memref<369xf32, #tpu.memory_space<smem>>
    %194 = vector.broadcast %193 : f32 to vector<8x128xf32>
    %195 = arith.mulf %52, %194 : vector<8x128xf32>
    %c64 = arith.constant 64 : index
    %196 = memref.load %arg1[%c64] : memref<369xf32, #tpu.memory_space<smem>>
    %197 = vector.broadcast %196 : f32 to vector<8x128xf32>
    %198 = arith.mulf %72, %197 : vector<8x128xf32>
    %199 = arith.addf %195, %198 : vector<8x128xf32>
    %c80 = arith.constant 80 : index
    %200 = memref.load %arg1[%c80] : memref<369xf32, #tpu.memory_space<smem>>
    %201 = vector.broadcast %200 : f32 to vector<8x128xf32>
    %202 = arith.mulf %92, %201 : vector<8x128xf32>
    %203 = arith.addf %199, %202 : vector<8x128xf32>
    %c96 = arith.constant 96 : index
    %204 = memref.load %arg1[%c96] : memref<369xf32, #tpu.memory_space<smem>>
    %205 = vector.broadcast %204 : f32 to vector<8x128xf32>
    %206 = arith.mulf %112, %205 : vector<8x128xf32>
    %207 = arith.addf %203, %206 : vector<8x128xf32>
    %c112 = arith.constant 112 : index
    %208 = memref.load %arg1[%c112] : memref<369xf32, #tpu.memory_space<smem>>
    %209 = vector.broadcast %208 : f32 to vector<8x128xf32>
    %210 = arith.mulf %132, %209 : vector<8x128xf32>
    %211 = arith.addf %207, %210 : vector<8x128xf32>
    %c128 = arith.constant 128 : index
    %212 = memref.load %arg1[%c128] : memref<369xf32, #tpu.memory_space<smem>>
    %213 = vector.broadcast %212 : f32 to vector<8x128xf32>
    %214 = arith.mulf %152, %213 : vector<8x128xf32>
    %215 = arith.addf %211, %214 : vector<8x128xf32>
    %c144 = arith.constant 144 : index
    %216 = memref.load %arg1[%c144] : memref<369xf32, #tpu.memory_space<smem>>
    %217 = vector.broadcast %216 : f32 to vector<8x128xf32>
    %218 = arith.mulf %172, %217 : vector<8x128xf32>
    %219 = arith.addf %215, %218 : vector<8x128xf32>
    %c160 = arith.constant 160 : index
    %220 = memref.load %arg1[%c160] : memref<369xf32, #tpu.memory_space<smem>>
    %221 = vector.broadcast %220 : f32 to vector<8x128xf32>
    %222 = arith.mulf %192, %221 : vector<8x128xf32>
    %223 = arith.addf %219, %222 : vector<8x128xf32>
    %c176 = arith.constant 176 : index
    %224 = memref.load %arg1[%c176] : memref<369xf32, #tpu.memory_space<smem>>
    %225 = vector.broadcast %224 : f32 to vector<8x128xf32>
    %226 = arith.addf %223, %225 : vector<8x128xf32>
    %cst_13 = arith.constant 0.000000e+00 : f32
    %227 = vector.broadcast %cst_13 : f32 to vector<8x128xf32>
    %228 = arith.maximumf %226, %227 : vector<8x128xf32>
    %c49 = arith.constant 49 : index
    %229 = memref.load %arg1[%c49] : memref<369xf32, #tpu.memory_space<smem>>
    %230 = vector.broadcast %229 : f32 to vector<8x128xf32>
    %231 = arith.mulf %52, %230 : vector<8x128xf32>
    %c65 = arith.constant 65 : index
    %232 = memref.load %arg1[%c65] : memref<369xf32, #tpu.memory_space<smem>>
    %233 = vector.broadcast %232 : f32 to vector<8x128xf32>
    %234 = arith.mulf %72, %233 : vector<8x128xf32>
    %235 = arith.addf %231, %234 : vector<8x128xf32>
    %c81 = arith.constant 81 : index
    %236 = memref.load %arg1[%c81] : memref<369xf32, #tpu.memory_space<smem>>
    %237 = vector.broadcast %236 : f32 to vector<8x128xf32>
    %238 = arith.mulf %92, %237 : vector<8x128xf32>
    %239 = arith.addf %235, %238 : vector<8x128xf32>
    %c97 = arith.constant 97 : index
    %240 = memref.load %arg1[%c97] : memref<369xf32, #tpu.memory_space<smem>>
    %241 = vector.broadcast %240 : f32 to vector<8x128xf32>
    %242 = arith.mulf %112, %241 : vector<8x128xf32>
    %243 = arith.addf %239, %242 : vector<8x128xf32>
    %c113 = arith.constant 113 : index
    %244 = memref.load %arg1[%c113] : memref<369xf32, #tpu.memory_space<smem>>
    %245 = vector.broadcast %244 : f32 to vector<8x128xf32>
    %246 = arith.mulf %132, %245 : vector<8x128xf32>
    %247 = arith.addf %243, %246 : vector<8x128xf32>
    %c129 = arith.constant 129 : index
    %248 = memref.load %arg1[%c129] : memref<369xf32, #tpu.memory_space<smem>>
    %249 = vector.broadcast %248 : f32 to vector<8x128xf32>
    %250 = arith.mulf %152, %249 : vector<8x128xf32>
    %251 = arith.addf %247, %250 : vector<8x128xf32>
    %c145 = arith.constant 145 : index
    %252 = memref.load %arg1[%c145] : memref<369xf32, #tpu.memory_space<smem>>
    %253 = vector.broadcast %252 : f32 to vector<8x128xf32>
    %254 = arith.mulf %172, %253 : vector<8x128xf32>
    %255 = arith.addf %251, %254 : vector<8x128xf32>
    %c161 = arith.constant 161 : index
    %256 = memref.load %arg1[%c161] : memref<369xf32, #tpu.memory_space<smem>>
    %257 = vector.broadcast %256 : f32 to vector<8x128xf32>
    %258 = arith.mulf %192, %257 : vector<8x128xf32>
    %259 = arith.addf %255, %258 : vector<8x128xf32>
    %c177 = arith.constant 177 : index
    %260 = memref.load %arg1[%c177] : memref<369xf32, #tpu.memory_space<smem>>
    %261 = vector.broadcast %260 : f32 to vector<8x128xf32>
    %262 = arith.addf %259, %261 : vector<8x128xf32>
    %cst_14 = arith.constant 0.000000e+00 : f32
    %263 = vector.broadcast %cst_14 : f32 to vector<8x128xf32>
    %264 = arith.maximumf %262, %263 : vector<8x128xf32>
    %c50 = arith.constant 50 : index
    %265 = memref.load %arg1[%c50] : memref<369xf32, #tpu.memory_space<smem>>
    %266 = vector.broadcast %265 : f32 to vector<8x128xf32>
    %267 = arith.mulf %52, %266 : vector<8x128xf32>
    %c66 = arith.constant 66 : index
    %268 = memref.load %arg1[%c66] : memref<369xf32, #tpu.memory_space<smem>>
    %269 = vector.broadcast %268 : f32 to vector<8x128xf32>
    %270 = arith.mulf %72, %269 : vector<8x128xf32>
    %271 = arith.addf %267, %270 : vector<8x128xf32>
    %c82 = arith.constant 82 : index
    %272 = memref.load %arg1[%c82] : memref<369xf32, #tpu.memory_space<smem>>
    %273 = vector.broadcast %272 : f32 to vector<8x128xf32>
    %274 = arith.mulf %92, %273 : vector<8x128xf32>
    %275 = arith.addf %271, %274 : vector<8x128xf32>
    %c98 = arith.constant 98 : index
    %276 = memref.load %arg1[%c98] : memref<369xf32, #tpu.memory_space<smem>>
    %277 = vector.broadcast %276 : f32 to vector<8x128xf32>
    %278 = arith.mulf %112, %277 : vector<8x128xf32>
    %279 = arith.addf %275, %278 : vector<8x128xf32>
    %c114 = arith.constant 114 : index
    %280 = memref.load %arg1[%c114] : memref<369xf32, #tpu.memory_space<smem>>
    %281 = vector.broadcast %280 : f32 to vector<8x128xf32>
    %282 = arith.mulf %132, %281 : vector<8x128xf32>
    %283 = arith.addf %279, %282 : vector<8x128xf32>
    %c130 = arith.constant 130 : index
    %284 = memref.load %arg1[%c130] : memref<369xf32, #tpu.memory_space<smem>>
    %285 = vector.broadcast %284 : f32 to vector<8x128xf32>
    %286 = arith.mulf %152, %285 : vector<8x128xf32>
    %287 = arith.addf %283, %286 : vector<8x128xf32>
    %c146 = arith.constant 146 : index
    %288 = memref.load %arg1[%c146] : memref<369xf32, #tpu.memory_space<smem>>
    %289 = vector.broadcast %288 : f32 to vector<8x128xf32>
    %290 = arith.mulf %172, %289 : vector<8x128xf32>
    %291 = arith.addf %287, %290 : vector<8x128xf32>
    %c162 = arith.constant 162 : index
    %292 = memref.load %arg1[%c162] : memref<369xf32, #tpu.memory_space<smem>>
    %293 = vector.broadcast %292 : f32 to vector<8x128xf32>
    %294 = arith.mulf %192, %293 : vector<8x128xf32>
    %295 = arith.addf %291, %294 : vector<8x128xf32>
    %c178 = arith.constant 178 : index
    %296 = memref.load %arg1[%c178] : memref<369xf32, #tpu.memory_space<smem>>
    %297 = vector.broadcast %296 : f32 to vector<8x128xf32>
    %298 = arith.addf %295, %297 : vector<8x128xf32>
    %cst_15 = arith.constant 0.000000e+00 : f32
    %299 = vector.broadcast %cst_15 : f32 to vector<8x128xf32>
    %300 = arith.maximumf %298, %299 : vector<8x128xf32>
    %c51 = arith.constant 51 : index
    %301 = memref.load %arg1[%c51] : memref<369xf32, #tpu.memory_space<smem>>
    %302 = vector.broadcast %301 : f32 to vector<8x128xf32>
    %303 = arith.mulf %52, %302 : vector<8x128xf32>
    %c67 = arith.constant 67 : index
    %304 = memref.load %arg1[%c67] : memref<369xf32, #tpu.memory_space<smem>>
    %305 = vector.broadcast %304 : f32 to vector<8x128xf32>
    %306 = arith.mulf %72, %305 : vector<8x128xf32>
    %307 = arith.addf %303, %306 : vector<8x128xf32>
    %c83 = arith.constant 83 : index
    %308 = memref.load %arg1[%c83] : memref<369xf32, #tpu.memory_space<smem>>
    %309 = vector.broadcast %308 : f32 to vector<8x128xf32>
    %310 = arith.mulf %92, %309 : vector<8x128xf32>
    %311 = arith.addf %307, %310 : vector<8x128xf32>
    %c99 = arith.constant 99 : index
    %312 = memref.load %arg1[%c99] : memref<369xf32, #tpu.memory_space<smem>>
    %313 = vector.broadcast %312 : f32 to vector<8x128xf32>
    %314 = arith.mulf %112, %313 : vector<8x128xf32>
    %315 = arith.addf %311, %314 : vector<8x128xf32>
    %c115 = arith.constant 115 : index
    %316 = memref.load %arg1[%c115] : memref<369xf32, #tpu.memory_space<smem>>
    %317 = vector.broadcast %316 : f32 to vector<8x128xf32>
    %318 = arith.mulf %132, %317 : vector<8x128xf32>
    %319 = arith.addf %315, %318 : vector<8x128xf32>
    %c131 = arith.constant 131 : index
    %320 = memref.load %arg1[%c131] : memref<369xf32, #tpu.memory_space<smem>>
    %321 = vector.broadcast %320 : f32 to vector<8x128xf32>
    %322 = arith.mulf %152, %321 : vector<8x128xf32>
    %323 = arith.addf %319, %322 : vector<8x128xf32>
    %c147 = arith.constant 147 : index
    %324 = memref.load %arg1[%c147] : memref<369xf32, #tpu.memory_space<smem>>
    %325 = vector.broadcast %324 : f32 to vector<8x128xf32>
    %326 = arith.mulf %172, %325 : vector<8x128xf32>
    %327 = arith.addf %323, %326 : vector<8x128xf32>
    %c163 = arith.constant 163 : index
    %328 = memref.load %arg1[%c163] : memref<369xf32, #tpu.memory_space<smem>>
    %329 = vector.broadcast %328 : f32 to vector<8x128xf32>
    %330 = arith.mulf %192, %329 : vector<8x128xf32>
    %331 = arith.addf %327, %330 : vector<8x128xf32>
    %c179 = arith.constant 179 : index
    %332 = memref.load %arg1[%c179] : memref<369xf32, #tpu.memory_space<smem>>
    %333 = vector.broadcast %332 : f32 to vector<8x128xf32>
    %334 = arith.addf %331, %333 : vector<8x128xf32>
    %cst_16 = arith.constant 0.000000e+00 : f32
    %335 = vector.broadcast %cst_16 : f32 to vector<8x128xf32>
    %336 = arith.maximumf %334, %335 : vector<8x128xf32>
    %c52 = arith.constant 52 : index
    %337 = memref.load %arg1[%c52] : memref<369xf32, #tpu.memory_space<smem>>
    %338 = vector.broadcast %337 : f32 to vector<8x128xf32>
    %339 = arith.mulf %52, %338 : vector<8x128xf32>
    %c68 = arith.constant 68 : index
    %340 = memref.load %arg1[%c68] : memref<369xf32, #tpu.memory_space<smem>>
    %341 = vector.broadcast %340 : f32 to vector<8x128xf32>
    %342 = arith.mulf %72, %341 : vector<8x128xf32>
    %343 = arith.addf %339, %342 : vector<8x128xf32>
    %c84 = arith.constant 84 : index
    %344 = memref.load %arg1[%c84] : memref<369xf32, #tpu.memory_space<smem>>
    %345 = vector.broadcast %344 : f32 to vector<8x128xf32>
    %346 = arith.mulf %92, %345 : vector<8x128xf32>
    %347 = arith.addf %343, %346 : vector<8x128xf32>
    %c100 = arith.constant 100 : index
    %348 = memref.load %arg1[%c100] : memref<369xf32, #tpu.memory_space<smem>>
    %349 = vector.broadcast %348 : f32 to vector<8x128xf32>
    %350 = arith.mulf %112, %349 : vector<8x128xf32>
    %351 = arith.addf %347, %350 : vector<8x128xf32>
    %c116 = arith.constant 116 : index
    %352 = memref.load %arg1[%c116] : memref<369xf32, #tpu.memory_space<smem>>
    %353 = vector.broadcast %352 : f32 to vector<8x128xf32>
    %354 = arith.mulf %132, %353 : vector<8x128xf32>
    %355 = arith.addf %351, %354 : vector<8x128xf32>
    %c132 = arith.constant 132 : index
    %356 = memref.load %arg1[%c132] : memref<369xf32, #tpu.memory_space<smem>>
    %357 = vector.broadcast %356 : f32 to vector<8x128xf32>
    %358 = arith.mulf %152, %357 : vector<8x128xf32>
    %359 = arith.addf %355, %358 : vector<8x128xf32>
    %c148 = arith.constant 148 : index
    %360 = memref.load %arg1[%c148] : memref<369xf32, #tpu.memory_space<smem>>
    %361 = vector.broadcast %360 : f32 to vector<8x128xf32>
    %362 = arith.mulf %172, %361 : vector<8x128xf32>
    %363 = arith.addf %359, %362 : vector<8x128xf32>
    %c164 = arith.constant 164 : index
    %364 = memref.load %arg1[%c164] : memref<369xf32, #tpu.memory_space<smem>>
    %365 = vector.broadcast %364 : f32 to vector<8x128xf32>
    %366 = arith.mulf %192, %365 : vector<8x128xf32>
    %367 = arith.addf %363, %366 : vector<8x128xf32>
    %c180 = arith.constant 180 : index
    %368 = memref.load %arg1[%c180] : memref<369xf32, #tpu.memory_space<smem>>
    %369 = vector.broadcast %368 : f32 to vector<8x128xf32>
    %370 = arith.addf %367, %369 : vector<8x128xf32>
    %cst_17 = arith.constant 0.000000e+00 : f32
    %371 = vector.broadcast %cst_17 : f32 to vector<8x128xf32>
    %372 = arith.maximumf %370, %371 : vector<8x128xf32>
    %c53 = arith.constant 53 : index
    %373 = memref.load %arg1[%c53] : memref<369xf32, #tpu.memory_space<smem>>
    %374 = vector.broadcast %373 : f32 to vector<8x128xf32>
    %375 = arith.mulf %52, %374 : vector<8x128xf32>
    %c69 = arith.constant 69 : index
    %376 = memref.load %arg1[%c69] : memref<369xf32, #tpu.memory_space<smem>>
    %377 = vector.broadcast %376 : f32 to vector<8x128xf32>
    %378 = arith.mulf %72, %377 : vector<8x128xf32>
    %379 = arith.addf %375, %378 : vector<8x128xf32>
    %c85 = arith.constant 85 : index
    %380 = memref.load %arg1[%c85] : memref<369xf32, #tpu.memory_space<smem>>
    %381 = vector.broadcast %380 : f32 to vector<8x128xf32>
    %382 = arith.mulf %92, %381 : vector<8x128xf32>
    %383 = arith.addf %379, %382 : vector<8x128xf32>
    %c101 = arith.constant 101 : index
    %384 = memref.load %arg1[%c101] : memref<369xf32, #tpu.memory_space<smem>>
    %385 = vector.broadcast %384 : f32 to vector<8x128xf32>
    %386 = arith.mulf %112, %385 : vector<8x128xf32>
    %387 = arith.addf %383, %386 : vector<8x128xf32>
    %c117 = arith.constant 117 : index
    %388 = memref.load %arg1[%c117] : memref<369xf32, #tpu.memory_space<smem>>
    %389 = vector.broadcast %388 : f32 to vector<8x128xf32>
    %390 = arith.mulf %132, %389 : vector<8x128xf32>
    %391 = arith.addf %387, %390 : vector<8x128xf32>
    %c133 = arith.constant 133 : index
    %392 = memref.load %arg1[%c133] : memref<369xf32, #tpu.memory_space<smem>>
    %393 = vector.broadcast %392 : f32 to vector<8x128xf32>
    %394 = arith.mulf %152, %393 : vector<8x128xf32>
    %395 = arith.addf %391, %394 : vector<8x128xf32>
    %c149 = arith.constant 149 : index
    %396 = memref.load %arg1[%c149] : memref<369xf32, #tpu.memory_space<smem>>
    %397 = vector.broadcast %396 : f32 to vector<8x128xf32>
    %398 = arith.mulf %172, %397 : vector<8x128xf32>
    %399 = arith.addf %395, %398 : vector<8x128xf32>
    %c165 = arith.constant 165 : index
    %400 = memref.load %arg1[%c165] : memref<369xf32, #tpu.memory_space<smem>>
    %401 = vector.broadcast %400 : f32 to vector<8x128xf32>
    %402 = arith.mulf %192, %401 : vector<8x128xf32>
    %403 = arith.addf %399, %402 : vector<8x128xf32>
    %c181 = arith.constant 181 : index
    %404 = memref.load %arg1[%c181] : memref<369xf32, #tpu.memory_space<smem>>
    %405 = vector.broadcast %404 : f32 to vector<8x128xf32>
    %406 = arith.addf %403, %405 : vector<8x128xf32>
    %cst_18 = arith.constant 0.000000e+00 : f32
    %407 = vector.broadcast %cst_18 : f32 to vector<8x128xf32>
    %408 = arith.maximumf %406, %407 : vector<8x128xf32>
    %c54 = arith.constant 54 : index
    %409 = memref.load %arg1[%c54] : memref<369xf32, #tpu.memory_space<smem>>
    %410 = vector.broadcast %409 : f32 to vector<8x128xf32>
    %411 = arith.mulf %52, %410 : vector<8x128xf32>
    %c70 = arith.constant 70 : index
    %412 = memref.load %arg1[%c70] : memref<369xf32, #tpu.memory_space<smem>>
    %413 = vector.broadcast %412 : f32 to vector<8x128xf32>
    %414 = arith.mulf %72, %413 : vector<8x128xf32>
    %415 = arith.addf %411, %414 : vector<8x128xf32>
    %c86 = arith.constant 86 : index
    %416 = memref.load %arg1[%c86] : memref<369xf32, #tpu.memory_space<smem>>
    %417 = vector.broadcast %416 : f32 to vector<8x128xf32>
    %418 = arith.mulf %92, %417 : vector<8x128xf32>
    %419 = arith.addf %415, %418 : vector<8x128xf32>
    %c102 = arith.constant 102 : index
    %420 = memref.load %arg1[%c102] : memref<369xf32, #tpu.memory_space<smem>>
    %421 = vector.broadcast %420 : f32 to vector<8x128xf32>
    %422 = arith.mulf %112, %421 : vector<8x128xf32>
    %423 = arith.addf %419, %422 : vector<8x128xf32>
    %c118 = arith.constant 118 : index
    %424 = memref.load %arg1[%c118] : memref<369xf32, #tpu.memory_space<smem>>
    %425 = vector.broadcast %424 : f32 to vector<8x128xf32>
    %426 = arith.mulf %132, %425 : vector<8x128xf32>
    %427 = arith.addf %423, %426 : vector<8x128xf32>
    %c134 = arith.constant 134 : index
    %428 = memref.load %arg1[%c134] : memref<369xf32, #tpu.memory_space<smem>>
    %429 = vector.broadcast %428 : f32 to vector<8x128xf32>
    %430 = arith.mulf %152, %429 : vector<8x128xf32>
    %431 = arith.addf %427, %430 : vector<8x128xf32>
    %c150 = arith.constant 150 : index
    %432 = memref.load %arg1[%c150] : memref<369xf32, #tpu.memory_space<smem>>
    %433 = vector.broadcast %432 : f32 to vector<8x128xf32>
    %434 = arith.mulf %172, %433 : vector<8x128xf32>
    %435 = arith.addf %431, %434 : vector<8x128xf32>
    %c166 = arith.constant 166 : index
    %436 = memref.load %arg1[%c166] : memref<369xf32, #tpu.memory_space<smem>>
    %437 = vector.broadcast %436 : f32 to vector<8x128xf32>
    %438 = arith.mulf %192, %437 : vector<8x128xf32>
    %439 = arith.addf %435, %438 : vector<8x128xf32>
    %c182 = arith.constant 182 : index
    %440 = memref.load %arg1[%c182] : memref<369xf32, #tpu.memory_space<smem>>
    %441 = vector.broadcast %440 : f32 to vector<8x128xf32>
    %442 = arith.addf %439, %441 : vector<8x128xf32>
    %cst_19 = arith.constant 0.000000e+00 : f32
    %443 = vector.broadcast %cst_19 : f32 to vector<8x128xf32>
    %444 = arith.maximumf %442, %443 : vector<8x128xf32>
    %c55 = arith.constant 55 : index
    %445 = memref.load %arg1[%c55] : memref<369xf32, #tpu.memory_space<smem>>
    %446 = vector.broadcast %445 : f32 to vector<8x128xf32>
    %447 = arith.mulf %52, %446 : vector<8x128xf32>
    %c71 = arith.constant 71 : index
    %448 = memref.load %arg1[%c71] : memref<369xf32, #tpu.memory_space<smem>>
    %449 = vector.broadcast %448 : f32 to vector<8x128xf32>
    %450 = arith.mulf %72, %449 : vector<8x128xf32>
    %451 = arith.addf %447, %450 : vector<8x128xf32>
    %c87 = arith.constant 87 : index
    %452 = memref.load %arg1[%c87] : memref<369xf32, #tpu.memory_space<smem>>
    %453 = vector.broadcast %452 : f32 to vector<8x128xf32>
    %454 = arith.mulf %92, %453 : vector<8x128xf32>
    %455 = arith.addf %451, %454 : vector<8x128xf32>
    %c103 = arith.constant 103 : index
    %456 = memref.load %arg1[%c103] : memref<369xf32, #tpu.memory_space<smem>>
    %457 = vector.broadcast %456 : f32 to vector<8x128xf32>
    %458 = arith.mulf %112, %457 : vector<8x128xf32>
    %459 = arith.addf %455, %458 : vector<8x128xf32>
    %c119 = arith.constant 119 : index
    %460 = memref.load %arg1[%c119] : memref<369xf32, #tpu.memory_space<smem>>
    %461 = vector.broadcast %460 : f32 to vector<8x128xf32>
    %462 = arith.mulf %132, %461 : vector<8x128xf32>
    %463 = arith.addf %459, %462 : vector<8x128xf32>
    %c135 = arith.constant 135 : index
    %464 = memref.load %arg1[%c135] : memref<369xf32, #tpu.memory_space<smem>>
    %465 = vector.broadcast %464 : f32 to vector<8x128xf32>
    %466 = arith.mulf %152, %465 : vector<8x128xf32>
    %467 = arith.addf %463, %466 : vector<8x128xf32>
    %c151 = arith.constant 151 : index
    %468 = memref.load %arg1[%c151] : memref<369xf32, #tpu.memory_space<smem>>
    %469 = vector.broadcast %468 : f32 to vector<8x128xf32>
    %470 = arith.mulf %172, %469 : vector<8x128xf32>
    %471 = arith.addf %467, %470 : vector<8x128xf32>
    %c167 = arith.constant 167 : index
    %472 = memref.load %arg1[%c167] : memref<369xf32, #tpu.memory_space<smem>>
    %473 = vector.broadcast %472 : f32 to vector<8x128xf32>
    %474 = arith.mulf %192, %473 : vector<8x128xf32>
    %475 = arith.addf %471, %474 : vector<8x128xf32>
    %c183 = arith.constant 183 : index
    %476 = memref.load %arg1[%c183] : memref<369xf32, #tpu.memory_space<smem>>
    %477 = vector.broadcast %476 : f32 to vector<8x128xf32>
    %478 = arith.addf %475, %477 : vector<8x128xf32>
    %cst_20 = arith.constant 0.000000e+00 : f32
    %479 = vector.broadcast %cst_20 : f32 to vector<8x128xf32>
    %480 = arith.maximumf %478, %479 : vector<8x128xf32>
    %c56 = arith.constant 56 : index
    %481 = memref.load %arg1[%c56] : memref<369xf32, #tpu.memory_space<smem>>
    %482 = vector.broadcast %481 : f32 to vector<8x128xf32>
    %483 = arith.mulf %52, %482 : vector<8x128xf32>
    %c72 = arith.constant 72 : index
    %484 = memref.load %arg1[%c72] : memref<369xf32, #tpu.memory_space<smem>>
    %485 = vector.broadcast %484 : f32 to vector<8x128xf32>
    %486 = arith.mulf %72, %485 : vector<8x128xf32>
    %487 = arith.addf %483, %486 : vector<8x128xf32>
    %c88 = arith.constant 88 : index
    %488 = memref.load %arg1[%c88] : memref<369xf32, #tpu.memory_space<smem>>
    %489 = vector.broadcast %488 : f32 to vector<8x128xf32>
    %490 = arith.mulf %92, %489 : vector<8x128xf32>
    %491 = arith.addf %487, %490 : vector<8x128xf32>
    %c104 = arith.constant 104 : index
    %492 = memref.load %arg1[%c104] : memref<369xf32, #tpu.memory_space<smem>>
    %493 = vector.broadcast %492 : f32 to vector<8x128xf32>
    %494 = arith.mulf %112, %493 : vector<8x128xf32>
    %495 = arith.addf %491, %494 : vector<8x128xf32>
    %c120 = arith.constant 120 : index
    %496 = memref.load %arg1[%c120] : memref<369xf32, #tpu.memory_space<smem>>
    %497 = vector.broadcast %496 : f32 to vector<8x128xf32>
    %498 = arith.mulf %132, %497 : vector<8x128xf32>
    %499 = arith.addf %495, %498 : vector<8x128xf32>
    %c136 = arith.constant 136 : index
    %500 = memref.load %arg1[%c136] : memref<369xf32, #tpu.memory_space<smem>>
    %501 = vector.broadcast %500 : f32 to vector<8x128xf32>
    %502 = arith.mulf %152, %501 : vector<8x128xf32>
    %503 = arith.addf %499, %502 : vector<8x128xf32>
    %c152 = arith.constant 152 : index
    %504 = memref.load %arg1[%c152] : memref<369xf32, #tpu.memory_space<smem>>
    %505 = vector.broadcast %504 : f32 to vector<8x128xf32>
    %506 = arith.mulf %172, %505 : vector<8x128xf32>
    %507 = arith.addf %503, %506 : vector<8x128xf32>
    %c168 = arith.constant 168 : index
    %508 = memref.load %arg1[%c168] : memref<369xf32, #tpu.memory_space<smem>>
    %509 = vector.broadcast %508 : f32 to vector<8x128xf32>
    %510 = arith.mulf %192, %509 : vector<8x128xf32>
    %511 = arith.addf %507, %510 : vector<8x128xf32>
    %c184 = arith.constant 184 : index
    %512 = memref.load %arg1[%c184] : memref<369xf32, #tpu.memory_space<smem>>
    %513 = vector.broadcast %512 : f32 to vector<8x128xf32>
    %514 = arith.addf %511, %513 : vector<8x128xf32>
    %cst_21 = arith.constant 0.000000e+00 : f32
    %515 = vector.broadcast %cst_21 : f32 to vector<8x128xf32>
    %516 = arith.maximumf %514, %515 : vector<8x128xf32>
    %c57 = arith.constant 57 : index
    %517 = memref.load %arg1[%c57] : memref<369xf32, #tpu.memory_space<smem>>
    %518 = vector.broadcast %517 : f32 to vector<8x128xf32>
    %519 = arith.mulf %52, %518 : vector<8x128xf32>
    %c73 = arith.constant 73 : index
    %520 = memref.load %arg1[%c73] : memref<369xf32, #tpu.memory_space<smem>>
    %521 = vector.broadcast %520 : f32 to vector<8x128xf32>
    %522 = arith.mulf %72, %521 : vector<8x128xf32>
    %523 = arith.addf %519, %522 : vector<8x128xf32>
    %c89 = arith.constant 89 : index
    %524 = memref.load %arg1[%c89] : memref<369xf32, #tpu.memory_space<smem>>
    %525 = vector.broadcast %524 : f32 to vector<8x128xf32>
    %526 = arith.mulf %92, %525 : vector<8x128xf32>
    %527 = arith.addf %523, %526 : vector<8x128xf32>
    %c105 = arith.constant 105 : index
    %528 = memref.load %arg1[%c105] : memref<369xf32, #tpu.memory_space<smem>>
    %529 = vector.broadcast %528 : f32 to vector<8x128xf32>
    %530 = arith.mulf %112, %529 : vector<8x128xf32>
    %531 = arith.addf %527, %530 : vector<8x128xf32>
    %c121 = arith.constant 121 : index
    %532 = memref.load %arg1[%c121] : memref<369xf32, #tpu.memory_space<smem>>
    %533 = vector.broadcast %532 : f32 to vector<8x128xf32>
    %534 = arith.mulf %132, %533 : vector<8x128xf32>
    %535 = arith.addf %531, %534 : vector<8x128xf32>
    %c137 = arith.constant 137 : index
    %536 = memref.load %arg1[%c137] : memref<369xf32, #tpu.memory_space<smem>>
    %537 = vector.broadcast %536 : f32 to vector<8x128xf32>
    %538 = arith.mulf %152, %537 : vector<8x128xf32>
    %539 = arith.addf %535, %538 : vector<8x128xf32>
    %c153 = arith.constant 153 : index
    %540 = memref.load %arg1[%c153] : memref<369xf32, #tpu.memory_space<smem>>
    %541 = vector.broadcast %540 : f32 to vector<8x128xf32>
    %542 = arith.mulf %172, %541 : vector<8x128xf32>
    %543 = arith.addf %539, %542 : vector<8x128xf32>
    %c169 = arith.constant 169 : index
    %544 = memref.load %arg1[%c169] : memref<369xf32, #tpu.memory_space<smem>>
    %545 = vector.broadcast %544 : f32 to vector<8x128xf32>
    %546 = arith.mulf %192, %545 : vector<8x128xf32>
    %547 = arith.addf %543, %546 : vector<8x128xf32>
    %c185 = arith.constant 185 : index
    %548 = memref.load %arg1[%c185] : memref<369xf32, #tpu.memory_space<smem>>
    %549 = vector.broadcast %548 : f32 to vector<8x128xf32>
    %550 = arith.addf %547, %549 : vector<8x128xf32>
    %cst_22 = arith.constant 0.000000e+00 : f32
    %551 = vector.broadcast %cst_22 : f32 to vector<8x128xf32>
    %552 = arith.maximumf %550, %551 : vector<8x128xf32>
    %c58 = arith.constant 58 : index
    %553 = memref.load %arg1[%c58] : memref<369xf32, #tpu.memory_space<smem>>
    %554 = vector.broadcast %553 : f32 to vector<8x128xf32>
    %555 = arith.mulf %52, %554 : vector<8x128xf32>
    %c74 = arith.constant 74 : index
    %556 = memref.load %arg1[%c74] : memref<369xf32, #tpu.memory_space<smem>>
    %557 = vector.broadcast %556 : f32 to vector<8x128xf32>
    %558 = arith.mulf %72, %557 : vector<8x128xf32>
    %559 = arith.addf %555, %558 : vector<8x128xf32>
    %c90 = arith.constant 90 : index
    %560 = memref.load %arg1[%c90] : memref<369xf32, #tpu.memory_space<smem>>
    %561 = vector.broadcast %560 : f32 to vector<8x128xf32>
    %562 = arith.mulf %92, %561 : vector<8x128xf32>
    %563 = arith.addf %559, %562 : vector<8x128xf32>
    %c106 = arith.constant 106 : index
    %564 = memref.load %arg1[%c106] : memref<369xf32, #tpu.memory_space<smem>>
    %565 = vector.broadcast %564 : f32 to vector<8x128xf32>
    %566 = arith.mulf %112, %565 : vector<8x128xf32>
    %567 = arith.addf %563, %566 : vector<8x128xf32>
    %c122 = arith.constant 122 : index
    %568 = memref.load %arg1[%c122] : memref<369xf32, #tpu.memory_space<smem>>
    %569 = vector.broadcast %568 : f32 to vector<8x128xf32>
    %570 = arith.mulf %132, %569 : vector<8x128xf32>
    %571 = arith.addf %567, %570 : vector<8x128xf32>
    %c138 = arith.constant 138 : index
    %572 = memref.load %arg1[%c138] : memref<369xf32, #tpu.memory_space<smem>>
    %573 = vector.broadcast %572 : f32 to vector<8x128xf32>
    %574 = arith.mulf %152, %573 : vector<8x128xf32>
    %575 = arith.addf %571, %574 : vector<8x128xf32>
    %c154 = arith.constant 154 : index
    %576 = memref.load %arg1[%c154] : memref<369xf32, #tpu.memory_space<smem>>
    %577 = vector.broadcast %576 : f32 to vector<8x128xf32>
    %578 = arith.mulf %172, %577 : vector<8x128xf32>
    %579 = arith.addf %575, %578 : vector<8x128xf32>
    %c170 = arith.constant 170 : index
    %580 = memref.load %arg1[%c170] : memref<369xf32, #tpu.memory_space<smem>>
    %581 = vector.broadcast %580 : f32 to vector<8x128xf32>
    %582 = arith.mulf %192, %581 : vector<8x128xf32>
    %583 = arith.addf %579, %582 : vector<8x128xf32>
    %c186 = arith.constant 186 : index
    %584 = memref.load %arg1[%c186] : memref<369xf32, #tpu.memory_space<smem>>
    %585 = vector.broadcast %584 : f32 to vector<8x128xf32>
    %586 = arith.addf %583, %585 : vector<8x128xf32>
    %cst_23 = arith.constant 0.000000e+00 : f32
    %587 = vector.broadcast %cst_23 : f32 to vector<8x128xf32>
    %588 = arith.maximumf %586, %587 : vector<8x128xf32>
    %c59 = arith.constant 59 : index
    %589 = memref.load %arg1[%c59] : memref<369xf32, #tpu.memory_space<smem>>
    %590 = vector.broadcast %589 : f32 to vector<8x128xf32>
    %591 = arith.mulf %52, %590 : vector<8x128xf32>
    %c75 = arith.constant 75 : index
    %592 = memref.load %arg1[%c75] : memref<369xf32, #tpu.memory_space<smem>>
    %593 = vector.broadcast %592 : f32 to vector<8x128xf32>
    %594 = arith.mulf %72, %593 : vector<8x128xf32>
    %595 = arith.addf %591, %594 : vector<8x128xf32>
    %c91 = arith.constant 91 : index
    %596 = memref.load %arg1[%c91] : memref<369xf32, #tpu.memory_space<smem>>
    %597 = vector.broadcast %596 : f32 to vector<8x128xf32>
    %598 = arith.mulf %92, %597 : vector<8x128xf32>
    %599 = arith.addf %595, %598 : vector<8x128xf32>
    %c107 = arith.constant 107 : index
    %600 = memref.load %arg1[%c107] : memref<369xf32, #tpu.memory_space<smem>>
    %601 = vector.broadcast %600 : f32 to vector<8x128xf32>
    %602 = arith.mulf %112, %601 : vector<8x128xf32>
    %603 = arith.addf %599, %602 : vector<8x128xf32>
    %c123 = arith.constant 123 : index
    %604 = memref.load %arg1[%c123] : memref<369xf32, #tpu.memory_space<smem>>
    %605 = vector.broadcast %604 : f32 to vector<8x128xf32>
    %606 = arith.mulf %132, %605 : vector<8x128xf32>
    %607 = arith.addf %603, %606 : vector<8x128xf32>
    %c139 = arith.constant 139 : index
    %608 = memref.load %arg1[%c139] : memref<369xf32, #tpu.memory_space<smem>>
    %609 = vector.broadcast %608 : f32 to vector<8x128xf32>
    %610 = arith.mulf %152, %609 : vector<8x128xf32>
    %611 = arith.addf %607, %610 : vector<8x128xf32>
    %c155 = arith.constant 155 : index
    %612 = memref.load %arg1[%c155] : memref<369xf32, #tpu.memory_space<smem>>
    %613 = vector.broadcast %612 : f32 to vector<8x128xf32>
    %614 = arith.mulf %172, %613 : vector<8x128xf32>
    %615 = arith.addf %611, %614 : vector<8x128xf32>
    %c171 = arith.constant 171 : index
    %616 = memref.load %arg1[%c171] : memref<369xf32, #tpu.memory_space<smem>>
    %617 = vector.broadcast %616 : f32 to vector<8x128xf32>
    %618 = arith.mulf %192, %617 : vector<8x128xf32>
    %619 = arith.addf %615, %618 : vector<8x128xf32>
    %c187 = arith.constant 187 : index
    %620 = memref.load %arg1[%c187] : memref<369xf32, #tpu.memory_space<smem>>
    %621 = vector.broadcast %620 : f32 to vector<8x128xf32>
    %622 = arith.addf %619, %621 : vector<8x128xf32>
    %cst_24 = arith.constant 0.000000e+00 : f32
    %623 = vector.broadcast %cst_24 : f32 to vector<8x128xf32>
    %624 = arith.maximumf %622, %623 : vector<8x128xf32>
    %c60 = arith.constant 60 : index
    %625 = memref.load %arg1[%c60] : memref<369xf32, #tpu.memory_space<smem>>
    %626 = vector.broadcast %625 : f32 to vector<8x128xf32>
    %627 = arith.mulf %52, %626 : vector<8x128xf32>
    %c76 = arith.constant 76 : index
    %628 = memref.load %arg1[%c76] : memref<369xf32, #tpu.memory_space<smem>>
    %629 = vector.broadcast %628 : f32 to vector<8x128xf32>
    %630 = arith.mulf %72, %629 : vector<8x128xf32>
    %631 = arith.addf %627, %630 : vector<8x128xf32>
    %c92 = arith.constant 92 : index
    %632 = memref.load %arg1[%c92] : memref<369xf32, #tpu.memory_space<smem>>
    %633 = vector.broadcast %632 : f32 to vector<8x128xf32>
    %634 = arith.mulf %92, %633 : vector<8x128xf32>
    %635 = arith.addf %631, %634 : vector<8x128xf32>
    %c108 = arith.constant 108 : index
    %636 = memref.load %arg1[%c108] : memref<369xf32, #tpu.memory_space<smem>>
    %637 = vector.broadcast %636 : f32 to vector<8x128xf32>
    %638 = arith.mulf %112, %637 : vector<8x128xf32>
    %639 = arith.addf %635, %638 : vector<8x128xf32>
    %c124 = arith.constant 124 : index
    %640 = memref.load %arg1[%c124] : memref<369xf32, #tpu.memory_space<smem>>
    %641 = vector.broadcast %640 : f32 to vector<8x128xf32>
    %642 = arith.mulf %132, %641 : vector<8x128xf32>
    %643 = arith.addf %639, %642 : vector<8x128xf32>
    %c140 = arith.constant 140 : index
    %644 = memref.load %arg1[%c140] : memref<369xf32, #tpu.memory_space<smem>>
    %645 = vector.broadcast %644 : f32 to vector<8x128xf32>
    %646 = arith.mulf %152, %645 : vector<8x128xf32>
    %647 = arith.addf %643, %646 : vector<8x128xf32>
    %c156 = arith.constant 156 : index
    %648 = memref.load %arg1[%c156] : memref<369xf32, #tpu.memory_space<smem>>
    %649 = vector.broadcast %648 : f32 to vector<8x128xf32>
    %650 = arith.mulf %172, %649 : vector<8x128xf32>
    %651 = arith.addf %647, %650 : vector<8x128xf32>
    %c172 = arith.constant 172 : index
    %652 = memref.load %arg1[%c172] : memref<369xf32, #tpu.memory_space<smem>>
    %653 = vector.broadcast %652 : f32 to vector<8x128xf32>
    %654 = arith.mulf %192, %653 : vector<8x128xf32>
    %655 = arith.addf %651, %654 : vector<8x128xf32>
    %c188 = arith.constant 188 : index
    %656 = memref.load %arg1[%c188] : memref<369xf32, #tpu.memory_space<smem>>
    %657 = vector.broadcast %656 : f32 to vector<8x128xf32>
    %658 = arith.addf %655, %657 : vector<8x128xf32>
    %cst_25 = arith.constant 0.000000e+00 : f32
    %659 = vector.broadcast %cst_25 : f32 to vector<8x128xf32>
    %660 = arith.maximumf %658, %659 : vector<8x128xf32>
    %c61 = arith.constant 61 : index
    %661 = memref.load %arg1[%c61] : memref<369xf32, #tpu.memory_space<smem>>
    %662 = vector.broadcast %661 : f32 to vector<8x128xf32>
    %663 = arith.mulf %52, %662 : vector<8x128xf32>
    %c77 = arith.constant 77 : index
    %664 = memref.load %arg1[%c77] : memref<369xf32, #tpu.memory_space<smem>>
    %665 = vector.broadcast %664 : f32 to vector<8x128xf32>
    %666 = arith.mulf %72, %665 : vector<8x128xf32>
    %667 = arith.addf %663, %666 : vector<8x128xf32>
    %c93 = arith.constant 93 : index
    %668 = memref.load %arg1[%c93] : memref<369xf32, #tpu.memory_space<smem>>
    %669 = vector.broadcast %668 : f32 to vector<8x128xf32>
    %670 = arith.mulf %92, %669 : vector<8x128xf32>
    %671 = arith.addf %667, %670 : vector<8x128xf32>
    %c109 = arith.constant 109 : index
    %672 = memref.load %arg1[%c109] : memref<369xf32, #tpu.memory_space<smem>>
    %673 = vector.broadcast %672 : f32 to vector<8x128xf32>
    %674 = arith.mulf %112, %673 : vector<8x128xf32>
    %675 = arith.addf %671, %674 : vector<8x128xf32>
    %c125 = arith.constant 125 : index
    %676 = memref.load %arg1[%c125] : memref<369xf32, #tpu.memory_space<smem>>
    %677 = vector.broadcast %676 : f32 to vector<8x128xf32>
    %678 = arith.mulf %132, %677 : vector<8x128xf32>
    %679 = arith.addf %675, %678 : vector<8x128xf32>
    %c141 = arith.constant 141 : index
    %680 = memref.load %arg1[%c141] : memref<369xf32, #tpu.memory_space<smem>>
    %681 = vector.broadcast %680 : f32 to vector<8x128xf32>
    %682 = arith.mulf %152, %681 : vector<8x128xf32>
    %683 = arith.addf %679, %682 : vector<8x128xf32>
    %c157 = arith.constant 157 : index
    %684 = memref.load %arg1[%c157] : memref<369xf32, #tpu.memory_space<smem>>
    %685 = vector.broadcast %684 : f32 to vector<8x128xf32>
    %686 = arith.mulf %172, %685 : vector<8x128xf32>
    %687 = arith.addf %683, %686 : vector<8x128xf32>
    %c173 = arith.constant 173 : index
    %688 = memref.load %arg1[%c173] : memref<369xf32, #tpu.memory_space<smem>>
    %689 = vector.broadcast %688 : f32 to vector<8x128xf32>
    %690 = arith.mulf %192, %689 : vector<8x128xf32>
    %691 = arith.addf %687, %690 : vector<8x128xf32>
    %c189 = arith.constant 189 : index
    %692 = memref.load %arg1[%c189] : memref<369xf32, #tpu.memory_space<smem>>
    %693 = vector.broadcast %692 : f32 to vector<8x128xf32>
    %694 = arith.addf %691, %693 : vector<8x128xf32>
    %cst_26 = arith.constant 0.000000e+00 : f32
    %695 = vector.broadcast %cst_26 : f32 to vector<8x128xf32>
    %696 = arith.maximumf %694, %695 : vector<8x128xf32>
    %c62 = arith.constant 62 : index
    %697 = memref.load %arg1[%c62] : memref<369xf32, #tpu.memory_space<smem>>
    %698 = vector.broadcast %697 : f32 to vector<8x128xf32>
    %699 = arith.mulf %52, %698 : vector<8x128xf32>
    %c78 = arith.constant 78 : index
    %700 = memref.load %arg1[%c78] : memref<369xf32, #tpu.memory_space<smem>>
    %701 = vector.broadcast %700 : f32 to vector<8x128xf32>
    %702 = arith.mulf %72, %701 : vector<8x128xf32>
    %703 = arith.addf %699, %702 : vector<8x128xf32>
    %c94 = arith.constant 94 : index
    %704 = memref.load %arg1[%c94] : memref<369xf32, #tpu.memory_space<smem>>
    %705 = vector.broadcast %704 : f32 to vector<8x128xf32>
    %706 = arith.mulf %92, %705 : vector<8x128xf32>
    %707 = arith.addf %703, %706 : vector<8x128xf32>
    %c110 = arith.constant 110 : index
    %708 = memref.load %arg1[%c110] : memref<369xf32, #tpu.memory_space<smem>>
    %709 = vector.broadcast %708 : f32 to vector<8x128xf32>
    %710 = arith.mulf %112, %709 : vector<8x128xf32>
    %711 = arith.addf %707, %710 : vector<8x128xf32>
    %c126 = arith.constant 126 : index
    %712 = memref.load %arg1[%c126] : memref<369xf32, #tpu.memory_space<smem>>
    %713 = vector.broadcast %712 : f32 to vector<8x128xf32>
    %714 = arith.mulf %132, %713 : vector<8x128xf32>
    %715 = arith.addf %711, %714 : vector<8x128xf32>
    %c142 = arith.constant 142 : index
    %716 = memref.load %arg1[%c142] : memref<369xf32, #tpu.memory_space<smem>>
    %717 = vector.broadcast %716 : f32 to vector<8x128xf32>
    %718 = arith.mulf %152, %717 : vector<8x128xf32>
    %719 = arith.addf %715, %718 : vector<8x128xf32>
    %c158 = arith.constant 158 : index
    %720 = memref.load %arg1[%c158] : memref<369xf32, #tpu.memory_space<smem>>
    %721 = vector.broadcast %720 : f32 to vector<8x128xf32>
    %722 = arith.mulf %172, %721 : vector<8x128xf32>
    %723 = arith.addf %719, %722 : vector<8x128xf32>
    %c174 = arith.constant 174 : index
    %724 = memref.load %arg1[%c174] : memref<369xf32, #tpu.memory_space<smem>>
    %725 = vector.broadcast %724 : f32 to vector<8x128xf32>
    %726 = arith.mulf %192, %725 : vector<8x128xf32>
    %727 = arith.addf %723, %726 : vector<8x128xf32>
    %c190 = arith.constant 190 : index
    %728 = memref.load %arg1[%c190] : memref<369xf32, #tpu.memory_space<smem>>
    %729 = vector.broadcast %728 : f32 to vector<8x128xf32>
    %730 = arith.addf %727, %729 : vector<8x128xf32>
    %cst_27 = arith.constant 0.000000e+00 : f32
    %731 = vector.broadcast %cst_27 : f32 to vector<8x128xf32>
    %732 = arith.maximumf %730, %731 : vector<8x128xf32>
    %c63 = arith.constant 63 : index
    %733 = memref.load %arg1[%c63] : memref<369xf32, #tpu.memory_space<smem>>
    %734 = vector.broadcast %733 : f32 to vector<8x128xf32>
    %735 = arith.mulf %52, %734 : vector<8x128xf32>
    %c79 = arith.constant 79 : index
    %736 = memref.load %arg1[%c79] : memref<369xf32, #tpu.memory_space<smem>>
    %737 = vector.broadcast %736 : f32 to vector<8x128xf32>
    %738 = arith.mulf %72, %737 : vector<8x128xf32>
    %739 = arith.addf %735, %738 : vector<8x128xf32>
    %c95 = arith.constant 95 : index
    %740 = memref.load %arg1[%c95] : memref<369xf32, #tpu.memory_space<smem>>
    %741 = vector.broadcast %740 : f32 to vector<8x128xf32>
    %742 = arith.mulf %92, %741 : vector<8x128xf32>
    %743 = arith.addf %739, %742 : vector<8x128xf32>
    %c111 = arith.constant 111 : index
    %744 = memref.load %arg1[%c111] : memref<369xf32, #tpu.memory_space<smem>>
    %745 = vector.broadcast %744 : f32 to vector<8x128xf32>
    %746 = arith.mulf %112, %745 : vector<8x128xf32>
    %747 = arith.addf %743, %746 : vector<8x128xf32>
    %c127 = arith.constant 127 : index
    %748 = memref.load %arg1[%c127] : memref<369xf32, #tpu.memory_space<smem>>
    %749 = vector.broadcast %748 : f32 to vector<8x128xf32>
    %750 = arith.mulf %132, %749 : vector<8x128xf32>
    %751 = arith.addf %747, %750 : vector<8x128xf32>
    %c143 = arith.constant 143 : index
    %752 = memref.load %arg1[%c143] : memref<369xf32, #tpu.memory_space<smem>>
    %753 = vector.broadcast %752 : f32 to vector<8x128xf32>
    %754 = arith.mulf %152, %753 : vector<8x128xf32>
    %755 = arith.addf %751, %754 : vector<8x128xf32>
    %c159 = arith.constant 159 : index
    %756 = memref.load %arg1[%c159] : memref<369xf32, #tpu.memory_space<smem>>
    %757 = vector.broadcast %756 : f32 to vector<8x128xf32>
    %758 = arith.mulf %172, %757 : vector<8x128xf32>
    %759 = arith.addf %755, %758 : vector<8x128xf32>
    %c175 = arith.constant 175 : index
    %760 = memref.load %arg1[%c175] : memref<369xf32, #tpu.memory_space<smem>>
    %761 = vector.broadcast %760 : f32 to vector<8x128xf32>
    %762 = arith.mulf %192, %761 : vector<8x128xf32>
    %763 = arith.addf %759, %762 : vector<8x128xf32>
    %c191 = arith.constant 191 : index
    %764 = memref.load %arg1[%c191] : memref<369xf32, #tpu.memory_space<smem>>
    %765 = vector.broadcast %764 : f32 to vector<8x128xf32>
    %766 = arith.addf %763, %765 : vector<8x128xf32>
    %cst_28 = arith.constant 0.000000e+00 : f32
    %767 = vector.broadcast %cst_28 : f32 to vector<8x128xf32>
    %768 = arith.maximumf %766, %767 : vector<8x128xf32>
    %c192 = arith.constant 192 : index
    %769 = memref.load %arg1[%c192] : memref<369xf32, #tpu.memory_space<smem>>
    %770 = vector.broadcast %769 : f32 to vector<8x128xf32>
    %771 = arith.mulf %228, %770 : vector<8x128xf32>
    %c200 = arith.constant 200 : index
    %772 = memref.load %arg1[%c200] : memref<369xf32, #tpu.memory_space<smem>>
    %773 = vector.broadcast %772 : f32 to vector<8x128xf32>
    %774 = arith.mulf %264, %773 : vector<8x128xf32>
    %775 = arith.addf %771, %774 : vector<8x128xf32>
    %c208 = arith.constant 208 : index
    %776 = memref.load %arg1[%c208] : memref<369xf32, #tpu.memory_space<smem>>
    %777 = vector.broadcast %776 : f32 to vector<8x128xf32>
    %778 = arith.mulf %300, %777 : vector<8x128xf32>
    %779 = arith.addf %775, %778 : vector<8x128xf32>
    %c216 = arith.constant 216 : index
    %780 = memref.load %arg1[%c216] : memref<369xf32, #tpu.memory_space<smem>>
    %781 = vector.broadcast %780 : f32 to vector<8x128xf32>
    %782 = arith.mulf %336, %781 : vector<8x128xf32>
    %783 = arith.addf %779, %782 : vector<8x128xf32>
    %c224 = arith.constant 224 : index
    %784 = memref.load %arg1[%c224] : memref<369xf32, #tpu.memory_space<smem>>
    %785 = vector.broadcast %784 : f32 to vector<8x128xf32>
    %786 = arith.mulf %372, %785 : vector<8x128xf32>
    %787 = arith.addf %783, %786 : vector<8x128xf32>
    %c232 = arith.constant 232 : index
    %788 = memref.load %arg1[%c232] : memref<369xf32, #tpu.memory_space<smem>>
    %789 = vector.broadcast %788 : f32 to vector<8x128xf32>
    %790 = arith.mulf %408, %789 : vector<8x128xf32>
    %791 = arith.addf %787, %790 : vector<8x128xf32>
    %c240 = arith.constant 240 : index
    %792 = memref.load %arg1[%c240] : memref<369xf32, #tpu.memory_space<smem>>
    %793 = vector.broadcast %792 : f32 to vector<8x128xf32>
    %794 = arith.mulf %444, %793 : vector<8x128xf32>
    %795 = arith.addf %791, %794 : vector<8x128xf32>
    %c248 = arith.constant 248 : index
    %796 = memref.load %arg1[%c248] : memref<369xf32, #tpu.memory_space<smem>>
    %797 = vector.broadcast %796 : f32 to vector<8x128xf32>
    %798 = arith.mulf %480, %797 : vector<8x128xf32>
    %799 = arith.addf %795, %798 : vector<8x128xf32>
    %c256 = arith.constant 256 : index
    %800 = memref.load %arg1[%c256] : memref<369xf32, #tpu.memory_space<smem>>
    %801 = vector.broadcast %800 : f32 to vector<8x128xf32>
    %802 = arith.mulf %516, %801 : vector<8x128xf32>
    %803 = arith.addf %799, %802 : vector<8x128xf32>
    %c264 = arith.constant 264 : index
    %804 = memref.load %arg1[%c264] : memref<369xf32, #tpu.memory_space<smem>>
    %805 = vector.broadcast %804 : f32 to vector<8x128xf32>
    %806 = arith.mulf %552, %805 : vector<8x128xf32>
    %807 = arith.addf %803, %806 : vector<8x128xf32>
    %c272 = arith.constant 272 : index
    %808 = memref.load %arg1[%c272] : memref<369xf32, #tpu.memory_space<smem>>
    %809 = vector.broadcast %808 : f32 to vector<8x128xf32>
    %810 = arith.mulf %588, %809 : vector<8x128xf32>
    %811 = arith.addf %807, %810 : vector<8x128xf32>
    %c280 = arith.constant 280 : index
    %812 = memref.load %arg1[%c280] : memref<369xf32, #tpu.memory_space<smem>>
    %813 = vector.broadcast %812 : f32 to vector<8x128xf32>
    %814 = arith.mulf %624, %813 : vector<8x128xf32>
    %815 = arith.addf %811, %814 : vector<8x128xf32>
    %c288 = arith.constant 288 : index
    %816 = memref.load %arg1[%c288] : memref<369xf32, #tpu.memory_space<smem>>
    %817 = vector.broadcast %816 : f32 to vector<8x128xf32>
    %818 = arith.mulf %660, %817 : vector<8x128xf32>
    %819 = arith.addf %815, %818 : vector<8x128xf32>
    %c296 = arith.constant 296 : index
    %820 = memref.load %arg1[%c296] : memref<369xf32, #tpu.memory_space<smem>>
    %821 = vector.broadcast %820 : f32 to vector<8x128xf32>
    %822 = arith.mulf %696, %821 : vector<8x128xf32>
    %823 = arith.addf %819, %822 : vector<8x128xf32>
    %c304 = arith.constant 304 : index
    %824 = memref.load %arg1[%c304] : memref<369xf32, #tpu.memory_space<smem>>
    %825 = vector.broadcast %824 : f32 to vector<8x128xf32>
    %826 = arith.mulf %732, %825 : vector<8x128xf32>
    %827 = arith.addf %823, %826 : vector<8x128xf32>
    %c312 = arith.constant 312 : index
    %828 = memref.load %arg1[%c312] : memref<369xf32, #tpu.memory_space<smem>>
    %829 = vector.broadcast %828 : f32 to vector<8x128xf32>
    %830 = arith.mulf %768, %829 : vector<8x128xf32>
    %831 = arith.addf %827, %830 : vector<8x128xf32>
    %c320 = arith.constant 320 : index
    %832 = memref.load %arg1[%c320] : memref<369xf32, #tpu.memory_space<smem>>
    %833 = vector.broadcast %832 : f32 to vector<8x128xf32>
    %834 = arith.addf %831, %833 : vector<8x128xf32>
    %cst_29 = arith.constant 0.000000e+00 : f32
    %835 = vector.broadcast %cst_29 : f32 to vector<8x128xf32>
    %836 = arith.maximumf %834, %835 : vector<8x128xf32>
    %c193 = arith.constant 193 : index
    %837 = memref.load %arg1[%c193] : memref<369xf32, #tpu.memory_space<smem>>
    %838 = vector.broadcast %837 : f32 to vector<8x128xf32>
    %839 = arith.mulf %228, %838 : vector<8x128xf32>
    %c201 = arith.constant 201 : index
    %840 = memref.load %arg1[%c201] : memref<369xf32, #tpu.memory_space<smem>>
    %841 = vector.broadcast %840 : f32 to vector<8x128xf32>
    %842 = arith.mulf %264, %841 : vector<8x128xf32>
    %843 = arith.addf %839, %842 : vector<8x128xf32>
    %c209 = arith.constant 209 : index
    %844 = memref.load %arg1[%c209] : memref<369xf32, #tpu.memory_space<smem>>
    %845 = vector.broadcast %844 : f32 to vector<8x128xf32>
    %846 = arith.mulf %300, %845 : vector<8x128xf32>
    %847 = arith.addf %843, %846 : vector<8x128xf32>
    %c217 = arith.constant 217 : index
    %848 = memref.load %arg1[%c217] : memref<369xf32, #tpu.memory_space<smem>>
    %849 = vector.broadcast %848 : f32 to vector<8x128xf32>
    %850 = arith.mulf %336, %849 : vector<8x128xf32>
    %851 = arith.addf %847, %850 : vector<8x128xf32>
    %c225 = arith.constant 225 : index
    %852 = memref.load %arg1[%c225] : memref<369xf32, #tpu.memory_space<smem>>
    %853 = vector.broadcast %852 : f32 to vector<8x128xf32>
    %854 = arith.mulf %372, %853 : vector<8x128xf32>
    %855 = arith.addf %851, %854 : vector<8x128xf32>
    %c233 = arith.constant 233 : index
    %856 = memref.load %arg1[%c233] : memref<369xf32, #tpu.memory_space<smem>>
    %857 = vector.broadcast %856 : f32 to vector<8x128xf32>
    %858 = arith.mulf %408, %857 : vector<8x128xf32>
    %859 = arith.addf %855, %858 : vector<8x128xf32>
    %c241 = arith.constant 241 : index
    %860 = memref.load %arg1[%c241] : memref<369xf32, #tpu.memory_space<smem>>
    %861 = vector.broadcast %860 : f32 to vector<8x128xf32>
    %862 = arith.mulf %444, %861 : vector<8x128xf32>
    %863 = arith.addf %859, %862 : vector<8x128xf32>
    %c249 = arith.constant 249 : index
    %864 = memref.load %arg1[%c249] : memref<369xf32, #tpu.memory_space<smem>>
    %865 = vector.broadcast %864 : f32 to vector<8x128xf32>
    %866 = arith.mulf %480, %865 : vector<8x128xf32>
    %867 = arith.addf %863, %866 : vector<8x128xf32>
    %c257 = arith.constant 257 : index
    %868 = memref.load %arg1[%c257] : memref<369xf32, #tpu.memory_space<smem>>
    %869 = vector.broadcast %868 : f32 to vector<8x128xf32>
    %870 = arith.mulf %516, %869 : vector<8x128xf32>
    %871 = arith.addf %867, %870 : vector<8x128xf32>
    %c265 = arith.constant 265 : index
    %872 = memref.load %arg1[%c265] : memref<369xf32, #tpu.memory_space<smem>>
    %873 = vector.broadcast %872 : f32 to vector<8x128xf32>
    %874 = arith.mulf %552, %873 : vector<8x128xf32>
    %875 = arith.addf %871, %874 : vector<8x128xf32>
    %c273 = arith.constant 273 : index
    %876 = memref.load %arg1[%c273] : memref<369xf32, #tpu.memory_space<smem>>
    %877 = vector.broadcast %876 : f32 to vector<8x128xf32>
    %878 = arith.mulf %588, %877 : vector<8x128xf32>
    %879 = arith.addf %875, %878 : vector<8x128xf32>
    %c281 = arith.constant 281 : index
    %880 = memref.load %arg1[%c281] : memref<369xf32, #tpu.memory_space<smem>>
    %881 = vector.broadcast %880 : f32 to vector<8x128xf32>
    %882 = arith.mulf %624, %881 : vector<8x128xf32>
    %883 = arith.addf %879, %882 : vector<8x128xf32>
    %c289 = arith.constant 289 : index
    %884 = memref.load %arg1[%c289] : memref<369xf32, #tpu.memory_space<smem>>
    %885 = vector.broadcast %884 : f32 to vector<8x128xf32>
    %886 = arith.mulf %660, %885 : vector<8x128xf32>
    %887 = arith.addf %883, %886 : vector<8x128xf32>
    %c297 = arith.constant 297 : index
    %888 = memref.load %arg1[%c297] : memref<369xf32, #tpu.memory_space<smem>>
    %889 = vector.broadcast %888 : f32 to vector<8x128xf32>
    %890 = arith.mulf %696, %889 : vector<8x128xf32>
    %891 = arith.addf %887, %890 : vector<8x128xf32>
    %c305 = arith.constant 305 : index
    %892 = memref.load %arg1[%c305] : memref<369xf32, #tpu.memory_space<smem>>
    %893 = vector.broadcast %892 : f32 to vector<8x128xf32>
    %894 = arith.mulf %732, %893 : vector<8x128xf32>
    %895 = arith.addf %891, %894 : vector<8x128xf32>
    %c313 = arith.constant 313 : index
    %896 = memref.load %arg1[%c313] : memref<369xf32, #tpu.memory_space<smem>>
    %897 = vector.broadcast %896 : f32 to vector<8x128xf32>
    %898 = arith.mulf %768, %897 : vector<8x128xf32>
    %899 = arith.addf %895, %898 : vector<8x128xf32>
    %c321 = arith.constant 321 : index
    %900 = memref.load %arg1[%c321] : memref<369xf32, #tpu.memory_space<smem>>
    %901 = vector.broadcast %900 : f32 to vector<8x128xf32>
    %902 = arith.addf %899, %901 : vector<8x128xf32>
    %cst_30 = arith.constant 0.000000e+00 : f32
    %903 = vector.broadcast %cst_30 : f32 to vector<8x128xf32>
    %904 = arith.maximumf %902, %903 : vector<8x128xf32>
    %c194 = arith.constant 194 : index
    %905 = memref.load %arg1[%c194] : memref<369xf32, #tpu.memory_space<smem>>
    %906 = vector.broadcast %905 : f32 to vector<8x128xf32>
    %907 = arith.mulf %228, %906 : vector<8x128xf32>
    %c202 = arith.constant 202 : index
    %908 = memref.load %arg1[%c202] : memref<369xf32, #tpu.memory_space<smem>>
    %909 = vector.broadcast %908 : f32 to vector<8x128xf32>
    %910 = arith.mulf %264, %909 : vector<8x128xf32>
    %911 = arith.addf %907, %910 : vector<8x128xf32>
    %c210 = arith.constant 210 : index
    %912 = memref.load %arg1[%c210] : memref<369xf32, #tpu.memory_space<smem>>
    %913 = vector.broadcast %912 : f32 to vector<8x128xf32>
    %914 = arith.mulf %300, %913 : vector<8x128xf32>
    %915 = arith.addf %911, %914 : vector<8x128xf32>
    %c218 = arith.constant 218 : index
    %916 = memref.load %arg1[%c218] : memref<369xf32, #tpu.memory_space<smem>>
    %917 = vector.broadcast %916 : f32 to vector<8x128xf32>
    %918 = arith.mulf %336, %917 : vector<8x128xf32>
    %919 = arith.addf %915, %918 : vector<8x128xf32>
    %c226 = arith.constant 226 : index
    %920 = memref.load %arg1[%c226] : memref<369xf32, #tpu.memory_space<smem>>
    %921 = vector.broadcast %920 : f32 to vector<8x128xf32>
    %922 = arith.mulf %372, %921 : vector<8x128xf32>
    %923 = arith.addf %919, %922 : vector<8x128xf32>
    %c234 = arith.constant 234 : index
    %924 = memref.load %arg1[%c234] : memref<369xf32, #tpu.memory_space<smem>>
    %925 = vector.broadcast %924 : f32 to vector<8x128xf32>
    %926 = arith.mulf %408, %925 : vector<8x128xf32>
    %927 = arith.addf %923, %926 : vector<8x128xf32>
    %c242 = arith.constant 242 : index
    %928 = memref.load %arg1[%c242] : memref<369xf32, #tpu.memory_space<smem>>
    %929 = vector.broadcast %928 : f32 to vector<8x128xf32>
    %930 = arith.mulf %444, %929 : vector<8x128xf32>
    %931 = arith.addf %927, %930 : vector<8x128xf32>
    %c250 = arith.constant 250 : index
    %932 = memref.load %arg1[%c250] : memref<369xf32, #tpu.memory_space<smem>>
    %933 = vector.broadcast %932 : f32 to vector<8x128xf32>
    %934 = arith.mulf %480, %933 : vector<8x128xf32>
    %935 = arith.addf %931, %934 : vector<8x128xf32>
    %c258 = arith.constant 258 : index
    %936 = memref.load %arg1[%c258] : memref<369xf32, #tpu.memory_space<smem>>
    %937 = vector.broadcast %936 : f32 to vector<8x128xf32>
    %938 = arith.mulf %516, %937 : vector<8x128xf32>
    %939 = arith.addf %935, %938 : vector<8x128xf32>
    %c266 = arith.constant 266 : index
    %940 = memref.load %arg1[%c266] : memref<369xf32, #tpu.memory_space<smem>>
    %941 = vector.broadcast %940 : f32 to vector<8x128xf32>
    %942 = arith.mulf %552, %941 : vector<8x128xf32>
    %943 = arith.addf %939, %942 : vector<8x128xf32>
    %c274 = arith.constant 274 : index
    %944 = memref.load %arg1[%c274] : memref<369xf32, #tpu.memory_space<smem>>
    %945 = vector.broadcast %944 : f32 to vector<8x128xf32>
    %946 = arith.mulf %588, %945 : vector<8x128xf32>
    %947 = arith.addf %943, %946 : vector<8x128xf32>
    %c282 = arith.constant 282 : index
    %948 = memref.load %arg1[%c282] : memref<369xf32, #tpu.memory_space<smem>>
    %949 = vector.broadcast %948 : f32 to vector<8x128xf32>
    %950 = arith.mulf %624, %949 : vector<8x128xf32>
    %951 = arith.addf %947, %950 : vector<8x128xf32>
    %c290 = arith.constant 290 : index
    %952 = memref.load %arg1[%c290] : memref<369xf32, #tpu.memory_space<smem>>
    %953 = vector.broadcast %952 : f32 to vector<8x128xf32>
    %954 = arith.mulf %660, %953 : vector<8x128xf32>
    %955 = arith.addf %951, %954 : vector<8x128xf32>
    %c298 = arith.constant 298 : index
    %956 = memref.load %arg1[%c298] : memref<369xf32, #tpu.memory_space<smem>>
    %957 = vector.broadcast %956 : f32 to vector<8x128xf32>
    %958 = arith.mulf %696, %957 : vector<8x128xf32>
    %959 = arith.addf %955, %958 : vector<8x128xf32>
    %c306 = arith.constant 306 : index
    %960 = memref.load %arg1[%c306] : memref<369xf32, #tpu.memory_space<smem>>
    %961 = vector.broadcast %960 : f32 to vector<8x128xf32>
    %962 = arith.mulf %732, %961 : vector<8x128xf32>
    %963 = arith.addf %959, %962 : vector<8x128xf32>
    %c314 = arith.constant 314 : index
    %964 = memref.load %arg1[%c314] : memref<369xf32, #tpu.memory_space<smem>>
    %965 = vector.broadcast %964 : f32 to vector<8x128xf32>
    %966 = arith.mulf %768, %965 : vector<8x128xf32>
    %967 = arith.addf %963, %966 : vector<8x128xf32>
    %c322 = arith.constant 322 : index
    %968 = memref.load %arg1[%c322] : memref<369xf32, #tpu.memory_space<smem>>
    %969 = vector.broadcast %968 : f32 to vector<8x128xf32>
    %970 = arith.addf %967, %969 : vector<8x128xf32>
    %cst_31 = arith.constant 0.000000e+00 : f32
    %971 = vector.broadcast %cst_31 : f32 to vector<8x128xf32>
    %972 = arith.maximumf %970, %971 : vector<8x128xf32>
    %c195 = arith.constant 195 : index
    %973 = memref.load %arg1[%c195] : memref<369xf32, #tpu.memory_space<smem>>
    %974 = vector.broadcast %973 : f32 to vector<8x128xf32>
    %975 = arith.mulf %228, %974 : vector<8x128xf32>
    %c203 = arith.constant 203 : index
    %976 = memref.load %arg1[%c203] : memref<369xf32, #tpu.memory_space<smem>>
    %977 = vector.broadcast %976 : f32 to vector<8x128xf32>
    %978 = arith.mulf %264, %977 : vector<8x128xf32>
    %979 = arith.addf %975, %978 : vector<8x128xf32>
    %c211 = arith.constant 211 : index
    %980 = memref.load %arg1[%c211] : memref<369xf32, #tpu.memory_space<smem>>
    %981 = vector.broadcast %980 : f32 to vector<8x128xf32>
    %982 = arith.mulf %300, %981 : vector<8x128xf32>
    %983 = arith.addf %979, %982 : vector<8x128xf32>
    %c219 = arith.constant 219 : index
    %984 = memref.load %arg1[%c219] : memref<369xf32, #tpu.memory_space<smem>>
    %985 = vector.broadcast %984 : f32 to vector<8x128xf32>
    %986 = arith.mulf %336, %985 : vector<8x128xf32>
    %987 = arith.addf %983, %986 : vector<8x128xf32>
    %c227 = arith.constant 227 : index
    %988 = memref.load %arg1[%c227] : memref<369xf32, #tpu.memory_space<smem>>
    %989 = vector.broadcast %988 : f32 to vector<8x128xf32>
    %990 = arith.mulf %372, %989 : vector<8x128xf32>
    %991 = arith.addf %987, %990 : vector<8x128xf32>
    %c235 = arith.constant 235 : index
    %992 = memref.load %arg1[%c235] : memref<369xf32, #tpu.memory_space<smem>>
    %993 = vector.broadcast %992 : f32 to vector<8x128xf32>
    %994 = arith.mulf %408, %993 : vector<8x128xf32>
    %995 = arith.addf %991, %994 : vector<8x128xf32>
    %c243 = arith.constant 243 : index
    %996 = memref.load %arg1[%c243] : memref<369xf32, #tpu.memory_space<smem>>
    %997 = vector.broadcast %996 : f32 to vector<8x128xf32>
    %998 = arith.mulf %444, %997 : vector<8x128xf32>
    %999 = arith.addf %995, %998 : vector<8x128xf32>
    %c251 = arith.constant 251 : index
    %1000 = memref.load %arg1[%c251] : memref<369xf32, #tpu.memory_space<smem>>
    %1001 = vector.broadcast %1000 : f32 to vector<8x128xf32>
    %1002 = arith.mulf %480, %1001 : vector<8x128xf32>
    %1003 = arith.addf %999, %1002 : vector<8x128xf32>
    %c259 = arith.constant 259 : index
    %1004 = memref.load %arg1[%c259] : memref<369xf32, #tpu.memory_space<smem>>
    %1005 = vector.broadcast %1004 : f32 to vector<8x128xf32>
    %1006 = arith.mulf %516, %1005 : vector<8x128xf32>
    %1007 = arith.addf %1003, %1006 : vector<8x128xf32>
    %c267 = arith.constant 267 : index
    %1008 = memref.load %arg1[%c267] : memref<369xf32, #tpu.memory_space<smem>>
    %1009 = vector.broadcast %1008 : f32 to vector<8x128xf32>
    %1010 = arith.mulf %552, %1009 : vector<8x128xf32>
    %1011 = arith.addf %1007, %1010 : vector<8x128xf32>
    %c275 = arith.constant 275 : index
    %1012 = memref.load %arg1[%c275] : memref<369xf32, #tpu.memory_space<smem>>
    %1013 = vector.broadcast %1012 : f32 to vector<8x128xf32>
    %1014 = arith.mulf %588, %1013 : vector<8x128xf32>
    %1015 = arith.addf %1011, %1014 : vector<8x128xf32>
    %c283 = arith.constant 283 : index
    %1016 = memref.load %arg1[%c283] : memref<369xf32, #tpu.memory_space<smem>>
    %1017 = vector.broadcast %1016 : f32 to vector<8x128xf32>
    %1018 = arith.mulf %624, %1017 : vector<8x128xf32>
    %1019 = arith.addf %1015, %1018 : vector<8x128xf32>
    %c291 = arith.constant 291 : index
    %1020 = memref.load %arg1[%c291] : memref<369xf32, #tpu.memory_space<smem>>
    %1021 = vector.broadcast %1020 : f32 to vector<8x128xf32>
    %1022 = arith.mulf %660, %1021 : vector<8x128xf32>
    %1023 = arith.addf %1019, %1022 : vector<8x128xf32>
    %c299 = arith.constant 299 : index
    %1024 = memref.load %arg1[%c299] : memref<369xf32, #tpu.memory_space<smem>>
    %1025 = vector.broadcast %1024 : f32 to vector<8x128xf32>
    %1026 = arith.mulf %696, %1025 : vector<8x128xf32>
    %1027 = arith.addf %1023, %1026 : vector<8x128xf32>
    %c307 = arith.constant 307 : index
    %1028 = memref.load %arg1[%c307] : memref<369xf32, #tpu.memory_space<smem>>
    %1029 = vector.broadcast %1028 : f32 to vector<8x128xf32>
    %1030 = arith.mulf %732, %1029 : vector<8x128xf32>
    %1031 = arith.addf %1027, %1030 : vector<8x128xf32>
    %c315 = arith.constant 315 : index
    %1032 = memref.load %arg1[%c315] : memref<369xf32, #tpu.memory_space<smem>>
    %1033 = vector.broadcast %1032 : f32 to vector<8x128xf32>
    %1034 = arith.mulf %768, %1033 : vector<8x128xf32>
    %1035 = arith.addf %1031, %1034 : vector<8x128xf32>
    %c323 = arith.constant 323 : index
    %1036 = memref.load %arg1[%c323] : memref<369xf32, #tpu.memory_space<smem>>
    %1037 = vector.broadcast %1036 : f32 to vector<8x128xf32>
    %1038 = arith.addf %1035, %1037 : vector<8x128xf32>
    %cst_32 = arith.constant 0.000000e+00 : f32
    %1039 = vector.broadcast %cst_32 : f32 to vector<8x128xf32>
    %1040 = arith.maximumf %1038, %1039 : vector<8x128xf32>
    %c196 = arith.constant 196 : index
    %1041 = memref.load %arg1[%c196] : memref<369xf32, #tpu.memory_space<smem>>
    %1042 = vector.broadcast %1041 : f32 to vector<8x128xf32>
    %1043 = arith.mulf %228, %1042 : vector<8x128xf32>
    %c204 = arith.constant 204 : index
    %1044 = memref.load %arg1[%c204] : memref<369xf32, #tpu.memory_space<smem>>
    %1045 = vector.broadcast %1044 : f32 to vector<8x128xf32>
    %1046 = arith.mulf %264, %1045 : vector<8x128xf32>
    %1047 = arith.addf %1043, %1046 : vector<8x128xf32>
    %c212 = arith.constant 212 : index
    %1048 = memref.load %arg1[%c212] : memref<369xf32, #tpu.memory_space<smem>>
    %1049 = vector.broadcast %1048 : f32 to vector<8x128xf32>
    %1050 = arith.mulf %300, %1049 : vector<8x128xf32>
    %1051 = arith.addf %1047, %1050 : vector<8x128xf32>
    %c220 = arith.constant 220 : index
    %1052 = memref.load %arg1[%c220] : memref<369xf32, #tpu.memory_space<smem>>
    %1053 = vector.broadcast %1052 : f32 to vector<8x128xf32>
    %1054 = arith.mulf %336, %1053 : vector<8x128xf32>
    %1055 = arith.addf %1051, %1054 : vector<8x128xf32>
    %c228 = arith.constant 228 : index
    %1056 = memref.load %arg1[%c228] : memref<369xf32, #tpu.memory_space<smem>>
    %1057 = vector.broadcast %1056 : f32 to vector<8x128xf32>
    %1058 = arith.mulf %372, %1057 : vector<8x128xf32>
    %1059 = arith.addf %1055, %1058 : vector<8x128xf32>
    %c236 = arith.constant 236 : index
    %1060 = memref.load %arg1[%c236] : memref<369xf32, #tpu.memory_space<smem>>
    %1061 = vector.broadcast %1060 : f32 to vector<8x128xf32>
    %1062 = arith.mulf %408, %1061 : vector<8x128xf32>
    %1063 = arith.addf %1059, %1062 : vector<8x128xf32>
    %c244 = arith.constant 244 : index
    %1064 = memref.load %arg1[%c244] : memref<369xf32, #tpu.memory_space<smem>>
    %1065 = vector.broadcast %1064 : f32 to vector<8x128xf32>
    %1066 = arith.mulf %444, %1065 : vector<8x128xf32>
    %1067 = arith.addf %1063, %1066 : vector<8x128xf32>
    %c252 = arith.constant 252 : index
    %1068 = memref.load %arg1[%c252] : memref<369xf32, #tpu.memory_space<smem>>
    %1069 = vector.broadcast %1068 : f32 to vector<8x128xf32>
    %1070 = arith.mulf %480, %1069 : vector<8x128xf32>
    %1071 = arith.addf %1067, %1070 : vector<8x128xf32>
    %c260 = arith.constant 260 : index
    %1072 = memref.load %arg1[%c260] : memref<369xf32, #tpu.memory_space<smem>>
    %1073 = vector.broadcast %1072 : f32 to vector<8x128xf32>
    %1074 = arith.mulf %516, %1073 : vector<8x128xf32>
    %1075 = arith.addf %1071, %1074 : vector<8x128xf32>
    %c268 = arith.constant 268 : index
    %1076 = memref.load %arg1[%c268] : memref<369xf32, #tpu.memory_space<smem>>
    %1077 = vector.broadcast %1076 : f32 to vector<8x128xf32>
    %1078 = arith.mulf %552, %1077 : vector<8x128xf32>
    %1079 = arith.addf %1075, %1078 : vector<8x128xf32>
    %c276 = arith.constant 276 : index
    %1080 = memref.load %arg1[%c276] : memref<369xf32, #tpu.memory_space<smem>>
    %1081 = vector.broadcast %1080 : f32 to vector<8x128xf32>
    %1082 = arith.mulf %588, %1081 : vector<8x128xf32>
    %1083 = arith.addf %1079, %1082 : vector<8x128xf32>
    %c284 = arith.constant 284 : index
    %1084 = memref.load %arg1[%c284] : memref<369xf32, #tpu.memory_space<smem>>
    %1085 = vector.broadcast %1084 : f32 to vector<8x128xf32>
    %1086 = arith.mulf %624, %1085 : vector<8x128xf32>
    %1087 = arith.addf %1083, %1086 : vector<8x128xf32>
    %c292 = arith.constant 292 : index
    %1088 = memref.load %arg1[%c292] : memref<369xf32, #tpu.memory_space<smem>>
    %1089 = vector.broadcast %1088 : f32 to vector<8x128xf32>
    %1090 = arith.mulf %660, %1089 : vector<8x128xf32>
    %1091 = arith.addf %1087, %1090 : vector<8x128xf32>
    %c300 = arith.constant 300 : index
    %1092 = memref.load %arg1[%c300] : memref<369xf32, #tpu.memory_space<smem>>
    %1093 = vector.broadcast %1092 : f32 to vector<8x128xf32>
    %1094 = arith.mulf %696, %1093 : vector<8x128xf32>
    %1095 = arith.addf %1091, %1094 : vector<8x128xf32>
    %c308 = arith.constant 308 : index
    %1096 = memref.load %arg1[%c308] : memref<369xf32, #tpu.memory_space<smem>>
    %1097 = vector.broadcast %1096 : f32 to vector<8x128xf32>
    %1098 = arith.mulf %732, %1097 : vector<8x128xf32>
    %1099 = arith.addf %1095, %1098 : vector<8x128xf32>
    %c316 = arith.constant 316 : index
    %1100 = memref.load %arg1[%c316] : memref<369xf32, #tpu.memory_space<smem>>
    %1101 = vector.broadcast %1100 : f32 to vector<8x128xf32>
    %1102 = arith.mulf %768, %1101 : vector<8x128xf32>
    %1103 = arith.addf %1099, %1102 : vector<8x128xf32>
    %c324 = arith.constant 324 : index
    %1104 = memref.load %arg1[%c324] : memref<369xf32, #tpu.memory_space<smem>>
    %1105 = vector.broadcast %1104 : f32 to vector<8x128xf32>
    %1106 = arith.addf %1103, %1105 : vector<8x128xf32>
    %cst_33 = arith.constant 0.000000e+00 : f32
    %1107 = vector.broadcast %cst_33 : f32 to vector<8x128xf32>
    %1108 = arith.maximumf %1106, %1107 : vector<8x128xf32>
    %c197 = arith.constant 197 : index
    %1109 = memref.load %arg1[%c197] : memref<369xf32, #tpu.memory_space<smem>>
    %1110 = vector.broadcast %1109 : f32 to vector<8x128xf32>
    %1111 = arith.mulf %228, %1110 : vector<8x128xf32>
    %c205 = arith.constant 205 : index
    %1112 = memref.load %arg1[%c205] : memref<369xf32, #tpu.memory_space<smem>>
    %1113 = vector.broadcast %1112 : f32 to vector<8x128xf32>
    %1114 = arith.mulf %264, %1113 : vector<8x128xf32>
    %1115 = arith.addf %1111, %1114 : vector<8x128xf32>
    %c213 = arith.constant 213 : index
    %1116 = memref.load %arg1[%c213] : memref<369xf32, #tpu.memory_space<smem>>
    %1117 = vector.broadcast %1116 : f32 to vector<8x128xf32>
    %1118 = arith.mulf %300, %1117 : vector<8x128xf32>
    %1119 = arith.addf %1115, %1118 : vector<8x128xf32>
    %c221 = arith.constant 221 : index
    %1120 = memref.load %arg1[%c221] : memref<369xf32, #tpu.memory_space<smem>>
    %1121 = vector.broadcast %1120 : f32 to vector<8x128xf32>
    %1122 = arith.mulf %336, %1121 : vector<8x128xf32>
    %1123 = arith.addf %1119, %1122 : vector<8x128xf32>
    %c229 = arith.constant 229 : index
    %1124 = memref.load %arg1[%c229] : memref<369xf32, #tpu.memory_space<smem>>
    %1125 = vector.broadcast %1124 : f32 to vector<8x128xf32>
    %1126 = arith.mulf %372, %1125 : vector<8x128xf32>
    %1127 = arith.addf %1123, %1126 : vector<8x128xf32>
    %c237 = arith.constant 237 : index
    %1128 = memref.load %arg1[%c237] : memref<369xf32, #tpu.memory_space<smem>>
    %1129 = vector.broadcast %1128 : f32 to vector<8x128xf32>
    %1130 = arith.mulf %408, %1129 : vector<8x128xf32>
    %1131 = arith.addf %1127, %1130 : vector<8x128xf32>
    %c245 = arith.constant 245 : index
    %1132 = memref.load %arg1[%c245] : memref<369xf32, #tpu.memory_space<smem>>
    %1133 = vector.broadcast %1132 : f32 to vector<8x128xf32>
    %1134 = arith.mulf %444, %1133 : vector<8x128xf32>
    %1135 = arith.addf %1131, %1134 : vector<8x128xf32>
    %c253 = arith.constant 253 : index
    %1136 = memref.load %arg1[%c253] : memref<369xf32, #tpu.memory_space<smem>>
    %1137 = vector.broadcast %1136 : f32 to vector<8x128xf32>
    %1138 = arith.mulf %480, %1137 : vector<8x128xf32>
    %1139 = arith.addf %1135, %1138 : vector<8x128xf32>
    %c261 = arith.constant 261 : index
    %1140 = memref.load %arg1[%c261] : memref<369xf32, #tpu.memory_space<smem>>
    %1141 = vector.broadcast %1140 : f32 to vector<8x128xf32>
    %1142 = arith.mulf %516, %1141 : vector<8x128xf32>
    %1143 = arith.addf %1139, %1142 : vector<8x128xf32>
    %c269 = arith.constant 269 : index
    %1144 = memref.load %arg1[%c269] : memref<369xf32, #tpu.memory_space<smem>>
    %1145 = vector.broadcast %1144 : f32 to vector<8x128xf32>
    %1146 = arith.mulf %552, %1145 : vector<8x128xf32>
    %1147 = arith.addf %1143, %1146 : vector<8x128xf32>
    %c277 = arith.constant 277 : index
    %1148 = memref.load %arg1[%c277] : memref<369xf32, #tpu.memory_space<smem>>
    %1149 = vector.broadcast %1148 : f32 to vector<8x128xf32>
    %1150 = arith.mulf %588, %1149 : vector<8x128xf32>
    %1151 = arith.addf %1147, %1150 : vector<8x128xf32>
    %c285 = arith.constant 285 : index
    %1152 = memref.load %arg1[%c285] : memref<369xf32, #tpu.memory_space<smem>>
    %1153 = vector.broadcast %1152 : f32 to vector<8x128xf32>
    %1154 = arith.mulf %624, %1153 : vector<8x128xf32>
    %1155 = arith.addf %1151, %1154 : vector<8x128xf32>
    %c293 = arith.constant 293 : index
    %1156 = memref.load %arg1[%c293] : memref<369xf32, #tpu.memory_space<smem>>
    %1157 = vector.broadcast %1156 : f32 to vector<8x128xf32>
    %1158 = arith.mulf %660, %1157 : vector<8x128xf32>
    %1159 = arith.addf %1155, %1158 : vector<8x128xf32>
    %c301 = arith.constant 301 : index
    %1160 = memref.load %arg1[%c301] : memref<369xf32, #tpu.memory_space<smem>>
    %1161 = vector.broadcast %1160 : f32 to vector<8x128xf32>
    %1162 = arith.mulf %696, %1161 : vector<8x128xf32>
    %1163 = arith.addf %1159, %1162 : vector<8x128xf32>
    %c309 = arith.constant 309 : index
    %1164 = memref.load %arg1[%c309] : memref<369xf32, #tpu.memory_space<smem>>
    %1165 = vector.broadcast %1164 : f32 to vector<8x128xf32>
    %1166 = arith.mulf %732, %1165 : vector<8x128xf32>
    %1167 = arith.addf %1163, %1166 : vector<8x128xf32>
    %c317 = arith.constant 317 : index
    %1168 = memref.load %arg1[%c317] : memref<369xf32, #tpu.memory_space<smem>>
    %1169 = vector.broadcast %1168 : f32 to vector<8x128xf32>
    %1170 = arith.mulf %768, %1169 : vector<8x128xf32>
    %1171 = arith.addf %1167, %1170 : vector<8x128xf32>
    %c325 = arith.constant 325 : index
    %1172 = memref.load %arg1[%c325] : memref<369xf32, #tpu.memory_space<smem>>
    %1173 = vector.broadcast %1172 : f32 to vector<8x128xf32>
    %1174 = arith.addf %1171, %1173 : vector<8x128xf32>
    %cst_34 = arith.constant 0.000000e+00 : f32
    %1175 = vector.broadcast %cst_34 : f32 to vector<8x128xf32>
    %1176 = arith.maximumf %1174, %1175 : vector<8x128xf32>
    %c198 = arith.constant 198 : index
    %1177 = memref.load %arg1[%c198] : memref<369xf32, #tpu.memory_space<smem>>
    %1178 = vector.broadcast %1177 : f32 to vector<8x128xf32>
    %1179 = arith.mulf %228, %1178 : vector<8x128xf32>
    %c206 = arith.constant 206 : index
    %1180 = memref.load %arg1[%c206] : memref<369xf32, #tpu.memory_space<smem>>
    %1181 = vector.broadcast %1180 : f32 to vector<8x128xf32>
    %1182 = arith.mulf %264, %1181 : vector<8x128xf32>
    %1183 = arith.addf %1179, %1182 : vector<8x128xf32>
    %c214 = arith.constant 214 : index
    %1184 = memref.load %arg1[%c214] : memref<369xf32, #tpu.memory_space<smem>>
    %1185 = vector.broadcast %1184 : f32 to vector<8x128xf32>
    %1186 = arith.mulf %300, %1185 : vector<8x128xf32>
    %1187 = arith.addf %1183, %1186 : vector<8x128xf32>
    %c222 = arith.constant 222 : index
    %1188 = memref.load %arg1[%c222] : memref<369xf32, #tpu.memory_space<smem>>
    %1189 = vector.broadcast %1188 : f32 to vector<8x128xf32>
    %1190 = arith.mulf %336, %1189 : vector<8x128xf32>
    %1191 = arith.addf %1187, %1190 : vector<8x128xf32>
    %c230 = arith.constant 230 : index
    %1192 = memref.load %arg1[%c230] : memref<369xf32, #tpu.memory_space<smem>>
    %1193 = vector.broadcast %1192 : f32 to vector<8x128xf32>
    %1194 = arith.mulf %372, %1193 : vector<8x128xf32>
    %1195 = arith.addf %1191, %1194 : vector<8x128xf32>
    %c238 = arith.constant 238 : index
    %1196 = memref.load %arg1[%c238] : memref<369xf32, #tpu.memory_space<smem>>
    %1197 = vector.broadcast %1196 : f32 to vector<8x128xf32>
    %1198 = arith.mulf %408, %1197 : vector<8x128xf32>
    %1199 = arith.addf %1195, %1198 : vector<8x128xf32>
    %c246 = arith.constant 246 : index
    %1200 = memref.load %arg1[%c246] : memref<369xf32, #tpu.memory_space<smem>>
    %1201 = vector.broadcast %1200 : f32 to vector<8x128xf32>
    %1202 = arith.mulf %444, %1201 : vector<8x128xf32>
    %1203 = arith.addf %1199, %1202 : vector<8x128xf32>
    %c254 = arith.constant 254 : index
    %1204 = memref.load %arg1[%c254] : memref<369xf32, #tpu.memory_space<smem>>
    %1205 = vector.broadcast %1204 : f32 to vector<8x128xf32>
    %1206 = arith.mulf %480, %1205 : vector<8x128xf32>
    %1207 = arith.addf %1203, %1206 : vector<8x128xf32>
    %c262 = arith.constant 262 : index
    %1208 = memref.load %arg1[%c262] : memref<369xf32, #tpu.memory_space<smem>>
    %1209 = vector.broadcast %1208 : f32 to vector<8x128xf32>
    %1210 = arith.mulf %516, %1209 : vector<8x128xf32>
    %1211 = arith.addf %1207, %1210 : vector<8x128xf32>
    %c270 = arith.constant 270 : index
    %1212 = memref.load %arg1[%c270] : memref<369xf32, #tpu.memory_space<smem>>
    %1213 = vector.broadcast %1212 : f32 to vector<8x128xf32>
    %1214 = arith.mulf %552, %1213 : vector<8x128xf32>
    %1215 = arith.addf %1211, %1214 : vector<8x128xf32>
    %c278 = arith.constant 278 : index
    %1216 = memref.load %arg1[%c278] : memref<369xf32, #tpu.memory_space<smem>>
    %1217 = vector.broadcast %1216 : f32 to vector<8x128xf32>
    %1218 = arith.mulf %588, %1217 : vector<8x128xf32>
    %1219 = arith.addf %1215, %1218 : vector<8x128xf32>
    %c286 = arith.constant 286 : index
    %1220 = memref.load %arg1[%c286] : memref<369xf32, #tpu.memory_space<smem>>
    %1221 = vector.broadcast %1220 : f32 to vector<8x128xf32>
    %1222 = arith.mulf %624, %1221 : vector<8x128xf32>
    %1223 = arith.addf %1219, %1222 : vector<8x128xf32>
    %c294 = arith.constant 294 : index
    %1224 = memref.load %arg1[%c294] : memref<369xf32, #tpu.memory_space<smem>>
    %1225 = vector.broadcast %1224 : f32 to vector<8x128xf32>
    %1226 = arith.mulf %660, %1225 : vector<8x128xf32>
    %1227 = arith.addf %1223, %1226 : vector<8x128xf32>
    %c302 = arith.constant 302 : index
    %1228 = memref.load %arg1[%c302] : memref<369xf32, #tpu.memory_space<smem>>
    %1229 = vector.broadcast %1228 : f32 to vector<8x128xf32>
    %1230 = arith.mulf %696, %1229 : vector<8x128xf32>
    %1231 = arith.addf %1227, %1230 : vector<8x128xf32>
    %c310 = arith.constant 310 : index
    %1232 = memref.load %arg1[%c310] : memref<369xf32, #tpu.memory_space<smem>>
    %1233 = vector.broadcast %1232 : f32 to vector<8x128xf32>
    %1234 = arith.mulf %732, %1233 : vector<8x128xf32>
    %1235 = arith.addf %1231, %1234 : vector<8x128xf32>
    %c318 = arith.constant 318 : index
    %1236 = memref.load %arg1[%c318] : memref<369xf32, #tpu.memory_space<smem>>
    %1237 = vector.broadcast %1236 : f32 to vector<8x128xf32>
    %1238 = arith.mulf %768, %1237 : vector<8x128xf32>
    %1239 = arith.addf %1235, %1238 : vector<8x128xf32>
    %c326 = arith.constant 326 : index
    %1240 = memref.load %arg1[%c326] : memref<369xf32, #tpu.memory_space<smem>>
    %1241 = vector.broadcast %1240 : f32 to vector<8x128xf32>
    %1242 = arith.addf %1239, %1241 : vector<8x128xf32>
    %cst_35 = arith.constant 0.000000e+00 : f32
    %1243 = vector.broadcast %cst_35 : f32 to vector<8x128xf32>
    %1244 = arith.maximumf %1242, %1243 : vector<8x128xf32>
    %c199 = arith.constant 199 : index
    %1245 = memref.load %arg1[%c199] : memref<369xf32, #tpu.memory_space<smem>>
    %1246 = vector.broadcast %1245 : f32 to vector<8x128xf32>
    %1247 = arith.mulf %228, %1246 : vector<8x128xf32>
    %c207 = arith.constant 207 : index
    %1248 = memref.load %arg1[%c207] : memref<369xf32, #tpu.memory_space<smem>>
    %1249 = vector.broadcast %1248 : f32 to vector<8x128xf32>
    %1250 = arith.mulf %264, %1249 : vector<8x128xf32>
    %1251 = arith.addf %1247, %1250 : vector<8x128xf32>
    %c215 = arith.constant 215 : index
    %1252 = memref.load %arg1[%c215] : memref<369xf32, #tpu.memory_space<smem>>
    %1253 = vector.broadcast %1252 : f32 to vector<8x128xf32>
    %1254 = arith.mulf %300, %1253 : vector<8x128xf32>
    %1255 = arith.addf %1251, %1254 : vector<8x128xf32>
    %c223 = arith.constant 223 : index
    %1256 = memref.load %arg1[%c223] : memref<369xf32, #tpu.memory_space<smem>>
    %1257 = vector.broadcast %1256 : f32 to vector<8x128xf32>
    %1258 = arith.mulf %336, %1257 : vector<8x128xf32>
    %1259 = arith.addf %1255, %1258 : vector<8x128xf32>
    %c231 = arith.constant 231 : index
    %1260 = memref.load %arg1[%c231] : memref<369xf32, #tpu.memory_space<smem>>
    %1261 = vector.broadcast %1260 : f32 to vector<8x128xf32>
    %1262 = arith.mulf %372, %1261 : vector<8x128xf32>
    %1263 = arith.addf %1259, %1262 : vector<8x128xf32>
    %c239 = arith.constant 239 : index
    %1264 = memref.load %arg1[%c239] : memref<369xf32, #tpu.memory_space<smem>>
    %1265 = vector.broadcast %1264 : f32 to vector<8x128xf32>
    %1266 = arith.mulf %408, %1265 : vector<8x128xf32>
    %1267 = arith.addf %1263, %1266 : vector<8x128xf32>
    %c247 = arith.constant 247 : index
    %1268 = memref.load %arg1[%c247] : memref<369xf32, #tpu.memory_space<smem>>
    %1269 = vector.broadcast %1268 : f32 to vector<8x128xf32>
    %1270 = arith.mulf %444, %1269 : vector<8x128xf32>
    %1271 = arith.addf %1267, %1270 : vector<8x128xf32>
    %c255 = arith.constant 255 : index
    %1272 = memref.load %arg1[%c255] : memref<369xf32, #tpu.memory_space<smem>>
    %1273 = vector.broadcast %1272 : f32 to vector<8x128xf32>
    %1274 = arith.mulf %480, %1273 : vector<8x128xf32>
    %1275 = arith.addf %1271, %1274 : vector<8x128xf32>
    %c263 = arith.constant 263 : index
    %1276 = memref.load %arg1[%c263] : memref<369xf32, #tpu.memory_space<smem>>
    %1277 = vector.broadcast %1276 : f32 to vector<8x128xf32>
    %1278 = arith.mulf %516, %1277 : vector<8x128xf32>
    %1279 = arith.addf %1275, %1278 : vector<8x128xf32>
    %c271 = arith.constant 271 : index
    %1280 = memref.load %arg1[%c271] : memref<369xf32, #tpu.memory_space<smem>>
    %1281 = vector.broadcast %1280 : f32 to vector<8x128xf32>
    %1282 = arith.mulf %552, %1281 : vector<8x128xf32>
    %1283 = arith.addf %1279, %1282 : vector<8x128xf32>
    %c279 = arith.constant 279 : index
    %1284 = memref.load %arg1[%c279] : memref<369xf32, #tpu.memory_space<smem>>
    %1285 = vector.broadcast %1284 : f32 to vector<8x128xf32>
    %1286 = arith.mulf %588, %1285 : vector<8x128xf32>
    %1287 = arith.addf %1283, %1286 : vector<8x128xf32>
    %c287 = arith.constant 287 : index
    %1288 = memref.load %arg1[%c287] : memref<369xf32, #tpu.memory_space<smem>>
    %1289 = vector.broadcast %1288 : f32 to vector<8x128xf32>
    %1290 = arith.mulf %624, %1289 : vector<8x128xf32>
    %1291 = arith.addf %1287, %1290 : vector<8x128xf32>
    %c295 = arith.constant 295 : index
    %1292 = memref.load %arg1[%c295] : memref<369xf32, #tpu.memory_space<smem>>
    %1293 = vector.broadcast %1292 : f32 to vector<8x128xf32>
    %1294 = arith.mulf %660, %1293 : vector<8x128xf32>
    %1295 = arith.addf %1291, %1294 : vector<8x128xf32>
    %c303 = arith.constant 303 : index
    %1296 = memref.load %arg1[%c303] : memref<369xf32, #tpu.memory_space<smem>>
    %1297 = vector.broadcast %1296 : f32 to vector<8x128xf32>
    %1298 = arith.mulf %696, %1297 : vector<8x128xf32>
    %1299 = arith.addf %1295, %1298 : vector<8x128xf32>
    %c311 = arith.constant 311 : index
    %1300 = memref.load %arg1[%c311] : memref<369xf32, #tpu.memory_space<smem>>
    %1301 = vector.broadcast %1300 : f32 to vector<8x128xf32>
    %1302 = arith.mulf %732, %1301 : vector<8x128xf32>
    %1303 = arith.addf %1299, %1302 : vector<8x128xf32>
    %c319 = arith.constant 319 : index
    %1304 = memref.load %arg1[%c319] : memref<369xf32, #tpu.memory_space<smem>>
    %1305 = vector.broadcast %1304 : f32 to vector<8x128xf32>
    %1306 = arith.mulf %768, %1305 : vector<8x128xf32>
    %1307 = arith.addf %1303, %1306 : vector<8x128xf32>
    %c327 = arith.constant 327 : index
    %1308 = memref.load %arg1[%c327] : memref<369xf32, #tpu.memory_space<smem>>
    %1309 = vector.broadcast %1308 : f32 to vector<8x128xf32>
    %1310 = arith.addf %1307, %1309 : vector<8x128xf32>
    %cst_36 = arith.constant 0.000000e+00 : f32
    %1311 = vector.broadcast %cst_36 : f32 to vector<8x128xf32>
    %1312 = arith.maximumf %1310, %1311 : vector<8x128xf32>
    %c328 = arith.constant 328 : index
    %1313 = memref.load %arg1[%c328] : memref<369xf32, #tpu.memory_space<smem>>
    %1314 = vector.broadcast %1313 : f32 to vector<8x128xf32>
    %1315 = arith.mulf %836, %1314 : vector<8x128xf32>
    %c332 = arith.constant 332 : index
    %1316 = memref.load %arg1[%c332] : memref<369xf32, #tpu.memory_space<smem>>
    %1317 = vector.broadcast %1316 : f32 to vector<8x128xf32>
    %1318 = arith.mulf %904, %1317 : vector<8x128xf32>
    %1319 = arith.addf %1315, %1318 : vector<8x128xf32>
    %c336 = arith.constant 336 : index
    %1320 = memref.load %arg1[%c336] : memref<369xf32, #tpu.memory_space<smem>>
    %1321 = vector.broadcast %1320 : f32 to vector<8x128xf32>
    %1322 = arith.mulf %972, %1321 : vector<8x128xf32>
    %1323 = arith.addf %1319, %1322 : vector<8x128xf32>
    %c340 = arith.constant 340 : index
    %1324 = memref.load %arg1[%c340] : memref<369xf32, #tpu.memory_space<smem>>
    %1325 = vector.broadcast %1324 : f32 to vector<8x128xf32>
    %1326 = arith.mulf %1040, %1325 : vector<8x128xf32>
    %1327 = arith.addf %1323, %1326 : vector<8x128xf32>
    %c344 = arith.constant 344 : index
    %1328 = memref.load %arg1[%c344] : memref<369xf32, #tpu.memory_space<smem>>
    %1329 = vector.broadcast %1328 : f32 to vector<8x128xf32>
    %1330 = arith.mulf %1108, %1329 : vector<8x128xf32>
    %1331 = arith.addf %1327, %1330 : vector<8x128xf32>
    %c348 = arith.constant 348 : index
    %1332 = memref.load %arg1[%c348] : memref<369xf32, #tpu.memory_space<smem>>
    %1333 = vector.broadcast %1332 : f32 to vector<8x128xf32>
    %1334 = arith.mulf %1176, %1333 : vector<8x128xf32>
    %1335 = arith.addf %1331, %1334 : vector<8x128xf32>
    %c352 = arith.constant 352 : index
    %1336 = memref.load %arg1[%c352] : memref<369xf32, #tpu.memory_space<smem>>
    %1337 = vector.broadcast %1336 : f32 to vector<8x128xf32>
    %1338 = arith.mulf %1244, %1337 : vector<8x128xf32>
    %1339 = arith.addf %1335, %1338 : vector<8x128xf32>
    %c356 = arith.constant 356 : index
    %1340 = memref.load %arg1[%c356] : memref<369xf32, #tpu.memory_space<smem>>
    %1341 = vector.broadcast %1340 : f32 to vector<8x128xf32>
    %1342 = arith.mulf %1312, %1341 : vector<8x128xf32>
    %1343 = arith.addf %1339, %1342 : vector<8x128xf32>
    %c360 = arith.constant 360 : index
    %1344 = memref.load %arg1[%c360] : memref<369xf32, #tpu.memory_space<smem>>
    %1345 = vector.broadcast %1344 : f32 to vector<8x128xf32>
    %1346 = arith.addf %1343, %1345 : vector<8x128xf32>
    %cst_37 = arith.constant 0.000000e+00 : f32
    %1347 = vector.broadcast %cst_37 : f32 to vector<8x128xf32>
    %1348 = arith.maximumf %1346, %1347 : vector<8x128xf32>
    %c329 = arith.constant 329 : index
    %1349 = memref.load %arg1[%c329] : memref<369xf32, #tpu.memory_space<smem>>
    %1350 = vector.broadcast %1349 : f32 to vector<8x128xf32>
    %1351 = arith.mulf %836, %1350 : vector<8x128xf32>
    %c333 = arith.constant 333 : index
    %1352 = memref.load %arg1[%c333] : memref<369xf32, #tpu.memory_space<smem>>
    %1353 = vector.broadcast %1352 : f32 to vector<8x128xf32>
    %1354 = arith.mulf %904, %1353 : vector<8x128xf32>
    %1355 = arith.addf %1351, %1354 : vector<8x128xf32>
    %c337 = arith.constant 337 : index
    %1356 = memref.load %arg1[%c337] : memref<369xf32, #tpu.memory_space<smem>>
    %1357 = vector.broadcast %1356 : f32 to vector<8x128xf32>
    %1358 = arith.mulf %972, %1357 : vector<8x128xf32>
    %1359 = arith.addf %1355, %1358 : vector<8x128xf32>
    %c341 = arith.constant 341 : index
    %1360 = memref.load %arg1[%c341] : memref<369xf32, #tpu.memory_space<smem>>
    %1361 = vector.broadcast %1360 : f32 to vector<8x128xf32>
    %1362 = arith.mulf %1040, %1361 : vector<8x128xf32>
    %1363 = arith.addf %1359, %1362 : vector<8x128xf32>
    %c345 = arith.constant 345 : index
    %1364 = memref.load %arg1[%c345] : memref<369xf32, #tpu.memory_space<smem>>
    %1365 = vector.broadcast %1364 : f32 to vector<8x128xf32>
    %1366 = arith.mulf %1108, %1365 : vector<8x128xf32>
    %1367 = arith.addf %1363, %1366 : vector<8x128xf32>
    %c349 = arith.constant 349 : index
    %1368 = memref.load %arg1[%c349] : memref<369xf32, #tpu.memory_space<smem>>
    %1369 = vector.broadcast %1368 : f32 to vector<8x128xf32>
    %1370 = arith.mulf %1176, %1369 : vector<8x128xf32>
    %1371 = arith.addf %1367, %1370 : vector<8x128xf32>
    %c353 = arith.constant 353 : index
    %1372 = memref.load %arg1[%c353] : memref<369xf32, #tpu.memory_space<smem>>
    %1373 = vector.broadcast %1372 : f32 to vector<8x128xf32>
    %1374 = arith.mulf %1244, %1373 : vector<8x128xf32>
    %1375 = arith.addf %1371, %1374 : vector<8x128xf32>
    %c357 = arith.constant 357 : index
    %1376 = memref.load %arg1[%c357] : memref<369xf32, #tpu.memory_space<smem>>
    %1377 = vector.broadcast %1376 : f32 to vector<8x128xf32>
    %1378 = arith.mulf %1312, %1377 : vector<8x128xf32>
    %1379 = arith.addf %1375, %1378 : vector<8x128xf32>
    %c361 = arith.constant 361 : index
    %1380 = memref.load %arg1[%c361] : memref<369xf32, #tpu.memory_space<smem>>
    %1381 = vector.broadcast %1380 : f32 to vector<8x128xf32>
    %1382 = arith.addf %1379, %1381 : vector<8x128xf32>
    %cst_38 = arith.constant 0.000000e+00 : f32
    %1383 = vector.broadcast %cst_38 : f32 to vector<8x128xf32>
    %1384 = arith.maximumf %1382, %1383 : vector<8x128xf32>
    %c330 = arith.constant 330 : index
    %1385 = memref.load %arg1[%c330] : memref<369xf32, #tpu.memory_space<smem>>
    %1386 = vector.broadcast %1385 : f32 to vector<8x128xf32>
    %1387 = arith.mulf %836, %1386 : vector<8x128xf32>
    %c334 = arith.constant 334 : index
    %1388 = memref.load %arg1[%c334] : memref<369xf32, #tpu.memory_space<smem>>
    %1389 = vector.broadcast %1388 : f32 to vector<8x128xf32>
    %1390 = arith.mulf %904, %1389 : vector<8x128xf32>
    %1391 = arith.addf %1387, %1390 : vector<8x128xf32>
    %c338 = arith.constant 338 : index
    %1392 = memref.load %arg1[%c338] : memref<369xf32, #tpu.memory_space<smem>>
    %1393 = vector.broadcast %1392 : f32 to vector<8x128xf32>
    %1394 = arith.mulf %972, %1393 : vector<8x128xf32>
    %1395 = arith.addf %1391, %1394 : vector<8x128xf32>
    %c342 = arith.constant 342 : index
    %1396 = memref.load %arg1[%c342] : memref<369xf32, #tpu.memory_space<smem>>
    %1397 = vector.broadcast %1396 : f32 to vector<8x128xf32>
    %1398 = arith.mulf %1040, %1397 : vector<8x128xf32>
    %1399 = arith.addf %1395, %1398 : vector<8x128xf32>
    %c346 = arith.constant 346 : index
    %1400 = memref.load %arg1[%c346] : memref<369xf32, #tpu.memory_space<smem>>
    %1401 = vector.broadcast %1400 : f32 to vector<8x128xf32>
    %1402 = arith.mulf %1108, %1401 : vector<8x128xf32>
    %1403 = arith.addf %1399, %1402 : vector<8x128xf32>
    %c350 = arith.constant 350 : index
    %1404 = memref.load %arg1[%c350] : memref<369xf32, #tpu.memory_space<smem>>
    %1405 = vector.broadcast %1404 : f32 to vector<8x128xf32>
    %1406 = arith.mulf %1176, %1405 : vector<8x128xf32>
    %1407 = arith.addf %1403, %1406 : vector<8x128xf32>
    %c354 = arith.constant 354 : index
    %1408 = memref.load %arg1[%c354] : memref<369xf32, #tpu.memory_space<smem>>
    %1409 = vector.broadcast %1408 : f32 to vector<8x128xf32>
    %1410 = arith.mulf %1244, %1409 : vector<8x128xf32>
    %1411 = arith.addf %1407, %1410 : vector<8x128xf32>
    %c358 = arith.constant 358 : index
    %1412 = memref.load %arg1[%c358] : memref<369xf32, #tpu.memory_space<smem>>
    %1413 = vector.broadcast %1412 : f32 to vector<8x128xf32>
    %1414 = arith.mulf %1312, %1413 : vector<8x128xf32>
    %1415 = arith.addf %1411, %1414 : vector<8x128xf32>
    %c362 = arith.constant 362 : index
    %1416 = memref.load %arg1[%c362] : memref<369xf32, #tpu.memory_space<smem>>
    %1417 = vector.broadcast %1416 : f32 to vector<8x128xf32>
    %1418 = arith.addf %1415, %1417 : vector<8x128xf32>
    %cst_39 = arith.constant 0.000000e+00 : f32
    %1419 = vector.broadcast %cst_39 : f32 to vector<8x128xf32>
    %1420 = arith.maximumf %1418, %1419 : vector<8x128xf32>
    %c331 = arith.constant 331 : index
    %1421 = memref.load %arg1[%c331] : memref<369xf32, #tpu.memory_space<smem>>
    %1422 = vector.broadcast %1421 : f32 to vector<8x128xf32>
    %1423 = arith.mulf %836, %1422 : vector<8x128xf32>
    %c335 = arith.constant 335 : index
    %1424 = memref.load %arg1[%c335] : memref<369xf32, #tpu.memory_space<smem>>
    %1425 = vector.broadcast %1424 : f32 to vector<8x128xf32>
    %1426 = arith.mulf %904, %1425 : vector<8x128xf32>
    %1427 = arith.addf %1423, %1426 : vector<8x128xf32>
    %c339 = arith.constant 339 : index
    %1428 = memref.load %arg1[%c339] : memref<369xf32, #tpu.memory_space<smem>>
    %1429 = vector.broadcast %1428 : f32 to vector<8x128xf32>
    %1430 = arith.mulf %972, %1429 : vector<8x128xf32>
    %1431 = arith.addf %1427, %1430 : vector<8x128xf32>
    %c343 = arith.constant 343 : index
    %1432 = memref.load %arg1[%c343] : memref<369xf32, #tpu.memory_space<smem>>
    %1433 = vector.broadcast %1432 : f32 to vector<8x128xf32>
    %1434 = arith.mulf %1040, %1433 : vector<8x128xf32>
    %1435 = arith.addf %1431, %1434 : vector<8x128xf32>
    %c347 = arith.constant 347 : index
    %1436 = memref.load %arg1[%c347] : memref<369xf32, #tpu.memory_space<smem>>
    %1437 = vector.broadcast %1436 : f32 to vector<8x128xf32>
    %1438 = arith.mulf %1108, %1437 : vector<8x128xf32>
    %1439 = arith.addf %1435, %1438 : vector<8x128xf32>
    %c351 = arith.constant 351 : index
    %1440 = memref.load %arg1[%c351] : memref<369xf32, #tpu.memory_space<smem>>
    %1441 = vector.broadcast %1440 : f32 to vector<8x128xf32>
    %1442 = arith.mulf %1176, %1441 : vector<8x128xf32>
    %1443 = arith.addf %1439, %1442 : vector<8x128xf32>
    %c355 = arith.constant 355 : index
    %1444 = memref.load %arg1[%c355] : memref<369xf32, #tpu.memory_space<smem>>
    %1445 = vector.broadcast %1444 : f32 to vector<8x128xf32>
    %1446 = arith.mulf %1244, %1445 : vector<8x128xf32>
    %1447 = arith.addf %1443, %1446 : vector<8x128xf32>
    %c359 = arith.constant 359 : index
    %1448 = memref.load %arg1[%c359] : memref<369xf32, #tpu.memory_space<smem>>
    %1449 = vector.broadcast %1448 : f32 to vector<8x128xf32>
    %1450 = arith.mulf %1312, %1449 : vector<8x128xf32>
    %1451 = arith.addf %1447, %1450 : vector<8x128xf32>
    %c363 = arith.constant 363 : index
    %1452 = memref.load %arg1[%c363] : memref<369xf32, #tpu.memory_space<smem>>
    %1453 = vector.broadcast %1452 : f32 to vector<8x128xf32>
    %1454 = arith.addf %1451, %1453 : vector<8x128xf32>
    %cst_40 = arith.constant 0.000000e+00 : f32
    %1455 = vector.broadcast %cst_40 : f32 to vector<8x128xf32>
    %1456 = arith.maximumf %1454, %1455 : vector<8x128xf32>
    %c364 = arith.constant 364 : index
    %1457 = memref.load %arg1[%c364] : memref<369xf32, #tpu.memory_space<smem>>
    %1458 = vector.broadcast %1457 : f32 to vector<8x128xf32>
    %1459 = arith.mulf %1348, %1458 : vector<8x128xf32>
    %c365 = arith.constant 365 : index
    %1460 = memref.load %arg1[%c365] : memref<369xf32, #tpu.memory_space<smem>>
    %1461 = vector.broadcast %1460 : f32 to vector<8x128xf32>
    %1462 = arith.mulf %1384, %1461 : vector<8x128xf32>
    %1463 = arith.addf %1459, %1462 : vector<8x128xf32>
    %c366 = arith.constant 366 : index
    %1464 = memref.load %arg1[%c366] : memref<369xf32, #tpu.memory_space<smem>>
    %1465 = vector.broadcast %1464 : f32 to vector<8x128xf32>
    %1466 = arith.mulf %1420, %1465 : vector<8x128xf32>
    %1467 = arith.addf %1463, %1466 : vector<8x128xf32>
    %c367 = arith.constant 367 : index
    %1468 = memref.load %arg1[%c367] : memref<369xf32, #tpu.memory_space<smem>>
    %1469 = vector.broadcast %1468 : f32 to vector<8x128xf32>
    %1470 = arith.mulf %1456, %1469 : vector<8x128xf32>
    %1471 = arith.addf %1467, %1470 : vector<8x128xf32>
    %c368 = arith.constant 368 : index
    %1472 = memref.load %arg1[%c368] : memref<369xf32, #tpu.memory_space<smem>>
    %1473 = vector.broadcast %1472 : f32 to vector<8x128xf32>
    %1474 = arith.addf %1471, %1473 : vector<8x128xf32>
    %c0_41 = arith.constant 0 : index
    %c0_42 = arith.constant 0 : index
    %1475 = vector.load %arg3[%c0_41, %c0_42] : memref<8x128xf32, #tpu.memory_space<vmem>>, vector<8x128xf32>
    tpu.vector_store %arg3[%c0_41, %c0_42], %1474 {strides = array<i32>} : memref<8x128xf32, #tpu.memory_space<vmem>>, vector<8x128xf32>,
    return
  }
  func.func @transform_0(%arg0: i32) -> i32 {
    %c0_i32 = arith.constant 0 : i32
    %c0_i32_0 = arith.constant 0 : i32
    return %c0_i32 : i32
  }
  func.func @transform_1(%arg0: i32) -> (i32, i32) {
    %c0_i32 = arith.constant 0 : i32
    %c0_i32_0 = arith.constant 0 : i32
    return %arg0, %c0_i32 : i32, i32
  }
  func.func @transform_2(%arg0: i32) -> (i32, i32) {
    %c0_i32 = arith.constant 0 : i32
    %c0_i32_0 = arith.constant 0 : i32
    return %arg0, %c0_i32 : i32, i32
  }
}

</mosaic_0001>

<bundles_post_ra>
// kernel: tpu_custom_call.1
= control target key start
LH: loop header
LB: loop body
LE: loop exit
PB: predicated region body
PF: predicated region fallthrough
CT: control target
= control target key end

     0   :  { %7 = vsyncpa [#allocation5], 0  ;;  %s4030_s0 = inlined_call_operand.hbm [shape: f32[369], index: 0, kind: input, shape index: {}]   ;;  %s4031_s1 = inlined_call_operand.hbm [shape: f32[16,128], index: 1, kind: input, shape index: {}]   ;;  %s4032_s2 = inlined_call_operand.hbm [shape: f32[16,128], index: 2, kind: output, shape index: {}]  }
   0x1   :  { %8 = vsyncpa [#allocation3], 0 }
   0x2   :  { %10 = vsyncpa [#allocation3 + $0x1], 0 }
   0x3   :  { %11 = vsyncpa [#allocation4], 0 }
   0x4   :  { %13 = vsyncpa [#allocation4 + $0x1], 0  ;;  %s2275_s9 = smov 0   ;;  %s2277_s10 = smov 0  }
   0x5   :  { %s2279_s11 = smov 0   ;;  %s2281_s12 = smov 0  }
   0x6 LB: > { %s2296_s13 = sadd.s32 4294967295, %s2255_s12   ;;  %s1703_s14 = sadd.s32 4294967294, %s2255_s12   ;;  %s2255_s12 = sphi %s2281_s12, %s4057_s12   ;;  %s2251_s11 = sphi %s2279_s11, %s4056_s11   ;;  %s2247_s10 = sphi %s2277_s10, %s4055_s10   ;;  %s2243_s9 = sphi %s2275_s9, %s4054_s9  }
   0x7   : > { %p60_p0 = scmp.ne.s32.totalorder %s2247_s10, %s2243_s9  ;;  %p4033_p1 = scmp.eq.s32.totalorder %s2296_s13, 0 }
   0x8   : > { %p90_p3 = scmp.eq.s32.totalorder %s1703_s14, 1  ;;  %p1704_p5 = scmp.ge.s32.totalorder %s2255_s12, 1 }
   0x9   : > { %p2305_p4 = por %p4033_p1, %p60_p0  ;;  %p97_p7 = scmp.lt.s32.totalorder %s2255_s12, 3 }
   0xa   : > { %p2310_p6 = por %p90_p3, %p60_p0  ;;  %s2321_s18 = sadd.s32 1, %s2255_s12  }
   0xb   : > { %s4037_s15 = scalar_select %p2305_p4, 1, 0 }
   0xc   : > { %s4038_s16 = scalar_select %p2310_p6, 1, 0 }
   0xd   : > { %p2315_p8 = pnand %p1704_p5, %p97_p7  ;;  %s44_s19 = ssub.s32 %s2255_s12, %s2321_s18 }
   0xe   : > { %s47_s20 = sadd.s32 1, %s2251_s11  ;;  %p2334_p12 = scmp.eq.s32.totalorder %s44_s19, 0 }
   0xf   : > { %p2093_p10 = pneg %p2315_p8  ;;  %p54_p13 = scmp.ne.s32.totalorder %s2251_s11, %s2247_s10 }
  0x10   : > { %s2142_s25 = scalar_lea.hbm %s4030_s0, 48  ;;  %s2147_s30 = scalar_lea.hbm %s4030_s0, 64 }
  0x11   : > { %p2330_p11 = pnand %p2093_p10, %p4033_p1  ;;  %p2143_p5 = scmp.ne.s32.totalorder %s4030_s0, %s2142_s25 }
  0x12   : > { %p2148_p1 = scmp.lt.u32.totalorder %s2147_s30, %s2142_s25  ;;  %p2149_p3 = scmp.lt.u32.totalorder %s2142_s25, %s4030_s0 }
  0x13   : > { %p2144_p7 = pneg %p2330_p11 }
  0x14   : > { %p2150_p2 = por %p2149_p3, %p2148_p1 }
  0x15   : > { %p2145_p10 = pnand %p2144_p7, %p2143_p5 }
  0x17   : > { %p2146_p9 = pneg %p2145_p10 }
  0x19   : > { %p2151_p0 = pnand %p2150_p2, %p2146_p9 }
  0x1b   : > { %2154 = shalt.err (!%p2151_p0)
}
  0x1c   : > { %s2257_s5 = smov [#allocation2]   ;;  %p4042_p1 = scmp.eq.s32.totalorder %s2255_s12, 0 }
  0x1d   : > { %2096 = dma.hbm_to_smem (!%p2330_p11), %s4030_s0, 48, %s2257_s5, [#allocation5]  }
  0x1e   : > { %s2364_s8 = scalar_select %p2334_p12, %s2251_s11, %s47_s20  }
  0x1f   : > { %p56_p2 = por %p4042_p1, %p54_p13  ;;  %p4043_p9 = scmp.eq.s32.totalorder %s2296_s13, 1 }
  0x20   : > { %s119_s19 = sand.u32 1, %s2251_s11   ;;  %s1708_s21 = sshll.u32 %s2255_s12, 7 }
  0x21   : > { %p2376_p0 = por %p4043_p9, %p54_p13  ;;  %s1707_s23 = sshll.u32 %s119_s19, 3 }
  0x22   : > { %s2385_s26 = scalar_lea.hbm %s4031_s1, %s1708_s21  ;;  %s123_s20 = scalar_lea.vmem [#allocation6], %s1707_s23 }
  0x23   : > { %s4044_s14 = scalar_select %p2376_p0, 1, 0 }
  0x24   : > { %s130_s22 = sshll.u32 %s123_s20, 4  ;;  %p4045_p11 = scmp.lt.s32.totalorder %s2255_s12, 2  ;;  %s2393_s22 = int_to_ptr.vmem [resolvable:$true] %s130_s22 }
  0x25   : > { %s120_s28 = scalar_lea.sflag [#allocation3], %s119_s19  ;;  %s2155_s29 = scalar_lea.hbm %s2385_s26, 128 }
  0x26   : > { %p2389_p12 = pnand %p4045_p11, %p56_p2  ;;  %p2156_p13 = scmp.ne.s32.totalorder %s2385_s26, %s2155_s29 }
  0x27   : > { %s2160_s4 = scalar_lea.hbm %s4031_s1, 256  ;;  %p2161_p10 = scmp.lt.u32.totalorder %s2385_s26, %s4031_s1 }
  0x28   : > { %p2157_p3 = pneg %p2389_p12  ;;  %p2162_p1 = scmp.lt.u32.totalorder %s2160_s4, %s2155_s29 }
  0x29   : > { %p2164_p9 = scmp.lt.u32.totalorder %s2155_s29, %s2385_s26 }
  0x2a   : > { %p2158_p5 = pnand %p2157_p3, %p2156_p13  ;;  %p2163_p2 = por %p2162_p1, %p2161_p10 }
  0x2c   : > { %p2159_p7 = pneg %p2158_p5  ;;  %p2165_p11 = por %p2164_p9, %p2163_p2 }
  0x2e   : > { %p2166_p6 = pnand %p2165_p11, %p2159_p7 }
  0x30   : > { %2169 = shalt.err (!%p2166_p6)
}
  0x31   : > { %s2170_s7 = scalar_lea.vmem %s2393_s22, 128  ;;  %s2258_s19 = smov [#allocation6]  }
  0x32   : > { %p2171_p13 = scmp.ne.s32.totalorder %s2393_s22, %s2170_s7  ;;  %s2175_s21 = sshll.u32 %s2258_s19, 4  ;;  %s2176_s21 = int_to_ptr.vmem [resolvable:$false] %s2175_s21 }
  0x33   : > { %s2177_s23 = scalar_lea.vmem %s2176_s21, 256  ;;  %p2178_p4 = scmp.lt.s32.totalorder %s2393_s22, %s2176_s21 }
  0x34   : > { %p2173_p5 = pnand %p2171_p13, %p2157_p3  ;;  %p2179_p10 = scmp.lt.s32.totalorder %s2177_s23, %s2170_s7 }
  0x36   : > { %p2174_p0 = pneg %p2173_p5  ;;  %p2180_p1 = por %p2179_p10, %p2178_p4 }
  0x38   : > { %p2181_p2 = pnand %p2180_p1, %p2174_p0 }
  0x3a   : > { %2184 = shalt.err (!%p2181_p2)
}
  0x3b   : > { %2100 = dma.hbm_to_vmem [thread:$0]  (!%p2389_p12), %s2385_s26, 128, %s2393_s22, %s120_s28  }
  0x3c   : > { %139 = sbr.rel (%p2315_p8) target bundleno = 372 (0x174), region = 28  ;;  %p4047_p6 = scmp.eq.s32.totalorder (!%p2315_p8), %s2296_s13, 0 }
  0x43   : > { %2230 = dma.done.wait (%p4047_p6), [#allocation5], 48   ;;  %p4048_p3 = pmov %p4047_p6 }
  0x44   : > { %s2427_s24 = sand.u32 1, %s2247_s10   ;;  %p4049_p4 = scmp.ne.s32.totalorder %s4037_s15, 0 }
  0x45   : > { %2232 = vsyncadd (%p4048_p3), [#allocation5], 4294967248  ;;  %s4036_s25 = sshll.u32 %s2427_s24, 3  ;;  %s146_s20 = scalar_lea.sflag [#allocation3], %s2427_s24 }
  0x46   : > { %s149_s26 = scalar_lea.vmem [#allocation6], %s4036_s25 }
  0x47   : > { %2234 = dma.done.wait (%p4049_p4), %s146_s20, 128  }
  0x48   : > { %2236 = vsyncadd (%p4049_p4), %s146_s20, 4294967168 }
  0x49   : > { %154 = sfence }
  0x4a   : > { %s172_s17 = sld [smem:[#allocation2]]  ;;  %s1713_s22 = sld [smem:[#allocation2 + $0x4]]  ;;  %v171_v0 = vld [vmem:[%s149_s26] sm:$0xff] }
  0x4b   : > { %s1714_s27 = sld [smem:[#allocation2 + $0x1]]  ;;  %s1715_s28 = sld [smem:[#allocation2 + $0x5]] }
  0x4c   : > { %s1716_s29 = sld [smem:[#allocation2 + $0x2]]  ;;  %s2437_s30 = sld [smem:[#allocation2 + $0x6]] }
  0x4d   : > { %s1718_s3 = sld [smem:[#allocation2 + $0x3]]  ;;  %s2439_s4 = sld [smem:[#allocation2 + $0x7]] }
  0x4e   : > { %s2441_s5 = sld [smem:[#allocation2 + $0x8]]  ;;  %s2451_s21 = sld [smem:[#allocation2 + $0x9]] }
  0x4f   : > { %s2443_s6 = sld [smem:[#allocation2 + $0x10]]  ;;  %s2453_s23 = sld [smem:[#allocation2 + $0x11]] }
  0x50   : > { %s2445_s7 = sld [smem:[#allocation2 + $0x18]]  ;;  %v173_v1 = vstv %s172_s17  ;;  %v176_v3 = vstv %s1713_s22  ;;  %s2455_s20 = sld [smem:[#allocation2 + $0x19]] }
  0x51   : > { %s2447_s15 = sld [smem:[#allocation2 + $0x20]]  ;;  %v174_v2 = vmul.f32 %v173_v1, %v171_v0  ;;  %v180_v4 = vstv %s1714_s27  ;;  %v183_v6 = vstv %s1715_s28  ;;  %s2457_s26 = sld [smem:[#allocation2 + $0x21]] }
  0x52   : > { %s2449_s19 = sld [smem:[#allocation2 + $0x28]]  ;;  %v181_v5 = vmul.f32 %v180_v4, %v171_v0  ;;  %v187_v7 = vstv %s1716_s29  ;;  %v190_v10 = vstv %s2437_s30  ;;  %s2460_s17 = sld [smem:[#allocation2 + $0xa]] }
  0x53   : > { %v177_v8 = vadd.f32 %v176_v3, %v174_v2  ;;  %v188_v9 = vmul.f32 %v187_v7, %v171_v0  ;;  %v194_v11 = vstv %s1718_s3  ;;  %v197_v14 = vstv %s2439_s4  ;;  %s2464_s22 = sld [smem:[#allocation2 + $0x12]]  ;;  %s2471_s28 = sld [smem:[#allocation2 + $0x29]] }
  0x54   : > { %v184_v12 = vadd.f32 %v183_v6, %v181_v5  ;;  %v195_v13 = vmul.f32 %v194_v11, %v171_v0  ;;  %v201_v15 = vstv %s2441_s5  ;;  %s2466_s27 = sld [smem:[#allocation2 + $0x1a]]  ;;  %s2479_s30 = sld [smem:[#allocation2 + $0xb]]  ;;  %v220_v25 = vstv %s2451_s21 }
  0x55   : > { %v2468_v16 = vmax.f32 %v177_v8, 0.0  ;;  %v191_v17 = vadd.f32 %v190_v10, %v188_v9  ;;  %v204_v18 = vstv %s2443_s6  ;;  %s2473_s29 = sld [smem:[#allocation2 + $0x22]]  ;;  %s2481_s3 = sld [smem:[#allocation2 + $0x13]]  ;;  %v223_v26 = vstv %s2453_s23 }
  0x56   : > { %v2475_v19 = vmax.f32 %v184_v12, 0.0  ;;  %v198_v20 = vadd.f32 %v197_v14, %v195_v13  ;;  %v208_v21 = vstv %s2445_s7  ;;  %s2488_s4 = sld [smem:[#allocation2 + $0x1b]]  ;;  %s2497_s6 = sld [smem:[#allocation2 + $0x2a]]  ;;  %v227_v33 = vstv %s2455_s20 }
  0x57   : > { %v212_v22 = vstv %s2447_s15  ;;  %v2483_v23 = vmax.f32 %v191_v17, 0.0  ;;  %v202_v24 = vmul.f32 %v201_v15, %v2468_v16  ;;  %s2490_s5 = sld [smem:[#allocation2 + $0x23]]  ;;  %v221_v29 = vmul.f32 %v220_v25, %v2468_v16  ;;  %s2503_s7 = sld [smem:[#allocation2 + $0xc]] }
  0x58   : > { %v2492_v27 = vmax.f32 %v198_v20, 0.0  ;;  %v205_v28 = vmul.f32 %v204_v18, %v2475_v19  ;;  %v224_v30 = vmul.f32 %v223_v26, %v2475_v19  ;;  %v216_v32 = vstv %s2449_s19  ;;  %s2507_s15 = sld [smem:[#allocation2 + $0x2b]]  ;;  %s2509_s21 = sld [smem:[#allocation2 + $0x14]] }
  0x59   : > { %v209_v31 = vmul.f32 %v208_v21, %v2483_v23  ;;  %v231_v34 = vstv %s2457_s26  ;;  %v228_v38 = vmul.f32 %v227_v33, %v2483_v23  ;;  %v239_v40 = vstv %s2460_s17  ;;  %s2515_s19 = sld [smem:[#allocation2 + $0x1c]]  ;;  %s2525_s20 = sld [smem:[#allocation2 + $0xd]] }
  0x5a   : > { %v206_v35 = vadd.f32 %v205_v28, %v202_v24  ;;  %v213_v36 = vmul.f32 %v212_v22, %v2492_v27  ;;  %v225_v37 = vadd.f32 %v224_v30, %v221_v29  ;;  %v232_v39 = vmul.f32 %v231_v34, %v2492_v27  ;;  %s2517_s23 = sld [smem:[#allocation2 + $0x24]]  ;;  %s2527_s26 = sld [smem:[#allocation2 + $0x15]] }
  0x5b   : > { %v242_v41 = vstv %s2464_s22  ;;  %v246_v42 = vstv %s2466_s27  ;;  %v240_v45 = vmul.f32 %v239_v40, %v2468_v16  ;;  %v235_v47 = vstv %s2471_s28  ;;  %s2530_s17 = sld [smem:[#allocation2 + $0x2c]]  ;;  %s2536_s22 = sld [smem:[#allocation2 + $0x1d]] }
  0x5c   : > { %v210_v43 = vadd.f32 %v209_v31, %v206_v35  ;;  %v229_v44 = vadd.f32 %v228_v38, %v225_v37  ;;  %v243_v46 = vmul.f32 %v242_v41, %v2475_v19  ;;  %v247_v48 = vmul.f32 %v246_v42, %v2483_v23  ;;  %s2538_s27 = sld [smem:[#allocation2 + $0x25]]  ;;  %s2542_s28 = sld [smem:[#allocation2 + $0xe]] }
  0x5d   : > { %v250_v49 = vstv %s2473_s29  ;;  %v258_v50 = vstv %s2479_s30  ;;  %v261_v56 = vstv %s2481_s3  ;;  %v265_v57 = vstv %s2488_s4  ;;  %s2547_s29 = sld [smem:[#allocation2 + $0x16]]  ;;  %s2554_s3 = sld [smem:[#allocation2 + $0x2d]] }
  0x5e   : > { %v214_v51 = vadd.f32 %v213_v36, %v210_v43  ;;  %v233_v52 = vadd.f32 %v232_v39, %v229_v44  ;;  %v244_v53 = vadd.f32 %v243_v46, %v240_v45  ;;  %v251_v54 = vmul.f32 %v250_v49, %v2492_v27  ;;  %s2549_s30 = sld [smem:[#allocation2 + $0x1e]]  ;;  %s2941_s25 = sld [smem:[#allocation2 + $0x89]] }
  0x5f   : > { %v259_v55 = vmul.f32 %v258_v50, %v2468_v16  ;;  %v269_v58 = vstv %s2490_s5  ;;  %v254_v61 = vstv %s2497_s6  ;;  %v262_v62 = vmul.f32 %v261_v56, %v2475_v19  ;;  %s2560_s4 = sld [smem:[#allocation2 + $0x26]]  ;;  %s2564_s5 = sld [smem:[#allocation2 + $0xf]] }
  0x60   : > { %v217_v59 = vadd.f32 %v216_v32, %v214_v51  ;;  %v248_v60 = vadd.f32 %v247_v48, %v244_v53  ;;  %v236_v63 = vadd.f32 %v235_v47, %v233_v52  ;;  %v266_v0 = vmul.f32 %v265_v57, %v2483_v23  ;;  %s2571_s6 = sld [smem:[#allocation2 + $0x17]]  ;;  %p4051_p0 = scmp.ne.s32.totalorder %s4044_s14, 0 }
  0x61   : > { %v270_v1 = vmul.f32 %v269_v58, %v2492_v27  ;;  %v277_v2 = vstv %s2503_s7  ;;  %v263_v5 = vadd.f32 %v262_v62, %v259_v55  ;;  %v273_v6 = vstv %s2507_s15  ;;  %s2573_s7 = sld [smem:[#allocation2 + $0x1f]]  ;;  %s2577_s15 = sld [smem:[#allocation2 + $0x2e]] }
  0x62   : > { %v2551_v3 = vmax.f32 %v217_v59, 0.0  ;;  %v252_v4 = vadd.f32 %v251_v54, %v248_v60  ;;  %v278_v7 = vmul.f32 %v277_v2, %v2468_v16  ;;  %v280_v8 = vstv %s2509_s21  ;;  %s2584_s21 = sld [smem:[#allocation2 + $0x27]] }
  0x63   : > { %v284_v9 = vstv %s2515_s19  ;;  %v288_v10 = vstv %s2517_s23  ;;  %v267_v12 = vadd.f32 %v266_v0, %v263_v5  ;;  %v281_v13 = vmul.f32 %v280_v8, %v2475_v19  ;;  %s2586_s19 = sld [smem:[#allocation2 + $0x30]] }
  0x64   : > { %v255_v11 = vadd.f32 %v254_v61, %v252_v4  ;;  %v285_v14 = vmul.f32 %v284_v9, %v2483_v23  ;;  %v2566_v15 = vmax.f32 %v236_v63, 0.0  ;;  %v289_v17 = vmul.f32 %v288_v10, %v2492_v27  ;;  %s2590_s23 = sld [smem:[#allocation2 + $0x40]] }
  0x65   : > { %v296_v18 = vstv %s2525_s20  ;;  %v299_v20 = vstv %s2527_s26  ;;  %v271_v21 = vadd.f32 %v270_v1, %v267_v12  ;;  %v282_v22 = vadd.f32 %v281_v13, %v278_v7  ;;  %s2595_s20 = sld [smem:[#allocation2 + $0x50]] }
  0x66   : > { %v292_v24 = vstv %s2530_s17  ;;  %v297_v25 = vmul.f32 %v296_v18, %v2468_v16  ;;  %v2579_v26 = vmax.f32 %v255_v11, 0.0  ;;  %v300_v28 = vmul.f32 %v299_v20, %v2475_v19  ;;  %s2597_s26 = sld [smem:[#allocation2 + $0x60]]  ;;  %s2602_s17 = sld [smem:[#allocation2 + $0x2f]] }
  0x67   : > { %v303_v29 = vstv %s2536_s22  ;;  %v307_v30 = vstv %s2538_s27  ;;  %v274_v31 = vadd.f32 %v273_v6, %v271_v21  ;;  %v286_v32 = vadd.f32 %v285_v14, %v282_v22  ;;  %s2608_s22 = sld [smem:[#allocation2 + $0x70]] }
  0x68   : > { %v304_v33 = vmul.f32 %v303_v29, %v2483_v23  ;;  %v308_v34 = vmul.f32 %v307_v30, %v2492_v27  ;;  %v301_v35 = vadd.f32 %v300_v28, %v297_v25  ;;  %v315_v36 = vstv %s2542_s28  ;;  %s2610_s27 = sld [smem:[#allocation2 + $0x80]] }
  0x69   : > { %v318_v37 = vstv %s2547_s29  ;;  %v322_v38 = vstv %s2549_s30  ;;  %v290_v39 = vadd.f32 %v289_v17, %v286_v32  ;;  %v311_v40 = vstv %s2554_s3  ;;  %s2614_s28 = sld [smem:[#allocation2 + $0x90]]  ;;  %s2621_s30 = sld [smem:[#allocation2 + $0x31]] }
  0x6a   : > { %v316_v41 = vmul.f32 %v315_v36, %v2468_v16  ;;  %v319_v42 = vmul.f32 %v318_v37, %v2475_v19  ;;  %v2604_v43 = vmax.f32 %v274_v31, 0.0  ;;  %v305_v44 = vadd.f32 %v304_v33, %v301_v35  ;;  %s2619_s29 = sld [smem:[#allocation2 + $0xa0]]  ;;  %s2626_s3 = sld [smem:[#allocation2 + $0x41]] }
  0x6b   : > { %v323_v45 = vmul.f32 %v322_v38, %v2483_v23  ;;  %v326_v46 = vstv %s2560_s4  ;;  %v293_v47 = vadd.f32 %v292_v24, %v290_v39  ;;  %v334_v50 = vstv %s2564_s5  ;;  %s2628_s4 = sld [smem:[#allocation2 + $0x51]] }
  0x6c   : > { %v320_v48 = vadd.f32 %v319_v42, %v316_v41  ;;  %v327_v49 = vmul.f32 %v326_v46, %v2492_v27  ;;  %v309_v51 = vadd.f32 %v308_v34, %v305_v44  ;;  %v335_v52 = vmul.f32 %v334_v50, %v2468_v16  ;;  %s2634_s5 = sld [smem:[#allocation2 + $0x61]] }
  0x6d   : > { %v337_v53 = vstv %s2571_s6  ;;  %v341_v54 = vstv %s2573_s7  ;;  %v330_v56 = vstv %s2577_s15  ;;  %v2630_v16 = vmax.f32 %v293_v47, 0.0  ;;  %s2636_s6 = sld [smem:[#allocation2 + $0x71]] }
  0x6e   : > { %v324_v55 = vadd.f32 %v323_v45, %v320_v48  ;;  %v338_v57 = vmul.f32 %v337_v53, %v2475_v19  ;;  %v342_v58 = vmul.f32 %v341_v54, %v2483_v23  ;;  %v312_v59 = vadd.f32 %v311_v40, %v309_v51  ;;  %s2645_s7 = sld [smem:[#allocation2 + $0x81]] }
  0x6f   : > { %v345_v60 = vstv %s2584_s21  ;;  %v353_v61 = vstv %s2586_s19  ;;  %v356_v1 = vstv %s2590_s23  ;;  %v360_v2 = vstv %s2595_s20  ;;  %s2649_s15 = sld [smem:[#allocation2 + $0x91]]  ;;  %s2656_s19 = sld [smem:[#allocation2 + $0x32]] }
  0x70   : > { %v328_v19 = vadd.f32 %v327_v49, %v324_v55  ;;  %v339_v62 = vadd.f32 %v338_v57, %v335_v52  ;;  %v346_v23 = vmul.f32 %v345_v60, %v2492_v27  ;;  %v354_v63 = vmul.f32 %v353_v61, %v2551_v3  ;;  %s2654_s21 = sld [smem:[#allocation2 + $0xa1]]  ;;  %s2660_s23 = sld [smem:[#allocation2 + $0x42]] }
  0x71   : > { %v2640_v0 = vmax.f32 %v312_v59, 0.0  ;;  %v364_v4 = vstv %s2597_s26  ;;  %v357_v7 = vmul.f32 %v356_v1, %v2566_v15  ;;  %v361_v8 = vmul.f32 %v360_v2, %v2579_v26  ;;  %s2662_s20 = sld [smem:[#allocation2 + $0x52]] }
  0x72   : > { %v331_v5 = vadd.f32 %v330_v56, %v328_v19  ;;  %v343_v6 = vadd.f32 %v342_v58, %v339_v62  ;;  %v349_v27 = vstv %s2602_s17  ;;  %v368_v9 = vstv %s2608_s22  ;;  %s2669_s26 = sld [smem:[#allocation2 + $0x62]]  ;;  %s2675_s22 = sld [smem:[#allocation2 + $0xb0]] }
  0x73   : > { %v372_v10 = vstv %s2610_s27  ;;  %v358_v12 = vadd.f32 %v357_v7, %v354_v63  ;;  %v365_v13 = vmul.f32 %v364_v4, %v2604_v43  ;;  %v376_v14 = vstv %s2614_s28  ;;  %s2671_s17 = sld [smem:[#allocation2 + $0x72]] }
  0x74   : > { %v347_v11 = vadd.f32 %v346_v23, %v343_v6  ;;  %v2664_v17 = vmax.f32 %v331_v5, 0.0  ;;  %v369_v18 = vmul.f32 %v368_v9, %v2630_v16  ;;  %v373_v20 = vmul.f32 %v372_v10, %v2640_v0  ;;  %s2681_s27 = sld [smem:[#allocation2 + $0x82]] }
  0x75   : > { %v388_v21 = vstv %s2621_s30  ;;  %v362_v24 = vadd.f32 %v361_v8, %v358_v12  ;;  %v380_v25 = vstv %s2619_s29  ;;  %v391_v29 = vstv %s2626_s3  ;;  %s2689_s28 = sld [smem:[#allocation2 + $0x92]]  ;;  %s2691_s29 = sld [smem:[#allocation2 + $0x33]] }
  0x76   : > { %v350_v22 = vadd.f32 %v349_v27, %v347_v11  ;;  %v389_v28 = vmul.f32 %v388_v21, %v2551_v3  ;;  %v395_v30 = vstv %s2628_s4  ;;  %v399_v31 = vstv %s2634_s5  ;;  %s2695_s30 = sld [smem:[#allocation2 + $0x43]]  ;;  %s2706_s5 = sld [smem:[#allocation2 + $0xb1]] }
  0x77   : > { %v403_v32 = vstv %s2636_s6  ;;  %v366_v34 = vadd.f32 %v365_v13, %v362_v24  ;;  %v392_v35 = vmul.f32 %v391_v29, %v2566_v15  ;;  %v396_v36 = vmul.f32 %v395_v30, %v2579_v26  ;;  %s2701_s3 = sld [smem:[#allocation2 + $0x53]]  ;;  %s2709_s6 = sld [smem:[#allocation2 + $0xa2]] }
  0x78   : > { %v2683_v33 = vmax.f32 %v350_v22, 0.0  ;;  %v377_v37 = vmul.f32 %v376_v14, %v2664_v17  ;;  %v407_v38 = vstv %s2645_s7  ;;  %v400_v41 = vmul.f32 %v399_v31, %v2604_v43  ;;  %s2703_s4 = sld [smem:[#allocation2 + $0x63]] }
  0x79   : > { %v370_v39 = vadd.f32 %v369_v18, %v366_v34  ;;  %v393_v40 = vadd.f32 %v392_v35, %v389_v28  ;;  %v404_v42 = vmul.f32 %v403_v32, %v2630_v16  ;;  %v408_v45 = vmul.f32 %v407_v38, %v2640_v0  ;;  %s2715_s7 = sld [smem:[#allocation2 + $0x73]] }
  0x7a   : > { %v381_v44 = vmul.f32 %v380_v25, %v2683_v33  ;;  %v411_v46 = vstv %s2649_s15  ;;  %v423_v47 = vstv %s2656_s19  ;;  %v415_v50 = vstv %s2654_s21  ;;  %s2717_s15 = sld [smem:[#allocation2 + $0x83]]  ;;  %s2723_s21 = sld [smem:[#allocation2 + $0xb2]] }
  0x7b   : > { %v374_v48 = vadd.f32 %v373_v20, %v370_v39  ;;  %v397_v49 = vadd.f32 %v396_v36, %v393_v40  ;;  %v424_v51 = vmul.f32 %v423_v47, %v2551_v3  ;;  %v426_v52 = vstv %s2660_s23  ;;  %s2727_s19 = sld [smem:[#allocation2 + $0x93]]  ;;  %s2729_s23 = sld [smem:[#allocation2 + $0x34]] }
  0x7c   : > { %v430_v53 = vstv %s2662_s20  ;;  %v434_v54 = vstv %s2669_s26  ;;  %v438_v55 = vstv %s2671_s17  ;;  %v427_v58 = vmul.f32 %v426_v52, %v2566_v15  ;;  %s2735_s20 = sld [smem:[#allocation2 + $0x44]]  ;;  %s2740_s17 = sld [smem:[#allocation2 + $0xa3]] }
  0x7d   : > { %v378_v56 = vadd.f32 %v377_v37, %v374_v48  ;;  %v401_v57 = vadd.f32 %v400_v41, %v397_v49  ;;  %v431_v59 = vmul.f32 %v430_v53, %v2579_v26  ;;  %v384_v60 = vstv %s2675_s22  ;;  %s2737_s26 = sld [smem:[#allocation2 + $0x54]] }
  0x7e   : > { %v442_v61 = vstv %s2681_s27  ;;  %v412_v62 = vmul.f32 %v411_v46, %v2664_v17  ;;  %v428_v23 = vadd.f32 %v427_v58, %v424_v51  ;;  %v435_v63 = vmul.f32 %v434_v54, %v2604_v43  ;;  %s2746_s22 = sld [smem:[#allocation2 + $0x64]] }
  0x7f   : > { %v405_v19 = vadd.f32 %v404_v42, %v401_v57  ;;  %v416_v1 = vmul.f32 %v415_v50, %v2683_v33  ;;  %v439_v2 = vmul.f32 %v438_v55, %v2630_v16  ;;  %v446_v4 = vstv %s2689_s28  ;;  %s2748_s27 = sld [smem:[#allocation2 + $0x74]]  ;;  %s2752_s28 = sld [smem:[#allocation2 + $0xb3]] }
  0x80   : > { %v458_v5 = vstv %s2691_s29  ;;  %v382_v6 = vadd.f32 %v381_v44, %v378_v56  ;;  %v432_v8 = vadd.f32 %v431_v59, %v428_v23  ;;  %v443_v27 = vmul.f32 %v442_v61, %v2640_v0  ;;  %s2758_s29 = sld [smem:[#allocation2 + $0x84]] }
  0x81   : > { %v409_v7 = vadd.f32 %v408_v45, %v405_v19  ;;  %v459_v9 = vmul.f32 %v458_v5, %v2551_v3  ;;  %v461_v10 = vstv %s2695_s30  ;;  %v465_v11 = vstv %s2701_s3  ;;  %s2762_s30 = sld [smem:[#allocation2 + $0x94]] }
  0x82   : > { %v469_v12 = vstv %s2703_s4  ;;  %v436_v14 = vadd.f32 %v435_v63, %v432_v8  ;;  %v450_v18 = vstv %s2709_s6  ;;  %v462_v20 = vmul.f32 %v461_v10, %v2566_v15  ;;  %s2766_s3 = sld [smem:[#allocation2 + $0xa4]]  ;;  %s2768_s4 = sld [smem:[#allocation2 + $0x35]] }
  0x83   : > { %v413_v13 = vadd.f32 %v412_v62, %v409_v7  ;;  %v419_v21 = vstv %s2706_s5  ;;  %v466_v22 = vmul.f32 %v465_v11, %v2579_v26  ;;  %v473_v24 = vstv %s2715_s7  ;;  %s2772_s5 = sld [smem:[#allocation2 + $0x45]] }
  0x84   : > { %v477_v25 = vstv %s2717_s15  ;;  %v440_v28 = vadd.f32 %v439_v2, %v436_v14  ;;  %v447_v29 = vmul.f32 %v446_v4, %v2664_v17  ;;  %v463_v30 = vadd.f32 %v462_v20, %v459_v9  ;;  %s2778_s6 = sld [smem:[#allocation2 + $0x55]] }
  0x85   : > { %v470_v31 = vmul.f32 %v469_v12, %v2604_v43  ;;  %v385_v32 = vadd.f32 %v384_v60, %v382_v6  ;;  %v417_v34 = vadd.f32 %v416_v1, %v413_v13  ;;  %v451_v35 = vmul.f32 %v450_v18, %v2683_v33  ;;  %s2780_s7 = sld [smem:[#allocation2 + $0x65]] }
  0x86   : > { %v454_v36 = vstv %s2723_s21  ;;  %v444_v37 = vadd.f32 %v443_v27, %v440_v28  ;;  %v467_v38 = vadd.f32 %v466_v22, %v463_v30  ;;  %v474_v39 = vmul.f32 %v473_v24, %v2630_v16  ;;  %s2784_s15 = sld [smem:[#allocation2 + $0x75]]  ;;  %s2849_s21 = sld [smem:[#allocation2 + $0x57]] }
  0x87   : > { %v478_v40 = vmul.f32 %v477_v25, %v2640_v0  ;;  %v481_v41 = vstv %s2727_s19  ;;  %v493_v42 = vstv %s2729_s23  ;;  %v496_v44 = vstv %s2735_s20  ;;  %s2790_s19 = sld [smem:[#allocation2 + $0x85]] }
  0x88   : > { %v500_v45 = vstv %s2737_s26  ;;  %v448_v46 = vadd.f32 %v447_v29, %v444_v37  ;;  %v471_v47 = vadd.f32 %v470_v31, %v467_v38  ;;  %v485_v48 = vstv %s2740_s17  ;;  %s2798_s23 = sld [smem:[#allocation2 + $0x95]]  ;;  %s2804_s26 = sld [smem:[#allocation2 + $0x36]] }
  0x89   : > { %v494_v49 = vmul.f32 %v493_v42, %v2551_v3  ;;  %v497_v50 = vmul.f32 %v496_v44, %v2566_v15  ;;  %v501_v51 = vmul.f32 %v500_v45, %v2579_v26  ;;  %v504_v52 = vstv %s2746_s22  ;;  %s2800_s20 = sld [smem:[#allocation2 + $0xa5]]  ;;  %s2806_s17 = sld [smem:[#allocation2 + $0x46]] }
  0x8a   : > { %v508_v53 = vstv %s2748_s27  ;;  %v2792_v54 = vmax.f32 %v385_v32, 0.0  ;;  %v475_v55 = vadd.f32 %v474_v39, %v471_v47  ;;  %v482_v56 = vmul.f32 %v481_v41, %v2664_v17  ;;  %s2811_s22 = sld [smem:[#allocation2 + $0x56]] }
  0x8b   : > { %v489_v57 = vstv %s2752_s28  ;;  %v420_v58 = vadd.f32 %v419_v21, %v417_v34  ;;  %v498_v59 = vadd.f32 %v497_v50, %v494_v49  ;;  %v505_v60 = vmul.f32 %v504_v52, %v2604_v43  ;;  %s2816_s27 = sld [smem:[#allocation2 + $0x66]] }
  0x8c   : > { %v512_v61 = vstv %s2758_s29  ;;  %v452_v19 = vadd.f32 %v451_v35, %v448_v46  ;;  %v479_v62 = vadd.f32 %v478_v40, %v475_v55  ;;  %v486_v23 = vmul.f32 %v485_v48, %v2683_v33  ;;  %s2818_s28 = sld [smem:[#allocation2 + $0x76]]  ;;  %s2824_s29 = sld [smem:[#allocation2 + $0xb4]] }
  0x8d   : > { %v509_v63 = vmul.f32 %v508_v53, %v2630_v16  ;;  %v502_v1 = vadd.f32 %v501_v51, %v498_v59  ;;  %v516_v2 = vstv %s2762_s30  ;;  %v520_v4 = vstv %s2766_s3  ;;  %s2828_s30 = sld [smem:[#allocation2 + $0x86]] }
  0x8e   : > { %v528_v5 = vstv %s2768_s4  ;;  %v483_v6 = vadd.f32 %v482_v56, %v479_v62  ;;  %v513_v7 = vmul.f32 %v512_v61, %v2640_v0  ;;  %v531_v27 = vstv %s2772_s5  ;;  %s2832_s3 = sld [smem:[#allocation2 + $0x96]]  ;;  %s2840_s4 = sld [smem:[#allocation2 + $0x37]] }
  0x8f   : > { %v529_v8 = vmul.f32 %v528_v5, %v2551_v3  ;;  %v506_v9 = vadd.f32 %v505_v60, %v502_v1  ;;  %v532_v10 = vmul.f32 %v531_v27, %v2566_v15  ;;  %v535_v11 = vstv %s2778_s6  ;;  %s2842_s5 = sld [smem:[#allocation2 + $0x47]] }
  0x90   : > { %v539_v12 = vstv %s2780_s7  ;;  %v487_v13 = vadd.f32 %v486_v23, %v483_v6  ;;  %v517_v14 = vmul.f32 %v516_v2, %v2664_v17  ;;  %v536_v18 = vmul.f32 %v535_v11, %v2579_v26  ;;  %s2851_s6 = sld [smem:[#allocation2 + $0x67]]  ;;  %s2855_s7 = sld [smem:[#allocation2 + $0xa6]] }
  0x91   : > { %v543_v20 = vstv %s2784_s15  ;;  %v510_v21 = vadd.f32 %v509_v63, %v506_v9  ;;  %v533_v22 = vadd.f32 %v532_v10, %v529_v8  ;;  %v540_v24 = vmul.f32 %v539_v12, %v2604_v43  ;;  %s2861_s15 = sld [smem:[#allocation2 + $0x77]] }
  0x92   : > { %v547_v25 = vstv %s2790_s19  ;;  %v2834_v28 = vmax.f32 %v420_v58, 0.0  ;;  %v455_v29 = vadd.f32 %v454_v36, %v452_v19  ;;  %v521_v30 = vmul.f32 %v520_v4, %v2683_v33  ;;  %s2863_s19 = sld [smem:[#allocation2 + $0x87]] }
  0x93   : > { %v544_v31 = vmul.f32 %v543_v20, %v2630_v16  ;;  %v490_v32 = vadd.f32 %v489_v57, %v487_v13  ;;  %v514_v34 = vadd.f32 %v513_v7, %v510_v21  ;;  %v537_v35 = vadd.f32 %v536_v18, %v533_v22 }
  0x94   : > { %v551_v37 = vstv %s2798_s23  ;;  %v548_v38 = vmul.f32 %v547_v25, %v2640_v0  ;;  %v555_v39 = vstv %s2800_s20  ;;  %v563_v40 = vstv %s2804_s26  ;;  %s2865_s23 = sld [smem:[#allocation2 + $0xb5]]  ;;  %s2868_s20 = sld [smem:[#allocation2 + $0xb6]] }
  0x95   : > { %v566_v36 = vstv %s2806_s17  ;;  %v518_v41 = vadd.f32 %v517_v14, %v514_v34  ;;  %v541_v42 = vadd.f32 %v540_v24, %v537_v35  ;;  %v564_v44 = vmul.f32 %v563_v40, %v2551_v3  ;;  %s2877_s26 = sld [smem:[#allocation2 + $0x97]]  ;;  %s2879_s17 = sld [smem:[#allocation2 + $0x38]] }
  0x96   : > { %v567_v45 = vmul.f32 %v566_v36, %v2566_v15  ;;  %v552_v46 = vmul.f32 %v551_v37, %v2664_v17  ;;  %v570_v47 = vstv %s2811_s22  ;;  %v574_v48 = vstv %s2816_s27  ;;  %s2886_s22 = sld [smem:[#allocation2 + $0x48]] }
  0x97   : > { %v578_v49 = vstv %s2818_s28  ;;  %v522_v50 = vadd.f32 %v521_v30, %v518_v41  ;;  %v545_v51 = vadd.f32 %v544_v31, %v541_v42  ;;  %v571_v53 = vmul.f32 %v570_v47, %v2579_v26  ;;  %s2888_s27 = sld [smem:[#allocation2 + $0x58]]  ;;  %s2891_s28 = sld [smem:[#allocation2 + $0xa7]] }
  0x98   : > { %v568_v52 = vadd.f32 %v567_v45, %v564_v44  ;;  %v2870_v55 = vmax.f32 %v455_v29, 0.0  ;;  %v524_v56 = vstv %s2824_s29  ;;  %v575_v57 = vmul.f32 %v574_v48, %v2604_v43  ;;  %s2893_s29 = sld [smem:[#allocation2 + $0x68]] }
  0x99   : > { %v582_v58 = vstv %s2828_s30  ;;  %v549_v59 = vadd.f32 %v548_v38, %v545_v51  ;;  %v556_v60 = vmul.f32 %v555_v39, %v2683_v33  ;;  %v579_v19 = vmul.f32 %v578_v49, %v2630_v16  ;;  %s2899_s30 = sld [smem:[#allocation2 + $0x78]] }
  0x9a   : > { %v572_v61 = vadd.f32 %v571_v53, %v568_v52  ;;  %v2881_v62 = vmax.f32 %v490_v32, 0.0  ;;  %v586_v23 = vstv %s2832_s3  ;;  %v598_v63 = vstv %s2840_s4  ;;  %s2901_s3 = sld [smem:[#allocation2 + $0x88]]  ;;  %s2906_s4 = sld [smem:[#allocation2 + $0xb7]] }
  0x9b   : > { %v601_v1 = vstv %s2842_s5  ;;  %v525_v2 = vadd.f32 %v524_v56, %v522_v50  ;;  %v553_v4 = vadd.f32 %v552_v46, %v549_v59  ;;  %v583_v6 = vmul.f32 %v582_v58, %v2640_v0  ;;  %s2911_s5 = sld [smem:[#allocation2 + $0x98]] }
  0x9c   : > { %v576_v5 = vadd.f32 %v575_v57, %v572_v61  ;;  %v599_v7 = vmul.f32 %v598_v63, %v2551_v3  ;;  %v602_v8 = vmul.f32 %v601_v1, %v2566_v15  ;;  %v605_v27 = vstv %s2849_s21  ;;  %s2917_s21 = sld [smem:[#allocation2 + $0xa8]] }
  0x9d   : > { %v609_v9 = vstv %s2851_s6  ;;  %v587_v11 = vmul.f32 %v586_v23, %v2664_v17  ;;  %v590_v12 = vstv %s2855_s7  ;;  %v606_v13 = vmul.f32 %v605_v27, %v2579_v26  ;;  %s2919_s6 = sld [smem:[#allocation2 + $0x39]] }
  0x9e   : > { %v580_v10 = vadd.f32 %v579_v19, %v576_v5  ;;  %v603_v14 = vadd.f32 %v602_v8, %v599_v7  ;;  %v610_v18 = vmul.f32 %v609_v9, %v2604_v43  ;;  %v613_v20 = vstv %s2861_s15  ;;  %s2923_s7 = sld [smem:[#allocation2 + $0x49]] }
  0x9f   : > { %v617_v21 = vstv %s2863_s19  ;;  %v2913_v22 = vmax.f32 %v525_v2, 0.0  ;;  %v559_v24 = vstv %s2865_s23  ;;  %v594_v29 = vstv %s2868_s20  ;;  %s2925_s15 = sld [smem:[#allocation2 + $0x59]]  ;;  %s3001_s20 = sld [smem:[#allocation2 + $0x6b]] }
  0xa0   : > { %v584_v25 = vadd.f32 %v583_v6, %v580_v10  ;;  %v557_v30 = vadd.f32 %v556_v60, %v553_v4  ;;  %v591_v31 = vmul.f32 %v590_v12, %v2683_v33  ;;  %v607_v32 = vadd.f32 %v606_v13, %v603_v14  ;;  %s2933_s19 = sld [smem:[#allocation2 + $0x69]] }
  0xa1   : > { %v614_v34 = vmul.f32 %v613_v20, %v2630_v16  ;;  %v618_v37 = vmul.f32 %v617_v21, %v2640_v0  ;;  %v621_v38 = vstv %s2877_s26  ;;  %v633_v39 = vstv %s2879_s17  ;;  %s2935_s23 = sld [smem:[#allocation2 + $0x79]] }
  0xa2   : > { %v588_v35 = vadd.f32 %v587_v11, %v584_v25  ;;  %v611_v40 = vadd.f32 %v610_v18, %v607_v32  ;;  %v634_v36 = vmul.f32 %v633_v39, %v2551_v3  ;;  %v636_v41 = vstv %s2886_s22  ;;  %s2948_s26 = sld [smem:[#allocation2 + $0x99]]  ;;  %s2954_s22 = sld [smem:[#allocation2 + $0x3a]] }
  0xa3   : > { %v640_v42 = vstv %s2888_s27  ;;  %v625_v44 = vstv %s2891_s28  ;;  %v637_v45 = vmul.f32 %v636_v41, %v2566_v15  ;;  %v644_v47 = vstv %s2893_s29  ;;  %s2950_s17 = sld [smem:[#allocation2 + $0xa9]]  ;;  %s2956_s27 = sld [smem:[#allocation2 + $0x4a]] }
  0xa4   : > { %v641_v46 = vmul.f32 %v640_v42, %v2579_v26  ;;  %v615_v48 = vadd.f32 %v614_v34, %v611_v40  ;;  %v622_v49 = vmul.f32 %v621_v38, %v2664_v17  ;;  %v648_v50 = vstv %s2899_s30  ;;  %s2961_s28 = sld [smem:[#allocation2 + $0x5a]] }
  0xa5   : > { %v652_v51 = vstv %s2901_s3  ;;  %v560_v52 = vadd.f32 %v559_v24, %v557_v30  ;;  %v629_v53 = vstv %s2906_s4  ;;  %v638_v56 = vadd.f32 %v637_v45, %v634_v36  ;;  %s2966_s29 = sld [smem:[#allocation2 + $0x6a]]  ;;  %s2974_s3 = sld [smem:[#allocation2 + $0xb8]] }
  0xa6   : > { %v645_v57 = vmul.f32 %v644_v47, %v2604_v43  ;;  %v592_v58 = vadd.f32 %v591_v31, %v588_v35  ;;  %v619_v59 = vadd.f32 %v618_v37, %v615_v48  ;;  %v626_v60 = vmul.f32 %v625_v44, %v2683_v33  ;;  %s2968_s30 = sld [smem:[#allocation2 + $0x7a]] }
  0xa7   : > { %v649_v61 = vmul.f32 %v648_v50, %v2630_v16  ;;  %v642_v19 = vadd.f32 %v641_v46, %v638_v56  ;;  %v653_v23 = vmul.f32 %v652_v51, %v2640_v0  ;;  %v656_v63 = vstv %s2911_s5  ;;  %s2978_s4 = sld [smem:[#allocation2 + $0x8a]] }
  0xa8   : > { %v660_v1 = vstv %s2917_s21  ;;  %v623_v2 = vadd.f32 %v622_v49, %v619_v59  ;;  %v668_v4 = vstv %s2919_s6  ;;  %v671_v5 = vstv %s2923_s7  ;;  %s2982_s5 = sld [smem:[#allocation2 + $0x9a]]  ;;  %s2990_s21 = sld [smem:[#allocation2 + $0x3b]] }
  0xa9   : > { %v675_v6 = vstv %s2925_s15  ;;  %v646_v7 = vadd.f32 %v645_v57, %v642_v19  ;;  %v669_v8 = vmul.f32 %v668_v4, %v2551_v3  ;;  %v672_v27 = vmul.f32 %v671_v5, %v2566_v15  ;;  %s2992_s6 = sld [smem:[#allocation2 + $0x4b]]  ;;  %s3005_s7 = sld [smem:[#allocation2 + $0xaa]] }
  0xaa   : > { %v676_v9 = vmul.f32 %v675_v6, %v2579_v26  ;;  %v627_v10 = vadd.f32 %v626_v60, %v623_v2  ;;  %v657_v11 = vmul.f32 %v656_v63, %v2664_v17  ;;  %v679_v12 = vstv %s2933_s19  ;;  %s3011_s15 = sld [smem:[#allocation2 + $0x7b]] }
  0xab   : > { %v683_v13 = vstv %s2935_s23  ;;  %v650_v14 = vadd.f32 %v649_v61, %v646_v7  ;;  %v673_v18 = vadd.f32 %v672_v27, %v669_v8  ;;  %v680_v20 = vmul.f32 %v679_v12, %v2604_v43  ;;  %s3013_s19 = sld [smem:[#allocation2 + $0x8b]]  ;;  %s3015_s23 = sld [smem:[#allocation2 + $0xb9]] }
  0xac   : > { %v687_v21 = vstv %s2941_s25  ;;  %v2984_v24 = vmax.f32 %v560_v52, 0.0  ;;  %v595_v25 = vadd.f32 %v594_v29, %v592_v58  ;;  %v661_v30 = vmul.f32 %v660_v1, %v2683_v33  ;;  %s2999_s25 = sld [smem:[#allocation2 + $0x5b]] }
  0xad   : > { %v684_v31 = vmul.f32 %v683_v13, %v2630_v16  ;;  %v630_v32 = vadd.f32 %v629_v53, %v627_v10  ;;  %v654_v34 = vadd.f32 %v653_v23, %v650_v14  ;;  %v677_v35 = vadd.f32 %v676_v9, %v673_v18 }
  0xae   : > { %v691_v37 = vstv %s2948_s26  ;;  %v688_v38 = vmul.f32 %v687_v21, %v2640_v0  ;;  %v695_v39 = vstv %s2950_s17  ;;  %v703_v40 = vstv %s2954_s22  ;;  %s3018_s26 = sld [smem:[#allocation2 + $0xba]]  ;;  %s3027_s17 = sld [smem:[#allocation2 + $0x9b]] }
  0xaf   : > { %v706_v29 = vstv %s2956_s27  ;;  %v658_v36 = vadd.f32 %v657_v11, %v654_v34  ;;  %v681_v41 = vadd.f32 %v680_v20, %v677_v35  ;;  %v704_v42 = vmul.f32 %v703_v40, %v2551_v3  ;;  %s3029_s22 = sld [smem:[#allocation2 + $0x3c]] }
  0xb0   : > { %v707_v44 = vmul.f32 %v706_v29, %v2566_v15  ;;  %v692_v45 = vmul.f32 %v691_v37, %v2664_v17  ;;  %v710_v46 = vstv %s2961_s28  ;;  %v714_v47 = vstv %s2966_s29  ;;  %s3036_s27 = sld [smem:[#allocation2 + $0x4c]]  ;;  %s3041_s29 = sld [smem:[#allocation2 + $0xab]] }
  0xb1   : > { %v718_v48 = vstv %s2968_s30  ;;  %v662_v49 = vadd.f32 %v661_v30, %v658_v36  ;;  %v685_v50 = vadd.f32 %v684_v31, %v681_v41  ;;  %v711_v52 = vmul.f32 %v710_v46, %v2579_v26  ;;  %s3038_s28 = sld [smem:[#allocation2 + $0x5c]] }
  0xb2   : > { %v708_v51 = vadd.f32 %v707_v44, %v704_v42  ;;  %v3020_v53 = vmax.f32 %v595_v25, 0.0  ;;  %v664_v56 = vstv %s2974_s3  ;;  %v715_v57 = vmul.f32 %v714_v47, %v2604_v43  ;;  %s3043_s30 = sld [smem:[#allocation2 + $0x6c]] }
  0xb3   : > { %v722_v58 = vstv %s2978_s4  ;;  %v689_v59 = vadd.f32 %v688_v38, %v685_v50  ;;  %v696_v60 = vmul.f32 %v695_v39, %v2683_v33  ;;  %v719_v19 = vmul.f32 %v718_v48, %v2630_v16  ;;  %s3049_s3 = sld [smem:[#allocation2 + $0x7c]] }
  0xb4   : > { %v712_v61 = vadd.f32 %v711_v52, %v708_v51  ;;  %v3031_v23 = vmax.f32 %v630_v32, 0.0  ;;  %v726_v63 = vstv %s2982_s5  ;;  %v738_v1 = vstv %s2990_s21  ;;  %s3051_s4 = sld [smem:[#allocation2 + $0x8c]]  ;;  %s3056_s5 = sld [smem:[#allocation2 + $0xbb]] }
  0xb5   : > { %v741_v2 = vstv %s2992_s6  ;;  %v665_v4 = vadd.f32 %v664_v56, %v662_v49  ;;  %v693_v5 = vadd.f32 %v692_v45, %v689_v59  ;;  %v723_v7 = vmul.f32 %v722_v58, %v2640_v0  ;;  %s3061_s21 = sld [smem:[#allocation2 + $0x9c]] }
  0xb6   : > { %v716_v6 = vadd.f32 %v715_v57, %v712_v61  ;;  %v739_v8 = vmul.f32 %v738_v1, %v2551_v3  ;;  %v742_v27 = vmul.f32 %v741_v2, %v2566_v15  ;;  %v745_v9 = vstv %s2999_s25  ;;  %s3067_s6 = sld [smem:[#allocation2 + $0xac]]  ;;  %s3069_s25 = sld [smem:[#allocation2 + $0x3d]] }
  0xb7   : > { %v749_v10 = vstv %s3001_s20  ;;  %v727_v12 = vmul.f32 %v726_v63, %v2664_v17  ;;  %v730_v13 = vstv %s3005_s7  ;;  %v746_v14 = vmul.f32 %v745_v9, %v2579_v26  ;;  %s3073_s20 = sld [smem:[#allocation2 + $0x4d]] }
  0xb8   : > { %v720_v11 = vadd.f32 %v719_v19, %v716_v6  ;;  %v743_v18 = vadd.f32 %v742_v27, %v739_v8  ;;  %v750_v20 = vmul.f32 %v749_v10, %v2604_v43  ;;  %v753_v21 = vstv %s3011_s15  ;;  %s3075_s7 = sld [smem:[#allocation2 + $0x5d]] }
  0xb9   : > { %v757_v25 = vstv %s3013_s19  ;;  %v3063_v30 = vmax.f32 %v665_v4, 0.0  ;;  %v699_v31 = vstv %s3015_s23  ;;  %v734_v34 = vstv %s3018_s26  ;;  %s3083_s15 = sld [smem:[#allocation2 + $0x6d]]  ;;  %s3145_s26 = sld [smem:[#allocation2 + $0xae]] }
  0xba   : > { %v724_v32 = vadd.f32 %v723_v7, %v720_v11  ;;  %v697_v35 = vadd.f32 %v696_v60, %v693_v5  ;;  %v731_v37 = vmul.f32 %v730_v13, %v2683_v33  ;;  %v747_v38 = vadd.f32 %v746_v14, %v743_v18  ;;  %s3085_s19 = sld [smem:[#allocation2 + $0x7d]] }
  0xbb   : > { %v754_v39 = vmul.f32 %v753_v21, %v2630_v16  ;;  %v758_v29 = vmul.f32 %v757_v25, %v2640_v0  ;;  %v761_v36 = vstv %s3027_s17  ;;  %v773_v41 = vstv %s3029_s22  ;;  %s3091_s23 = sld [smem:[#allocation2 + $0x8d]]  ;;  %s3096_s17 = sld [smem:[#allocation2 + $0xbc]] }
  0xbc   : > { %v728_v40 = vadd.f32 %v727_v12, %v724_v32  ;;  %v751_v42 = vadd.f32 %v750_v20, %v747_v38  ;;  %v774_v44 = vmul.f32 %v773_v41, %v2551_v3  ;;  %v776_v45 = vstv %s3036_s27  ;;  %s3100_s22 = sld [smem:[#allocation2 + $0x9d]]  ;;  %s3104_s27 = sld [smem:[#allocation2 + $0x3e]] }
  0xbd   : > { %v780_v46 = vstv %s3038_s28  ;;  %v765_v47 = vstv %s3041_s29  ;;  %v777_v48 = vmul.f32 %v776_v45, %v2566_v15  ;;  %v784_v50 = vstv %s3043_s30  ;;  %s3106_s28 = sld [smem:[#allocation2 + $0x4e]]  ;;  %s3111_s29 = sld [smem:[#allocation2 + $0xad]] }
  0xbe   : > { %v781_v49 = vmul.f32 %v780_v46, %v2579_v26  ;;  %v755_v51 = vadd.f32 %v754_v39, %v751_v42  ;;  %v762_v52 = vmul.f32 %v761_v36, %v2664_v17  ;;  %v788_v56 = vstv %s3049_s3  ;;  %s3113_s30 = sld [smem:[#allocation2 + $0x5e]] }
  0xbf   : > { %v792_v57 = vstv %s3051_s4  ;;  %v700_v58 = vadd.f32 %v699_v31, %v697_v35  ;;  %v769_v59 = vstv %s3056_s5  ;;  %v778_v60 = vadd.f32 %v777_v48, %v774_v44  ;;  %s3118_s3 = sld [smem:[#allocation2 + $0x6e]] }
  0xc0   : > { %v785_v61 = vmul.f32 %v784_v50, %v2604_v43  ;;  %v732_v19 = vadd.f32 %v731_v37, %v728_v40  ;;  %v759_v63 = vadd.f32 %v758_v29, %v755_v51  ;;  %v766_v1 = vmul.f32 %v765_v47, %v2683_v33  ;;  %s3120_s4 = sld [smem:[#allocation2 + $0x7e]] }
  0xc1   : > { %v789_v2 = vmul.f32 %v788_v56, %v2630_v16  ;;  %v782_v4 = vadd.f32 %v781_v49, %v778_v60  ;;  %v793_v5 = vmul.f32 %v792_v57, %v2640_v0  ;;  %v796_v6 = vstv %s3061_s21  ;;  %s3129_s5 = sld [smem:[#allocation2 + $0x8e]] }
  0xc2   : > { %v800_v7 = vstv %s3067_s6  ;;  %v763_v8 = vadd.f32 %v762_v52, %v759_v63  ;;  %v808_v27 = vstv %s3069_s25  ;;  %v811_v9 = vstv %s3073_s20  ;;  %s3133_s21 = sld [smem:[#allocation2 + $0x9e]]  ;;  %s3140_s6 = sld [smem:[#allocation2 + $0x3f]] }
  0xc3   : > { %v815_v10 = vstv %s3075_s7  ;;  %v786_v11 = vadd.f32 %v785_v61, %v782_v4  ;;  %v809_v12 = vmul.f32 %v808_v27, %v2551_v3  ;;  %v812_v13 = vmul.f32 %v811_v9, %v2566_v15  ;;  %s3142_s25 = sld [smem:[#allocation2 + $0x4f]] }
  0xc4   : > { %v816_v14 = vmul.f32 %v815_v10, %v2579_v26  ;;  %v3125_v18 = vmax.f32 %v700_v58, 0.0  ;;  %v767_v20 = vadd.f32 %v766_v1, %v763_v8  ;;  %v819_v21 = vstv %s3083_s15  ;;  %s3151_s20 = sld [smem:[#allocation2 + $0x5f]]  ;;  %s3156_s15 = sld [smem:[#allocation2 + $0xbd]] }
  0xc5   : > { %v823_v25 = vstv %s3085_s19  ;;  %v790_v31 = vadd.f32 %v789_v2, %v786_v11  ;;  %v813_v32 = vadd.f32 %v812_v13, %v809_v12  ;;  %v820_v35 = vmul.f32 %v819_v21, %v2604_v43  ;;  %s3153_s7 = sld [smem:[#allocation2 + $0x6f]] }
  0xc6   : > { %v827_v37 = vstv %s3091_s23  ;;  %v735_v38 = vadd.f32 %v734_v34, %v732_v19  ;;  %v797_v39 = vmul.f32 %v796_v6, %v2664_v17  ;;  %v801_v40 = vmul.f32 %v800_v7, %v2683_v33  ;;  %s3163_s19 = sld [smem:[#allocation2 + $0x7f]] }
  0xc7   : > { %v804_v29 = vstv %s3096_s17  ;;  %v770_v36 = vadd.f32 %v769_v59, %v767_v20  ;;  %v794_v41 = vadd.f32 %v793_v5, %v790_v31  ;;  %v817_v42 = vadd.f32 %v816_v14, %v813_v32  ;;  %s3165_s23 = sld [smem:[#allocation2 + $0x8f]]  ;;  %s3226_s17 = sld [smem:[#allocation2 + $0x110]] }
  0xc8   : > { %v824_v44 = vmul.f32 %v823_v25, %v2630_v16  ;;  %v828_v34 = vmul.f32 %v827_v37, %v2640_v0  ;;  %v831_v45 = vstv %s3100_s22  ;;  %v843_v46 = vstv %s3104_s27  ;;  %s3169_s22 = sld [smem:[#allocation2 + $0xbe]]  ;;  %s3176_s27 = sld [smem:[#allocation2 + $0x9f]] }
  0xc9   : > { %v846_v47 = vstv %s3106_s28  ;;  %v821_v48 = vadd.f32 %v820_v35, %v817_v42  ;;  %v835_v49 = vstv %s3111_s29  ;;  %v844_v50 = vmul.f32 %v843_v46, %v2551_v3  ;;  %s3181_s28 = sld [smem:[#allocation2 + $0xaf]]  ;;  %s3183_s29 = sld [smem:[#allocation2 + $0xc0]] }
  0xca   : > { %v847_v51 = vmul.f32 %v846_v47, %v2566_v15  ;;  %v798_v52 = vadd.f32 %v797_v39, %v794_v41  ;;  %v850_v56 = vstv %s3113_s30  ;;  %v854_v57 = vstv %s3118_s3  ;;  %s3188_s30 = sld [smem:[#allocation2 + $0xc8]] }
  0xcb   : > { %v858_v58 = vstv %s3120_s4  ;;  %v825_v59 = vadd.f32 %v824_v44, %v821_v48  ;;  %v832_v60 = vmul.f32 %v831_v45, %v2664_v17  ;;  %v851_v19 = vmul.f32 %v850_v56, %v2579_v26  ;;  %s3190_s3 = sld [smem:[#allocation2 + $0xd0]] }
  0xcc   : > { %v848_v61 = vadd.f32 %v847_v51, %v844_v50  ;;  %v3171_v63 = vmax.f32 %v735_v38, 0.0  ;;  %v836_v1 = vmul.f32 %v835_v49, %v2683_v33  ;;  %v855_v2 = vmul.f32 %v854_v57, %v2604_v43  ;;  %s3194_s4 = sld [smem:[#allocation2 + $0xd8]] }
  0xcd   : > { %v862_v4 = vstv %s3129_s5  ;;  %v3178_v5 = vmax.f32 %v770_v36, 0.0  ;;  %v829_v6 = vadd.f32 %v828_v34, %v825_v59  ;;  %v859_v8 = vmul.f32 %v858_v58, %v2630_v16  ;;  %s3200_s5 = sld [smem:[#allocation2 + $0xe0]] }
  0xce   : > { %v852_v7 = vadd.f32 %v851_v19, %v848_v61  ;;  %v802_v27 = vadd.f32 %v801_v40, %v798_v52  ;;  %v866_v9 = vstv %s3133_s21  ;;  %v878_v10 = vstv %s3140_s6  ;;  %s3205_s21 = sld [smem:[#allocation2 + $0xbf]]  ;;  %s3210_s6 = sld [smem:[#allocation2 + $0xe8]] }
  0xcf   : > { %v881_v11 = vstv %s3142_s25  ;;  %v833_v12 = vadd.f32 %v832_v60, %v829_v6  ;;  %v863_v14 = vmul.f32 %v862_v4, %v2640_v0  ;;  %v870_v20 = vstv %s3145_s26  ;;  %s3212_s25 = sld [smem:[#allocation2 + $0xf0]] }
  0xd0   : > { %v856_v13 = vadd.f32 %v855_v2, %v852_v7  ;;  %v879_v21 = vmul.f32 %v878_v10, %v2551_v3  ;;  %v882_v25 = vmul.f32 %v881_v11, %v2566_v15  ;;  %v885_v31 = vstv %s3151_s20  ;;  %s3218_s26 = sld [smem:[#allocation2 + $0xf8]] }
  0xd1   : > { %v889_v32 = vstv %s3153_s7  ;;  %v839_v35 = vstv %s3156_s15  ;;  %v867_v38 = vmul.f32 %v866_v9, %v2664_v17  ;;  %v886_v39 = vmul.f32 %v885_v31, %v2579_v26  ;;  %s3220_s20 = sld [smem:[#allocation2 + $0x100]] }
  0xd2   : > { %v860_v37 = vadd.f32 %v859_v8, %v856_v13  ;;  %v883_v40 = vadd.f32 %v882_v25, %v879_v21  ;;  %v890_v3 = vmul.f32 %v889_v32, %v2604_v43  ;;  %v893_v36 = vstv %s3163_s19  ;;  %s3224_s7 = sld [smem:[#allocation2 + $0x108]] }
  0xd3   : > { %v897_v41 = vstv %s3165_s23  ;;  %v805_v15 = vadd.f32 %v804_v29, %v802_v27  ;;  %v871_v44 = vmul.f32 %v870_v20, %v2683_v33  ;;  %v874_v26 = vstv %s3169_s22  ;;  %s3234_s15 = sld [smem:[#allocation2 + $0x118]] }
  0xd4   : > { %v864_v42 = vadd.f32 %v863_v14, %v860_v37  ;;  %v837_v43 = vadd.f32 %v836_v1, %v833_v12  ;;  %v887_v34 = vadd.f32 %v886_v39, %v883_v40  ;;  %v894_v45 = vmul.f32 %v893_v36, %v2630_v16  ;;  %s3239_s19 = sld [smem:[#allocation2 + $0x120]] }
  0xd5   : > { %v901_v46 = vstv %s3176_s27  ;;  %v898_v47 = vmul.f32 %v897_v41, %v2640_v0  ;;  %v905_v48 = vstv %s3181_s28  ;;  %v913_v49 = vstv %s3183_s29  ;;  %s3241_s23 = sld [smem:[#allocation2 + $0x128]]  ;;  %s3249_s27 = sld [smem:[#allocation2 + $0xc1]] }
  0xd6   : > { %v868_v29 = vadd.f32 %v867_v38, %v864_v42  ;;  %v891_v50 = vadd.f32 %v890_v3, %v887_v34  ;;  %v914_v51 = vmul.f32 %v913_v49, %v2792_v54  ;;  %v916_v52 = vstv %s3188_s30  ;;  %s3247_s22 = sld [smem:[#allocation2 + $0x130]]  ;;  %s3252_s28 = sld [smem:[#allocation2 + $0xc9]] }
  0xd7   : > { %v920_v56 = vstv %s3190_s3  ;;  %v917_v57 = vmul.f32 %v916_v52, %v2834_v28  ;;  %v924_v59 = vstv %s3194_s4  ;;  %v3243_v0 = vmax.f32 %v805_v15, 0.0  ;;  %s3254_s29 = sld [smem:[#allocation2 + $0xd1]]  ;;  %s3269_s4 = sld [smem:[#allocation2 + $0x138]] }
  0xd8   : > { %v872_v16 = vadd.f32 %v871_v44, %v868_v29  ;;  %v921_v58 = vmul.f32 %v920_v56, %v2870_v55  ;;  %v895_v60 = vadd.f32 %v894_v45, %v891_v50  ;;  %v902_v61 = vmul.f32 %v901_v46, %v2664_v17  ;;  %s3262_s30 = sld [smem:[#allocation2 + $0xd9]] }
  0xd9   : > { %v928_v19 = vstv %s3200_s5  ;;  %v840_v1 = vadd.f32 %v839_v35, %v837_v43  ;;  %v918_v4 = vadd.f32 %v917_v57, %v914_v51  ;;  %v925_v6 = vmul.f32 %v924_v59, %v2881_v62  ;;  %s3264_s3 = sld [smem:[#allocation2 + $0xe1]] }
  0xda   : > { %v875_v2 = vadd.f32 %v874_v26, %v872_v16  ;;  %v899_v17 = vadd.f32 %v898_v47, %v895_v60  ;;  %v906_v7 = vmul.f32 %v905_v48, %v2683_v33  ;;  %v929_v8 = vmul.f32 %v928_v19, %v2913_v22  ;;  %s3276_s5 = sld [smem:[#allocation2 + $0xe9]] }
  0xdb   : > { %v932_v27 = vstv %s3210_s6  ;;  %v922_v9 = vadd.f32 %v921_v58, %v918_v4  ;;  %v936_v10 = vstv %s3212_s25  ;;  %v940_v11 = vstv %s3218_s26  ;;  %s3278_s6 = sld [smem:[#allocation2 + $0xf1]] }
  0xdc   : > { %v944_v12 = vstv %s3220_s20  ;;  %v903_v13 = vadd.f32 %v902_v61, %v899_v17  ;;  %v909_v14 = vstv %s3205_s21  ;;  %v948_v20 = vstv %s3224_s7  ;;  %s3283_s21 = sld [smem:[#allocation2 + $0xf9]]  ;;  %s3299_s7 = sld [smem:[#allocation2 + $0x140]] }
  0xdd   : > { %v952_v21 = vstv %s3226_s17  ;;  %v3271_v25 = vmax.f32 %v840_v1, 0.0  ;;  %v3273_v33 = vmax.f32 %v875_v2, 0.0  ;;  %v926_v31 = vadd.f32 %v925_v6, %v922_v9  ;;  %s3285_s25 = sld [smem:[#allocation2 + $0x101]] }
  0xde   : > { %v933_v32 = vmul.f32 %v932_v27, %v2984_v24  ;;  %v907_v35 = vadd.f32 %v906_v7, %v903_v13  ;;  %v937_v37 = vmul.f32 %v936_v10, %v3020_v53  ;;  %v941_v38 = vmul.f32 %v940_v11, %v3031_v23  ;;  %s3292_s26 = sld [smem:[#allocation2 + $0x109]] }
  0xdf   : > { %v945_v39 = vmul.f32 %v944_v12, %v3063_v30  ;;  %v930_v40 = vadd.f32 %v929_v8, %v926_v31  ;;  %v949_v3 = vmul.f32 %v948_v20, %v3125_v18  ;;  %v3289_v36 = vmul.f32 %v952_v21, %v3171_v63  ;;  %s3294_s20 = sld [smem:[#allocation2 + $0x111]] }
  0xe0   : > { %v956_v41 = vstv %s3234_s15  ;;  %v910_v15 = vadd.f32 %v909_v14, %v907_v35  ;;  %v960_v42 = vstv %s3239_s19  ;;  %v964_v44 = vstv %s3241_s23  ;;  %s3301_s17 = sld [smem:[#allocation2 + $0x119]] }
  0xe1   : > { %v968_v26 = vstv %s3247_s22  ;;  %v934_v43 = vadd.f32 %v933_v32, %v930_v40  ;;  %v980_v34 = vstv %s3249_s27  ;;  %v983_v45 = vstv %s3252_s28  ;;  %s3310_s15 = sld [smem:[#allocation2 + $0x121]]  ;;  %s3328_s22 = sld [smem:[#allocation2 + $0xc2]] }
  0xe2   : > { %v987_v46 = vstv %s3254_s29  ;;  %v957_v29 = vmul.f32 %v956_v41, %v3178_v5  ;;  %v981_v47 = vmul.f32 %v980_v34, %v2792_v54  ;;  %v984_v48 = vmul.f32 %v983_v45, %v2834_v28  ;;  %s3317_s19 = sld [smem:[#allocation2 + $0x129]]  ;;  %s3330_s27 = sld [smem:[#allocation2 + $0xca]] }
  0xe3   : > { %v988_v49 = vmul.f32 %v987_v46, %v2870_v55  ;;  %v938_v50 = vadd.f32 %v937_v37, %v934_v43  ;;  %v3313_v51 = vmul.f32 %v960_v42, %v3243_v0  ;;  %v991_v52 = vstv %s3262_s30  ;;  %s3319_s23 = sld [smem:[#allocation2 + $0x131]]  ;;  %s3336_s28 = sld [smem:[#allocation2 + $0xd2]] }
  0xe4   : > { %v995_v56 = vstv %s3264_s3  ;;  %v3322_v16 = vmul.f32 %v964_v44, %v3271_v25  ;;  %v3325_v57 = vmul.f32 %v968_v26, %v3273_v33  ;;  %v985_v58 = vadd.f32 %v984_v48, %v981_v47  ;;  %s3341_s29 = sld [smem:[#allocation2 + $0xda]] }
  0xe5   : > { %v992_v59 = vmul.f32 %v991_v52, %v2881_v62  ;;  %v3332_v60 = vmax.f32 %v910_v15, 0.0  ;;  %v942_v61 = vadd.f32 %v941_v38, %v938_v50  ;;  %v972_v19 = vstv %s3269_s4  ;;  %s3343_s30 = sld [smem:[#allocation2 + $0xe2]]  ;;  %s3358_s4 = sld [smem:[#allocation2 + $0x139]] }
  0xe6   : > { %v999_v1 = vstv %s3276_s5  ;;  %v989_v2 = vadd.f32 %v988_v49, %v985_v58  ;;  %v996_v4 = vmul.f32 %v995_v56, %v2913_v22  ;;  %v1003_v6 = vstv %s3278_s6  ;;  %s3351_s3 = sld [smem:[#allocation2 + $0xea]]  ;;  %s3360_s5 = sld [smem:[#allocation2 + $0x141]] }
  0xe7   : > { %v1007_v17 = vstv %s3283_s21  ;;  %v946_v7 = vadd.f32 %v945_v39, %v942_v61  ;;  %v1011_v8 = vstv %s3285_s25  ;;  %v1015_v27 = vstv %s3292_s26  ;;  %s3365_s6 = sld [smem:[#allocation2 + $0xf2]] }
  0xe8   : > { %v1019_v9 = vstv %s3294_s20  ;;  %v976_v10 = vstv %s3299_s7  ;;  %v993_v11 = vadd.f32 %v992_v59, %v989_v2  ;;  %v1000_v12 = vmul.f32 %v999_v1, %v2984_v24  ;;  %s3367_s21 = sld [smem:[#allocation2 + $0xfa]]  ;;  %s3485_s7 = sld [smem:[#allocation2 + $0xc4]] }
  0xe9   : > { %v1023_v13 = vstv %s3301_s17  ;;  %v950_v14 = vadd.f32 %v949_v3, %v946_v7  ;;  %v3354_v20 = vmul.f32 %v972_v19, %v3332_v60  ;;  %v1004_v21 = vmul.f32 %v1003_v6, %v3020_v53  ;;  %s3375_s25 = sld [smem:[#allocation2 + $0x102]] }
  0xea   : > { %v1008_v31 = vmul.f32 %v1007_v17, %v3031_v23  ;;  %v997_v32 = vadd.f32 %v996_v4, %v993_v11  ;;  %v1012_v35 = vmul.f32 %v1011_v8, %v3063_v30  ;;  %v1016_v37 = vmul.f32 %v1015_v27, %v3125_v18  ;;  %s3377_s26 = sld [smem:[#allocation2 + $0x10a]] }
  0xeb   : > { %v1020_v38 = vmul.f32 %v1019_v9, %v3171_v63  ;;  %v954_v39 = vadd.f32 %v3289_v36, %v950_v14  ;;  %v3371_v40 = vmul.f32 %v1023_v13, %v3178_v5  ;;  %v1027_v3 = vstv %s3310_s15  ;;  %s3382_s20 = sld [smem:[#allocation2 + $0x112]] }
  0xec   : > { %v1031_v41 = vstv %s3317_s19  ;;  %v1001_v15 = vadd.f32 %v1000_v12, %v997_v32  ;;  %v1035_v42 = vstv %s3319_s23  ;;  %v1047_v44 = vstv %s3328_s22  ;;  %s3384_s17 = sld [smem:[#allocation2 + $0x11a]]  ;;  %s3406_s23 = sld [smem:[#allocation2 + $0xc3]] }
  0xed   : > { %v1050_v26 = vstv %s3330_s27  ;;  %v958_v36 = vadd.f32 %v957_v29, %v954_v39  ;;  %v1048_v43 = vmul.f32 %v1047_v44, %v2792_v54  ;;  %v1054_v45 = vstv %s3336_s28  ;;  %s3389_s15 = sld [smem:[#allocation2 + $0x122]]  ;;  %s3413_s27 = sld [smem:[#allocation2 + $0xcb]] }
  0xee   : > { %v1051_v34 = vmul.f32 %v1050_v26, %v2834_v28  ;;  %v1005_v46 = vadd.f32 %v1004_v21, %v1001_v15  ;;  %v1055_v47 = vmul.f32 %v1054_v45, %v2870_v55  ;;  %v1058_v48 = vstv %s3341_s29  ;;  %s3404_s19 = sld [smem:[#allocation2 + $0x12a]]  ;;  %s3418_s28 = sld [smem:[#allocation2 + $0xd3]] }
  0xef   : > { %v1062_v49 = vstv %s3343_s30  ;;  %v962_v50 = vadd.f32 %v3313_v51, %v958_v36  ;;  %v1028_v52 = vmul.f32 %v1027_v3, %v3243_v0  ;;  %v1059_v56 = vmul.f32 %v1058_v48, %v2881_v62  ;;  %s3411_s22 = sld [smem:[#allocation2 + $0x132]]  ;;  %s3420_s29 = sld [smem:[#allocation2 + $0xdb]] }
  0xf0   : > { %v1052_v29 = vadd.f32 %v1051_v34, %v1048_v43  ;;  %v1009_v58 = vadd.f32 %v1008_v31, %v1005_v46  ;;  %v3398_v59 = vmul.f32 %v1031_v41, %v3271_v25  ;;  %v3401_v61 = vmul.f32 %v1035_v42, %v3273_v33  ;;  %s3428_s30 = sld [smem:[#allocation2 + $0xe3]] }
  0xf1   : > { %v1066_v19 = vstv %s3351_s3  ;;  %v966_v51 = vadd.f32 %v3322_v16, %v962_v50  ;;  %v1039_v1 = vstv %s3358_s4  ;;  %v1063_v4 = vmul.f32 %v1062_v49, %v2913_v22  ;;  %s3430_s3 = sld [smem:[#allocation2 + $0xeb]]  ;;  %s3435_s4 = sld [smem:[#allocation2 + $0x13a]] }
  0xf2   : > { %v1056_v2 = vadd.f32 %v1055_v47, %v1052_v29  ;;  %v1013_v6 = vadd.f32 %v1012_v35, %v1009_v58  ;;  %v1043_v17 = vstv %s3360_s5  ;;  %v1070_v7 = vstv %s3365_s6  ;;  %s3440_s6 = sld [smem:[#allocation2 + $0x142]]  ;;  %s3543_s5 = sld [smem:[#allocation2 + $0x114]] }
  0xf3   : > { %v1074_v8 = vstv %s3367_s21  ;;  %v970_v16 = vadd.f32 %v3325_v57, %v966_v51  ;;  %v1067_v9 = vmul.f32 %v1066_v19, %v2984_v24  ;;  %v1078_v11 = vstv %s3375_s25  ;;  %s3442_s21 = sld [smem:[#allocation2 + $0xf3]] }
  0xf4   : > { %v1060_v27 = vadd.f32 %v1059_v56, %v1056_v2  ;;  %v1017_v12 = vadd.f32 %v1016_v37, %v1013_v6  ;;  %v1082_v13 = vstv %s3377_s26  ;;  %v1086_v14 = vstv %s3382_s20  ;;  %s3447_s25 = sld [smem:[#allocation2 + $0xfb]] }
  0xf5   : > { %v1090_v21 = vstv %s3384_s17  ;;  %v974_v31 = vadd.f32 %v3354_v20, %v970_v16  ;;  %v1071_v35 = vmul.f32 %v1070_v7, %v3020_v53  ;;  %v1094_v39 = vstv %s3389_s15  ;;  %s3455_s26 = sld [smem:[#allocation2 + $0x103]] }
  0xf6   : > { %v1064_v32 = vadd.f32 %v1063_v4, %v1060_v27  ;;  %v1021_v57 = vadd.f32 %v1020_v38, %v1017_v12  ;;  %v1040_v37 = vmul.f32 %v1039_v1, %v3332_v60  ;;  %v1075_v3 = vmul.f32 %v1074_v8, %v3031_v23  ;;  %s3457_s20 = sld [smem:[#allocation2 + $0x10b]] }
  0xf7   : > { %v1079_v41 = vmul.f32 %v1078_v11, %v3063_v30  ;;  %v1083_v15 = vmul.f32 %v1082_v13, %v3125_v18  ;;  %v1087_v42 = vmul.f32 %v1086_v14, %v3171_v63  ;;  %v1091_v38 = vmul.f32 %v1090_v21, %v3178_v5  ;;  %s3463_s17 = sld [smem:[#allocation2 + $0x113]] }
  0xf8   : > { %v1068_v20 = vadd.f32 %v1067_v9, %v1064_v32  ;;  %v1025_v44 = vadd.f32 %v3371_v40, %v1021_v57  ;;  %v3451_v26 = vmul.f32 %v1094_v39, %v3243_v0  ;;  %v1098_v36 = vstv %s3404_s19  ;;  %s3465_s15 = sld [smem:[#allocation2 + $0x11b]] }
  0xf9   : > { %v1114_v43 = vstv %s3406_s23  ;;  %v977_v34 = vadd.f32 %v976_v10, %v974_v31  ;;  %v1102_v46 = vstv %s3411_s22  ;;  %v1117_v48 = vstv %s3413_s27  ;;  %s3470_s19 = sld [smem:[#allocation2 + $0x123]]  ;;  %s3487_s22 = sld [smem:[#allocation2 + $0xcc]] }
  0xfa   : > { %v1072_v45 = vadd.f32 %v1071_v35, %v1068_v20  ;;  %v1115_v47 = vmul.f32 %v1114_v43, %v2792_v54  ;;  %v1029_v40 = vadd.f32 %v1028_v52, %v1025_v44  ;;  %v1121_v49 = vstv %s3418_s28  ;;  %s3472_s23 = sld [smem:[#allocation2 + $0x12b]]  ;;  %s3494_s27 = sld [smem:[#allocation2 + $0xd4]] }
  0xfb   : > { %v1125_v50 = vstv %s3420_s29  ;;  %v1099_v29 = vmul.f32 %v1098_v36, %v3271_v25  ;;  %v1118_v56 = vmul.f32 %v1117_v48, %v2834_v28  ;;  %v1122_v58 = vmul.f32 %v1121_v49, %v2870_v55  ;;  %s3496_s28 = sld [smem:[#allocation2 + $0xdc]] }
  0xfc   : > { %v1076_v10 = vadd.f32 %v1075_v3, %v1072_v45  ;;  %v1033_v19 = vadd.f32 %v3398_v59, %v1029_v40  ;;  %v3479_v52 = vmul.f32 %v1102_v46, %v3273_v33  ;;  %v1129_v51 = vstv %s3428_s30  ;;  %s3503_s29 = sld [smem:[#allocation2 + $0xe4]]  ;;  %s3507_s30 = sld [smem:[#allocation2 + $0x133]] }
  0xfd   : > { %v1133_v1 = vstv %s3430_s3  ;;  %v1106_v4 = vstv %s3435_s4  ;;  %v1119_v6 = vadd.f32 %v1118_v56, %v1115_v47  ;;  %v1126_v7 = vmul.f32 %v1125_v50, %v2881_v62  ;;  %s3509_s3 = sld [smem:[#allocation2 + $0xec]]  ;;  %s3515_s4 = sld [smem:[#allocation2 + $0x13b]] }
  0xfe   : > { %v1080_v2 = vadd.f32 %v1079_v41, %v1076_v10  ;;  %v3489_v8 = vmax.f32 %v977_v34, 0.0  ;;  %v1037_v59 = vadd.f32 %v3401_v61, %v1033_v19  ;;  %v1110_v16 = vstv %s3440_s6  ;;  %s3598_s6 = sld [smem:[#allocation2 + $0xf5]] }
  0xff   : > { %v1137_v27 = vstv %s3442_s21  ;;  %v1123_v11 = vadd.f32 %v1122_v58, %v1119_v6  ;;  %v1130_v12 = vmul.f32 %v1129_v51, %v2913_v22  ;;  %v1134_v13 = vmul.f32 %v1133_v1, %v2984_v24  ;;  %s3517_s21 = sld [smem:[#allocation2 + $0x143]] }
 0x100   : > { %v1084_v9 = vadd.f32 %v1083_v15, %v1080_v2  ;;  %v1041_v14 = vadd.f32 %v1040_v37, %v1037_v59  ;;  %v1141_v21 = vstv %s3447_s25  ;;  %v1145_v31 = vstv %s3455_s26  ;;  %s3521_s25 = sld [smem:[#allocation2 + $0xf4]] }
 0x101   : > { %v1149_v61 = vstv %s3457_s20  ;;  %v1127_v35 = vadd.f32 %v1126_v7, %v1123_v11  ;;  %v1153_v39 = vstv %s3463_s17  ;;  %v1157_v57 = vstv %s3465_s15  ;;  %s3523_s26 = sld [smem:[#allocation2 + $0xfc]] }
 0x102   : > { %v1088_v32 = vadd.f32 %v1087_v42, %v1084_v9  ;;  %v1107_v3 = vmul.f32 %v1106_v4, %v3332_v60  ;;  %v1138_v41 = vmul.f32 %v1137_v27, %v3020_v53  ;;  %v1161_v20 = vstv %s3470_s19  ;;  %s3532_s20 = sld [smem:[#allocation2 + $0x104]] }
 0x103   : > { %v1165_v37 = vstv %s3472_s23  ;;  %v1131_v42 = vadd.f32 %v1130_v12, %v1127_v35  ;;  %v1142_v44 = vmul.f32 %v1141_v21, %v3031_v23  ;;  %v1146_v36 = vmul.f32 %v1145_v31, %v3063_v30  ;;  %s3534_s17 = sld [smem:[#allocation2 + $0x10c]] }
 0x104   : > { %v1092_v15 = vadd.f32 %v1091_v38, %v1088_v32  ;;  %v1044_v43 = vadd.f32 %v1043_v17, %v1041_v14  ;;  %v1150_v34 = vmul.f32 %v1149_v61, %v3125_v18  ;;  %v1154_v45 = vmul.f32 %v1153_v39, %v3171_v63  ;;  %s3549_s15 = sld [smem:[#allocation2 + $0x11c]] }
 0x105   : > { %v3530_v38 = vmul.f32 %v1157_v57, %v3178_v5  ;;  %v1135_v47 = vadd.f32 %v1134_v13, %v1131_v42  ;;  %v3538_v40 = vmul.f32 %v1161_v20, %v3243_v0  ;;  %v3541_v17 = vmul.f32 %v1165_v37, %v3271_v25  ;;  %s3553_s19 = sld [smem:[#allocation2 + $0x124]] }
 0x106   : > { %v1096_v46 = vadd.f32 %v3451_v26, %v1092_v15  ;;  %v1181_v48 = vstv %s3485_s7  ;;  %v1184_v49 = vstv %s3487_s22  ;;  %v1188_v50 = vstv %s3494_s27  ;;  %s3560_s23 = sld [smem:[#allocation2 + $0x12c]]  ;;  %s3564_s7 = sld [smem:[#allocation2 + $0xc5]] }
 0x107   : > { %v1192_v10 = vstv %s3496_s28  ;;  %v1139_v26 = vadd.f32 %v1138_v41, %v1135_v47  ;;  %v1182_v58 = vmul.f32 %v1181_v48, %v2792_v54  ;;  %v1185_v19 = vmul.f32 %v1184_v49, %v2834_v28  ;;  %s3570_s22 = sld [smem:[#allocation2 + $0xcd]] }
 0x108   : > { %v1100_v56 = vadd.f32 %v1099_v29, %v1096_v46  ;;  %v3555_v51 = vmax.f32 %v1044_v43, 0.0  ;;  %v1189_v1 = vmul.f32 %v1188_v50, %v2870_v55  ;;  %v1193_v2 = vmul.f32 %v1192_v10, %v2881_v62  ;;  %s3572_s27 = sld [smem:[#allocation2 + $0xd5]] }
 0x109   : > { %v1196_v4 = vstv %s3503_s29  ;;  %v1143_v6 = vadd.f32 %v1142_v44, %v1139_v26  ;;  %v1186_v7 = vadd.f32 %v1185_v19, %v1182_v58  ;;  %v1200_v59 = vstv %s3509_s3  ;;  %s3575_s28 = sld [smem:[#allocation2 + $0xdd]]  ;;  %s3592_s3 = sld [smem:[#allocation2 + $0x134]] }
 0x10a   : > { %v1104_v29 = vadd.f32 %v3479_v52, %v1100_v56  ;;  %v1169_v27 = vstv %s3507_s30  ;;  %v1173_v9 = vstv %s3515_s4  ;;  %v1177_v11 = vstv %s3517_s21  ;;  %s3581_s29 = sld [smem:[#allocation2 + $0xe5]]  ;;  %s3594_s4 = sld [smem:[#allocation2 + $0x13c]] }
 0x10b   : > { %v1197_v12 = vmul.f32 %v1196_v4, %v2913_v22  ;;  %v1147_v13 = vadd.f32 %v1146_v36, %v1143_v6  ;;  %v1190_v14 = vadd.f32 %v1189_v1, %v1186_v7  ;;  %v1204_v21 = vstv %s3521_s25  ;;  %s3583_s30 = sld [smem:[#allocation2 + $0xed]]  ;;  %s3692_s21 = sld [smem:[#allocation2 + $0x116]] }
 0x10c   : > { %v1108_v52 = vadd.f32 %v1107_v3, %v1104_v29  ;;  %v1201_v31 = vmul.f32 %v1200_v59, %v2984_v24  ;;  %v1208_v61 = vstv %s3523_s26  ;;  %v1212_v32 = vstv %s3532_s20  ;;  %s3600_s25 = sld [smem:[#allocation2 + $0xfd]] }
 0x10d   : > { %v1216_v35 = vstv %s3534_s17  ;;  %v1151_v57 = vadd.f32 %v1150_v34, %v1147_v13  ;;  %v1194_v3 = vadd.f32 %v1193_v2, %v1190_v14  ;;  %v1220_v41 = vstv %s3543_s5  ;;  %s3606_s26 = sld [smem:[#allocation2 + $0x105]]  ;;  %s3619_s5 = sld [smem:[#allocation2 + $0x144]] }
 0x10e   : > { %v1111_v39 = vadd.f32 %v1110_v16, %v1108_v52  ;;  %v1170_v20 = vmul.f32 %v1169_v27, %v3273_v33  ;;  %v1174_v37 = vmul.f32 %v1173_v9, %v3332_v60  ;;  %v1205_v15 = vmul.f32 %v1204_v21, %v3020_v53  ;;  %s3608_s20 = sld [smem:[#allocation2 + $0x10d]] }
 0x10f   : > { %v1224_v42 = vstv %s3549_s15  ;;  %v1155_v44 = vadd.f32 %v1154_v45, %v1151_v57  ;;  %v1198_v36 = vadd.f32 %v1197_v12, %v1194_v3  ;;  %v1209_v43 = vmul.f32 %v1208_v61, %v3031_v23  ;;  %s3614_s17 = sld [smem:[#allocation2 + $0x115]] }
 0x110   : > { %v1228_v16 = vstv %s3553_s19  ;;  %v1213_v34 = vmul.f32 %v1212_v32, %v3063_v30  ;;  %v1217_v46 = vmul.f32 %v1216_v35, %v3125_v18  ;;  %v1221_v47 = vmul.f32 %v1220_v41, %v3171_v63  ;;  %s3624_s15 = sld [smem:[#allocation2 + $0x11d]] }
 0x111   : > { %v1232_v48 = vstv %s3560_s23  ;;  %v3610_v45 = vmax.f32 %v1111_v39, 0.0  ;;  %v1159_v49 = vadd.f32 %v3530_v38, %v1155_v44  ;;  %v1202_v50 = vadd.f32 %v1201_v31, %v1198_v36  ;;  %s3629_s19 = sld [smem:[#allocation2 + $0x125]] }
 0x112   : > { %v1225_v10 = vmul.f32 %v1224_v42, %v3178_v5  ;;  %v3617_v56 = vmul.f32 %v1228_v16, %v3243_v0  ;;  %v1248_v26 = vstv %s3564_s7  ;;  %v1251_v58 = vstv %s3570_s22  ;;  %s3637_s23 = sld [smem:[#allocation2 + $0x12d]]  ;;  %s3645_s22 = sld [smem:[#allocation2 + $0xc6]] }
 0x113   : > { %v1255_v19 = vstv %s3572_s27  ;;  %v1163_v38 = vadd.f32 %v3538_v40, %v1159_v49  ;;  %v1206_v1 = vadd.f32 %v1205_v15, %v1202_v50  ;;  %v1249_v2 = vmul.f32 %v1248_v26, %v2792_v54  ;;  %s3643_s7 = sld [smem:[#allocation2 + $0x135]] }
 0x114   : > { %v1252_v4 = vmul.f32 %v1251_v58, %v2834_v28  ;;  %v1256_v29 = vmul.f32 %v1255_v19, %v2870_v55  ;;  %v1259_v6 = vstv %s3575_s28  ;;  %v1263_v7 = vstv %s3581_s29  ;;  %s3648_s27 = sld [smem:[#allocation2 + $0x13d]]  ;;  %s3650_s28 = sld [smem:[#allocation2 + $0xce]] }
 0x115   : > { %v1267_v59 = vstv %s3583_s30  ;;  %v1167_v27 = vadd.f32 %v3541_v17, %v1163_v38  ;;  %v1210_v9 = vadd.f32 %v1209_v43, %v1206_v1  ;;  %v1260_v40 = vmul.f32 %v1259_v6, %v2881_v62  ;;  %s3656_s29 = sld [smem:[#allocation2 + $0xd6]] }
 0x116   : > { %v1253_v12 = vadd.f32 %v1252_v4, %v1249_v2  ;;  %v1233_v52 = vmul.f32 %v1232_v48, %v3271_v25  ;;  %v1236_v13 = vstv %s3592_s3  ;;  %v1240_v14 = vstv %s3594_s4  ;;  %s3658_s30 = sld [smem:[#allocation2 + $0xde]] }
 0x117   : > { %v1264_v21 = vmul.f32 %v1263_v7, %v2913_v22  ;;  %v1171_v17 = vadd.f32 %v1170_v20, %v1167_v27  ;;  %v1214_v31 = vadd.f32 %v1213_v34, %v1210_v9  ;;  %v1268_v32 = vmul.f32 %v1267_v59, %v2984_v24  ;;  %s3661_s3 = sld [smem:[#allocation2 + $0xe6]] }
 0x118   : > { %v1257_v61 = vadd.f32 %v1256_v29, %v1253_v12  ;;  %v1271_v35 = vstv %s3598_s6  ;;  %v1275_v39 = vstv %s3600_s25  ;;  %v1279_v57 = vstv %s3606_s26  ;;  %s3667_s4 = sld [smem:[#allocation2 + $0xee]] }
 0x119   : > { %v1283_v3 = vstv %s3608_s20  ;;  %v1175_v41 = vadd.f32 %v1174_v37, %v1171_v17  ;;  %v1218_v20 = vadd.f32 %v1217_v46, %v1214_v31  ;;  %v1287_v42 = vstv %s3614_s17  ;;  %s3675_s6 = sld [smem:[#allocation2 + $0xf6]] }
 0x11a   : > { %v1261_v15 = vadd.f32 %v1260_v40, %v1257_v61  ;;  %v1237_v44 = vmul.f32 %v1236_v13, %v3273_v33  ;;  %v1241_v36 = vmul.f32 %v1240_v14, %v3332_v60  ;;  %v1244_v43 = vstv %s3619_s5  ;;  %s3677_s25 = sld [smem:[#allocation2 + $0xfe]] }
 0x11b   : > { %v1291_v16 = vstv %s3624_s15  ;;  %v1222_v34 = vadd.f32 %v1221_v47, %v1218_v20  ;;  %v1272_v49 = vmul.f32 %v1271_v35, %v3020_v53  ;;  %v1295_v37 = vstv %s3629_s19  ;;  %s3682_s26 = sld [smem:[#allocation2 + $0x106]]  ;;  %s3697_s15 = sld [smem:[#allocation2 + $0x145]] }
 0x11c   : > { %v1265_v48 = vadd.f32 %v1264_v21, %v1261_v15  ;;  %v1276_v46 = vmul.f32 %v1275_v39, %v3031_v23  ;;  %v1280_v50 = vmul.f32 %v1279_v57, %v3063_v30  ;;  %v1284_v26 = vmul.f32 %v1283_v3, %v3125_v18  ;;  %s3684_s20 = sld [smem:[#allocation2 + $0x10e]] }
 0x11d   : > { %v1288_v58 = vmul.f32 %v1287_v42, %v3171_v63  ;;  %v1178_v47 = vadd.f32 %v1177_v11, %v1175_v41  ;;  %v1226_v19 = vadd.f32 %v1225_v10, %v1222_v34  ;;  %v1292_v1 = vmul.f32 %v1291_v16, %v3178_v5  ;;  %s3694_s17 = sld [smem:[#allocation2 + $0x11e]] }
 0x11e   : > { %v1269_v38 = vadd.f32 %v1268_v32, %v1265_v48  ;;  %v3687_v2 = vmul.f32 %v1295_v37, %v3243_v0  ;;  %v1299_v4 = vstv %s3637_s23  ;;  %v1303_v29 = vstv %s3643_s7  ;;  %s3707_s19 = sld [smem:[#allocation2 + $0x126]] }
 0x11f   : > { %v1315_v6 = vstv %s3645_s22  ;;  %v1230_v11 = vadd.f32 %v3617_v56, %v1226_v19  ;;  %v1318_v59 = vstv %s3650_s28  ;;  %v1307_v27 = vstv %s3648_s27  ;;  %s3713_s23 = sld [smem:[#allocation2 + $0x12e]]  ;;  %s3719_s22 = sld [smem:[#allocation2 + $0xc7]] }
 0x120   : > { %v1273_v10 = vadd.f32 %v1272_v49, %v1269_v38  ;;  %v1316_v7 = vmul.f32 %v1315_v6, %v2792_v54  ;;  %v1319_v9 = vmul.f32 %v1318_v59, %v2834_v28  ;;  %v1322_v12 = vstv %s3656_s29  ;;  %s3715_s7 = sld [smem:[#allocation2 + $0x136]]  ;;  %s3721_s27 = sld [smem:[#allocation2 + $0xcf]] }
 0x121   : > { %v1326_v40 = vstv %s3658_s30  ;;  %v1234_v13 = vadd.f32 %v1233_v52, %v1230_v11  ;;  %v1323_v21 = vmul.f32 %v1322_v12, %v2870_v55  ;;  %v1330_v17 = vstv %s3661_s3  ;;  %s3726_s28 = sld [smem:[#allocation2 + $0xd7]]  ;;  %s3748_s5 = sld [smem:[#allocation2 + $0x146]] }
 0x122   : > { %v1277_v14 = vadd.f32 %v1276_v46, %v1273_v10  ;;  %v3709_v56 = vmax.f32 %v1178_v47, 0.0  ;;  %v1320_v31 = vadd.f32 %v1319_v9, %v1316_v7  ;;  %v1327_v61 = vmul.f32 %v1326_v40, %v2881_v62  ;;  %s3730_s29 = sld [smem:[#allocation2 + $0xdf]] }
 0x123   : > { %v1334_v32 = vstv %s3667_s4  ;;  %v1238_v52 = vadd.f32 %v1237_v44, %v1234_v13  ;;  %v1300_v39 = vmul.f32 %v1299_v4, %v3271_v25  ;;  %v1304_v57 = vmul.f32 %v1303_v29, %v3273_v33  ;;  %s3732_s30 = sld [smem:[#allocation2 + $0xe7]]  ;;  %s3746_s4 = sld [smem:[#allocation2 + $0x13e]] }
 0x124   : > { %v1281_v35 = vadd.f32 %v1280_v50, %v1277_v14  ;;  %v1324_v3 = vadd.f32 %v1323_v21, %v1320_v31  ;;  %v1331_v41 = vmul.f32 %v1330_v17, %v2913_v22  ;;  %v1335_v20 = vmul.f32 %v1334_v32, %v2984_v24  ;;  %s3741_s3 = sld [smem:[#allocation2 + $0xef]] }
 0x125   : > { %v1338_v15 = vstv %s3675_s6  ;;  %v1242_v42 = vadd.f32 %v1241_v36, %v1238_v52  ;;  %v1342_v16 = vstv %s3677_s25  ;;  %v1346_v34 = vstv %s3682_s26  ;;  %s3755_s6 = sld [smem:[#allocation2 + $0xf7]] }
 0x126   : > { %v1285_v44 = vadd.f32 %v1284_v26, %v1281_v35  ;;  %v1328_v48 = vadd.f32 %v1327_v61, %v1324_v3  ;;  %v1350_v49 = vstv %s3684_s20  ;;  %v1354_v37 = vstv %s3692_s21  ;;  %s3757_s25 = sld [smem:[#allocation2 + $0xff]] }
 0x127   : > { %v1358_v46 = vstv %s3694_s17  ;;  %v1245_v50 = vadd.f32 %v1244_v43, %v1242_v42  ;;  %v1308_v19 = vmul.f32 %v1307_v27, %v3332_v60  ;;  %v1311_v38 = vstv %s3697_s15  ;;  %s3762_s26 = sld [smem:[#allocation2 + $0x107]] }
 0x128   : > { %v1289_v47 = vadd.f32 %v1288_v58, %v1285_v44  ;;  %v1332_v36 = vadd.f32 %v1331_v41, %v1328_v48  ;;  %v1339_v26 = vmul.f32 %v1338_v15, %v3020_v53  ;;  %v1343_v4 = vmul.f32 %v1342_v16, %v3031_v23  ;;  %s3764_s20 = sld [smem:[#allocation2 + $0x10f]] }
 0x129   : > { %v1347_v29 = vmul.f32 %v1346_v34, %v3063_v30  ;;  %v1351_v58 = vmul.f32 %v1350_v49, %v3125_v18  ;;  %v1355_v6 = vmul.f32 %v1354_v37, %v3171_v63  ;;  %v3753_v11 = vmul.f32 %v1358_v46, %v3178_v5  ;;  %s3771_s21 = sld [smem:[#allocation2 + $0x117]] }
 0x12a   : > { %v1293_v43 = vadd.f32 %v1292_v1, %v1289_v47  ;;  %v1336_v10 = vadd.f32 %v1335_v20, %v1332_v36  ;;  %v1362_v7 = vstv %s3707_s19  ;;  %v1366_v59 = vstv %s3713_s23  ;;  %s3773_s17 = sld [smem:[#allocation2 + $0x11f]]  ;;  %s3790_s19 = sld [smem:[#allocation2 + $0x148]] }
 0x12b   : > { %v1370_v27 = vstv %s3715_s7  ;;  %v3766_v1 = vmax.f32 %v1245_v50, 0.0  ;;  %v1382_v12 = vstv %s3719_s22  ;;  %v1385_v40 = vstv %s3721_s27  ;;  %s3778_s15 = sld [smem:[#allocation2 + $0x127]]  ;;  %s3792_s23 = sld [smem:[#allocation2 + $0x14c]] }
 0x12c   : > { %v1297_v9 = vadd.f32 %v3687_v2, %v1293_v43  ;;  %v1340_v13 = vadd.f32 %v1339_v26, %v1336_v10  ;;  %v1383_v14 = vmul.f32 %v1382_v12, %v2792_v54  ;;  %v1386_v21 = vmul.f32 %v1385_v40, %v2834_v28  ;;  %s3796_s7 = sld [smem:[#allocation2 + $0x12f]]  ;;  %s3798_s22 = sld [smem:[#allocation2 + $0x150]] }
 0x12d   : > { %v1389_v17 = vstv %s3726_s28  ;;  %v1393_v2 = vstv %s3730_s29  ;;  %v1397_v32 = vstv %s3732_s30  ;;  %v1363_v35 = vmul.f32 %v1362_v7, %v3243_v0  ;;  %s3803_s27 = sld [smem:[#allocation2 + $0x154]]  ;;  %s3805_s28 = sld [smem:[#allocation2 + $0x158]] }
 0x12e   : > { %v1301_v31 = vadd.f32 %v1300_v39, %v1297_v9  ;;  %v1390_v61 = vmul.f32 %v1389_v17, %v2870_v55  ;;  %v1344_v52 = vadd.f32 %v1343_v4, %v1340_v13  ;;  %v1387_v3 = vadd.f32 %v1386_v21, %v1383_v14  ;;  %s3809_s29 = sld [smem:[#allocation2 + $0x137]]  ;;  %s3814_s30 = sld [smem:[#allocation2 + $0x15c]] }
 0x12f   : > { %v1394_v41 = vmul.f32 %v1393_v2, %v2881_v62  ;;  %v1367_v28 = vmul.f32 %v1366_v59, %v3271_v25  ;;  %v3787_v20 = vmul.f32 %v1370_v27, %v3273_v33  ;;  %v1401_v15 = vstv %s3741_s3  ;;  %s3818_s3 = sld [smem:[#allocation2 + $0x13f]] }
 0x130   : > { %v1305_v54 = vadd.f32 %v1304_v57, %v1301_v31  ;;  %v1348_v55 = vadd.f32 %v1347_v29, %v1344_v52  ;;  %v1374_v39 = vstv %s3746_s4  ;;  %v1391_v42 = vadd.f32 %v1390_v61, %v1387_v3  ;;  %s3824_s4 = sld [smem:[#allocation2 + $0x149]] }
 0x131   : > { %v1398_v62 = vmul.f32 %v1397_v32, %v2913_v22  ;;  %v1402_v44 = vmul.f32 %v1401_v15, %v2984_v24  ;;  %v1405_v16 = vstv %s3755_s6  ;;  %v1409_v34 = vstv %s3757_s25  ;;  %s3826_s6 = sld [smem:[#allocation2 + $0x14d]]  ;;  %s3831_s25 = sld [smem:[#allocation2 + $0x151]] }
 0x132   : > { %v1309_v57 = vadd.f32 %v1308_v19, %v1305_v54  ;;  %v1352_v48 = vadd.f32 %v1351_v58, %v1348_v55  ;;  %v1395_v49 = vadd.f32 %v1394_v41, %v1391_v42  ;;  %v1413_v37 = vstv %s3762_s26  ;;  %s3840_s26 = sld [smem:[#allocation2 + $0x155]] }
 0x133   : > { %v1417_v22 = vstv %s3764_s20  ;;  %v1378_v50 = vstv %s3748_s5  ;;  %v1421_v47 = vstv %s3771_s21  ;;  %v1425_v36 = vstv %s3773_s17  ;;  %s3842_s20 = sld [smem:[#allocation2 + $0x159]]  ;;  %s3850_s21 = sld [smem:[#allocation2 + $0x160]] }
 0x134   : > { %v1312_v46 = vadd.f32 %v1311_v38, %v1309_v57  ;;  %v1356_v24 = vadd.f32 %v1355_v6, %v1352_v48  ;;  %v1399_v19 = vadd.f32 %v1398_v62, %v1395_v49  ;;  %v1406_v26 = vmul.f32 %v1405_v16, %v3020_v53  ;;  %s3852_s17 = sld [smem:[#allocation2 + $0x15d]]  ;;  %s3899_s5 = sld [smem:[#allocation2 + $0x162]] }
 0x135   : > { %v1429_v4 = vstv %s3778_s15  ;;  %v1375_v29 = vmul.f32 %v1374_v39, %v3332_v60  ;;  %v1410_v43 = vmul.f32 %v1409_v34, %v3031_v23  ;;  %v1414_v38 = vmul.f32 %v1413_v37, %v3063_v30  ;;  %s3857_s15 = sld [smem:[#allocation2 + $0x147]] }
 0x136   : > { %v1418_v58 = vmul.f32 %v1417_v22, %v3125_v18  ;;  %v1360_v53 = vadd.f32 %v3753_v11, %v1356_v24  ;;  %v1403_v6 = vadd.f32 %v1402_v44, %v1399_v19  ;;  %v1422_v10 = vmul.f32 %v1421_v47, %v3171_v63 }
 0x137   : > { %v1426_v7 = vmul.f32 %v1425_v36, %v3178_v5  ;;  %v3833_v23 = vmax.f32 %v1312_v46, 0.0  ;;  %v3836_v30 = vmul.f32 %v1429_v4, %v3243_v0  ;;  %v1449_v18 = vstv %s3790_s19  ;;  %s3864_s19 = sld [smem:[#allocation2 + $0x161]] }
 0x138   : > { %v1452_v59 = vstv %s3792_s23  ;;  %v1364_v11 = vadd.f32 %v1363_v35, %v1360_v53  ;;  %v1407_v27 = vadd.f32 %v1406_v26, %v1403_v6  ;;  %v1433_v63 = vstv %s3796_s7  ;;  %s3866_s23 = sld [smem:[#allocation2 + $0x14a]]  ;;  %s3871_s7 = sld [smem:[#allocation2 + $0x14e]] }
 0x139   : > { %v1450_v5 = vmul.f32 %v1449_v18, %v3489_v8  ;;  %v1453_v9 = vmul.f32 %v1452_v59, %v3555_v51  ;;  %v1456_v12 = vstv %s3798_s22  ;;  %v1460_v40 = vstv %s3803_s27  ;;  %s3873_s22 = sld [smem:[#allocation2 + $0x152]]  ;;  %s3877_s27 = sld [smem:[#allocation2 + $0x156]] }
 0x13a   : > { %v1464_v0 = vstv %s3805_s28  ;;  %v1368_v13 = vadd.f32 %v1367_v28, %v1364_v11  ;;  %v1411_v14 = vadd.f32 %v1410_v43, %v1407_v27  ;;  %v1437_v21 = vstv %s3809_s29  ;;  %s3879_s28 = sld [smem:[#allocation2 + $0x164]]  ;;  %s3884_s29 = sld [smem:[#allocation2 + $0x15a]] }
 0x13b   : > { %v1457_v17 = vmul.f32 %v1456_v12, %v3610_v45  ;;  %v1434_v31 = vmul.f32 %v1433_v63, %v3271_v25  ;;  %v1454_v61 = vadd.f32 %v1453_v9, %v1450_v5  ;;  %v1461_v2 = vmul.f32 %v1460_v40, %v3709_v56 }
 0x13c   : > { %v1468_v32 = vstv %s3814_s30  ;;  %v1372_v52 = vadd.f32 %v3787_v20, %v1368_v13  ;;  %v1415_v35 = vadd.f32 %v1414_v38, %v1411_v14  ;;  %v1441_v3 = vstv %s3818_s3  ;;  %s3889_s30 = sld [smem:[#allocation2 + $0x165]]  ;;  %s3891_s3 = sld [smem:[#allocation2 + $0x15e]] }
 0x13d   : > { %v1465_v41 = vmul.f32 %v1464_v0, %v3766_v1  ;;  %v1458_v25 = vadd.f32 %v1457_v17, %v1454_v61  ;;  %v1469_v54 = vmul.f32 %v1468_v32, %v3833_v23  ;;  %v1484_v28 = vstv %s3824_s4  ;;  %s3901_s4 = sld [smem:[#allocation2 + $0x14b]] }
 0x13e   : > { %v1487_v15 = vstv %s3826_s6  ;;  %v1376_v20 = vadd.f32 %v1375_v29, %v1372_v52  ;;  %v1419_v55 = vadd.f32 %v1418_v58, %v1415_v35  ;;  %v1485_v39 = vmul.f32 %v1484_v28, %v3489_v8  ;;  %s3907_s6 = sld [smem:[#allocation2 + $0x14f]] }
 0x13f   : > { %v1488_v42 = vmul.f32 %v1487_v15, %v3555_v51  ;;  %v1462_v62 = vadd.f32 %v1461_v2, %v1458_v25  ;;  %v1491_v57 = vstv %s3831_s25  ;;  %v1495_v44 = vstv %s3840_s26  ;;  %s3909_s25 = sld [smem:[#allocation2 + $0x153]]  ;;  %s3913_s26 = sld [smem:[#allocation2 + $0x166]] }
 0x140   : > { %v1499_v16 = vstv %s3842_s20  ;;  %v1379_v34 = vadd.f32 %v1378_v50, %v1376_v20  ;;  %v1423_v48 = vadd.f32 %v1422_v10, %v1419_v55  ;;  %v1492_v37 = vmul.f32 %v1491_v57, %v3610_v45  ;;  %s3919_s20 = sld [smem:[#allocation2 + $0x157]] }
 0x141   : > { %v1489_v49 = vadd.f32 %v1488_v42, %v1485_v39  ;;  %v1466_v22 = vadd.f32 %v1465_v41, %v1462_v62  ;;  %v1472_v46 = vstv %s3850_s21  ;;  %v1496_v47 = vmul.f32 %v1495_v44, %v3709_v56  ;;  %s3921_s21 = sld [smem:[#allocation2 + $0x15b]] }
 0x142   : > { %v1503_v36 = vstv %s3852_s17  ;;  %v3896_v24 = vmax.f32 %v1379_v34, 0.0  ;;  %v1427_v19 = vadd.f32 %v1426_v7, %v1423_v48  ;;  %v1500_v50 = vmul.f32 %v1499_v16, %v3766_v1  ;;  %s3926_s17 = sld [smem:[#allocation2 + $0x168]] }
 0x143   : > { %v1493_v26 = vadd.f32 %v1492_v37, %v1489_v49  ;;  %v1438_v4 = vmul.f32 %v1437_v21, %v3273_v33  ;;  %v1442_v29 = vmul.f32 %v1441_v3, %v3332_v60  ;;  %v1445_v43 = vstv %s3857_s15  ;;  %s3931_s15 = sld [smem:[#allocation2 + $0x15f]] }
 0x144   : > { %v1504_v38 = vmul.f32 %v1503_v36, %v3833_v23  ;;  %v1431_v58 = vadd.f32 %v3836_v30, %v1427_v19  ;;  %v1470_v53 = vadd.f32 %v1469_v54, %v1466_v22  ;;  %v1507_v10 = vstv %s3864_s19  ;;  %s3936_s19 = sld [smem:[#allocation2 + $0x169]] }
 0x145   : > { %v1497_v6 = vadd.f32 %v1496_v47, %v1493_v26  ;;  %v1473_v33 = vmul.f32 %v1472_v46, %v3896_v24  ;;  %v1519_v60 = vstv %s3866_s23  ;;  %v1522_v7 = vstv %s3871_s7  ;;  %s3939_s23 = sld [smem:[#allocation2 + $0x163]]  ;;  %s3944_s7 = sld [smem:[#allocation2 + $0x16a]] }
 0x146   : > { %v1526_v18 = vstv %s3873_s22  ;;  %v1435_v59 = vadd.f32 %v1434_v31, %v1431_v58  ;;  %v1520_v30 = vmul.f32 %v1519_v60, %v3489_v8  ;;  %v1530_v27 = vstv %s3877_s27  ;;  %s3949_s22 = sld [smem:[#allocation2 + $0x167]]  ;;  %s3957_s27 = sld [smem:[#allocation2 + $0x16c]] }
 0x147   : > { %v1501_v11 = vadd.f32 %v1500_v50, %v1497_v6  ;;  %v1476_v63 = vstv %s3879_s28  ;;  %v1523_v5 = vmul.f32 %v1522_v7, %v3555_v51  ;;  %v1527_v9 = vmul.f32 %v1526_v18, %v3610_v45  ;;  %s3959_s28 = sld [smem:[#allocation2 + $0x16d]] }
 0x148   : > { %v1534_v12 = vstv %s3884_s29  ;;  %v1439_v40 = vadd.f32 %v1438_v4, %v1435_v59  ;;  %v1508_v0 = vmul.f32 %v1507_v10, %v3896_v24  ;;  %v1511_v13 = vstv %s3889_s30  ;;  %s3966_s29 = sld [smem:[#allocation2 + $0x16e]]  ;;  %s3970_s30 = sld [smem:[#allocation2 + $0x16b]] }
 0x149   : > { %v1538_v14 = vstv %s3891_s3  ;;  %v1474_v21 = vadd.f32 %v1473_v33, %v1470_v53  ;;  %v1505_v17 = vadd.f32 %v1504_v38, %v1501_v11  ;;  %v1524_v31 = vadd.f32 %v1523_v5, %v1520_v30  ;;  %s2079_s3 = sld [smem:[#allocation2 + $0x16f]] }
 0x14a   : > { %v1531_v61 = vmul.f32 %v1530_v27, %v3709_v56  ;;  %v1443_v2 = vadd.f32 %v1442_v29, %v1439_v40  ;;  %v1535_v32 = vmul.f32 %v1534_v12, %v3766_v1  ;;  %v1539_v52 = vmul.f32 %v1538_v14, %v3833_v23 }
 0x14b   : > { %v1542_v35 = vstv %s3899_s5  ;;  %v1528_v3 = vadd.f32 %v1527_v9, %v1524_v31  ;;  %v1554_v41 = vstv %s3901_s4  ;;  %v1557_v25 = vstv %s3907_s6  ;;  %s2080_s5 = sld [smem:[#allocation2 + $0x170]]  ;;  %s2082_s4 = sshll.u32 %s2296_s13, 7 }
 0x14c   : > { %v1561_v54 = vstv %s3909_s25  ;;  %v1446_v28 = vadd.f32 %v1445_v43, %v1443_v2  ;;  %v1555_v15 = vmul.f32 %v1554_v41, %v3489_v8  ;;  %v1558_v20 = vmul.f32 %v1557_v25, %v3555_v51  ;;  %s4050_s6 = sshll.u32 %s2427_s24, 3  ;;  %s2259_s13 = smov [#allocation7]  }
 0x14d   : > { %v1562_v55 = vmul.f32 %v1561_v54, %v3610_v45  ;;  %v1532_v39 = vadd.f32 %v1531_v61, %v1528_v3  ;;  %v1546_v42 = vstv %s3913_s26  ;;  %v1565_v62 = vstv %s3919_s20  ;;  %s170_s25 = scalar_lea.vmem [#allocation7], %s4050_s6 }
 0x14e   : > { %v1569_v57 = vstv %s3921_s21  ;;  %v1447_v44 = vmax.f32 %v1446_v28, 0.0  ;;  %v1509_v16 = vadd.f32 %v1508_v0, %v1505_v17  ;;  %v1559_v34 = vadd.f32 %v1558_v20, %v1555_v15  ;;  %s1621_s26 = sshll.u32 %s170_s25, 4  ;;  %s3988_s26 = int_to_ptr.vmem [resolvable:$true] %s1621_s26 }
 0x14f   : > { %v1566_v8 = vmul.f32 %v1565_v62, %v3709_v56  ;;  %v1480_v48 = vstv %s3926_s17  ;;  %v1536_v49 = vadd.f32 %v1535_v32, %v1532_v39  ;;  %v1543_v51 = vmul.f32 %v1542_v35, %v3896_v24  ;;  %s3986_s17 = scalar_lea.hbm %s4032_s2, %s2082_s4 }
 0x150   : > { %v1573_v45 = vstv %s3931_s15  ;;  %v1477_v37 = vmul.f32 %v1476_v63, %v1447_v44  ;;  %v1512_v22 = vmul.f32 %v1511_v13, %v1447_v44  ;;  %v1563_v46 = vadd.f32 %v1562_v55, %v1559_v34  ;;  %s1608_s15 = scalar_lea.sflag [#allocation4], %s2427_s24 }
 0x151   : > { %v1570_v47 = vmul.f32 %v1569_v57, %v3766_v1  ;;  %v1515_v36 = vstv %s3936_s19  ;;  %v1540_v19 = vadd.f32 %v1539_v52, %v1536_v49  ;;  %v1547_v26 = vmul.f32 %v1546_v42, %v1447_v44  ;;  %s2185_s19 = scalar_lea.vmem %s3988_s26, 128 }
 0x152   : > { %v1577_v56 = vstv %s3939_s23  ;;  %v1478_v50 = vadd.f32 %v1477_v37, %v1474_v21  ;;  %v1513_v4 = vadd.f32 %v1512_v22, %v1509_v16  ;;  %v1567_v29 = vadd.f32 %v1566_v8, %v1563_v46  ;;  %p2186_p8 = scmp.ne.s32.totalorder %s3988_s26, %s2185_s19  ;;  %s2189_s23 = sshll.u32 %s2259_s13, 4  ;;  %s2190_s23 = int_to_ptr.vmem [resolvable:$false] %s2189_s23 }
 0x153   : > { %v1574_v43 = vmul.f32 %v1573_v45, %v3833_v23  ;;  %v1544_v38 = vadd.f32 %v1543_v51, %v1540_v19  ;;  %v1550_v58 = vstv %s3944_s7  ;;  %v1581_v53 = vstv %s3949_s22  ;;  %s2191_s7 = scalar_lea.vmem %s2190_s23, 256  ;;  %p2192_p9 = scmp.lt.s32.totalorder %s3988_s26, %s2190_s23 }
 0x154   : > { %v1481_v6 = vadd.f32 %v1480_v48, %v1478_v50  ;;  %v1516_v1 = vadd.f32 %v1515_v36, %v1513_v4  ;;  %v1571_v10 = vadd.f32 %v1570_v47, %v1567_v29  ;;  %v1578_v33 = vmul.f32 %v1577_v56, %v3896_v24  ;;  %p2187_p12 = pnand %p2186_p8, %p4051_p0  ;;  %p2193_p11 = scmp.lt.s32.totalorder %s2191_s7, %s2185_s19 }
 0x155   : > { %v1548_v60 = vadd.f32 %v1547_v26, %v1544_v38  ;;  %v1589_v7 = vstv %s3957_s27  ;;  %v1592_v18 = vstv %s3959_s28  ;;  %v1582_v27 = vmul.f32 %v1581_v53, %v1447_v44 }
 0x156   : > { %v1482_v59 = vmax.f32 %v1481_v6, 0.0  ;;  %v1517_v11 = vmax.f32 %v1516_v1, 0.0  ;;  %v1575_v30 = vadd.f32 %v1574_v43, %v1571_v10  ;;  %v1596_v12 = vstv %s3966_s29  ;;  %p2188_p7 = pneg %p2187_p12  ;;  %p2194_p13 = por %p2193_p11, %p2192_p9 }
 0x157   : > { %v1551_v63 = vadd.f32 %v1550_v58, %v1548_v60  ;;  %v1585_v0 = vstv %s3970_s30  ;;  %v1600_v17 = vstv %s2079_s3  ;;  %v1604_v32 = vstv %s2080_s5 }
 0x158   : > { %v1579_v23 = vadd.f32 %v1578_v33, %v1575_v30  ;;  %v1590_v5 = vmul.f32 %v1589_v7, %v1482_v59  ;;  %v1593_v9 = vmul.f32 %v1592_v18, %v1517_v11  ;;  %p2195_p5 = pnand %p2194_p13, %p2188_p7 }
 0x159   : > { %v1552_v40 = vmax.f32 %v1551_v63, 0.0 }
 0x15a   : > { %v1583_v13 = vadd.f32 %v1582_v27, %v1579_v23  ;;  %v1594_v24 = vadd.f32 %v1593_v9, %v1590_v5 }
 0x15b   : > { %v1597_v14 = vmul.f32 %v1596_v12, %v1552_v40 }
 0x15c   : > { %v1586_v21 = vadd.f32 %v1585_v0, %v1583_v13 }
 0x15d   : > { %v1598_v61 = vadd.f32 %v1597_v14, %v1594_v24 }
 0x15e   : > { %v1587_v31 = vmax.f32 %v1586_v21, 0.0 }
 0x160   : > { %v1601_v2 = vmul.f32 %v1600_v17, %v1587_v31 }
 0x162   : > { %v1602_v52 = vadd.f32 %v1601_v2, %v1598_v61 }
 0x164   : > { %v1605_v35 = vadd.f32 %v1604_v32, %v1602_v52 }
 0x166   : > { %1606 = vst [vmem:[%s170_s25] sm:$0xff] %v1605_v35 }
 0x167   : > { %2198 = shalt.err (!%p2195_p5)
}
 0x168   : > { %s2199_s24 = scalar_lea.hbm %s3986_s17, 128  ;;  %s2203_s28 = scalar_lea.hbm %s4032_s2, 256 }
 0x169   : > { %p2200_p10 = scmp.ne.s32.totalorder %s3986_s17, %s2199_s24  ;;  %p2204_p6 = scmp.lt.u32.totalorder %s3986_s17, %s4032_s2 }
 0x16a   : > { %p2205_p3 = scmp.lt.u32.totalorder %s2203_s28, %s2199_s24  ;;  %p2207_p8 = scmp.lt.u32.totalorder %s2199_s24, %s3986_s17 }
 0x16b   : > { %p2201_p1 = pnand %p2200_p10, %p4051_p0 }
 0x16c   : > { %p2206_p4 = por %p2205_p3, %p2204_p6 }
 0x16d   : > { %p2202_p2 = pneg %p2201_p1 }
 0x16e   : > { %p2208_p12 = por %p2207_p8, %p2206_p4 }
 0x170   : > { %p2209_p7 = pnand %p2208_p12, %p2202_p2 }
 0x172   : > { %2212 = shalt.err (!%p2209_p7)
}
 0x173   : > { %2091 = dma.vmem_to_hbm [thread:$0]  (%p4051_p0), %s3988_s26, 128, %s3986_s17, %s1608_s15  }
 0x174 PF: > { %s1633_s3 = sand.u32 1, %s2243_s9   ;;  %p4052_p9 = scmp.ne.s32.totalorder %s4038_s16, 0 }
 0x175   : > { %p4053_p11 = scmp.ge.s32.totalorder %s2255_s12, 2  ;;  %s1634_s5 = scalar_lea.sflag [#allocation4], %s1633_s3 }
 0x177   : > { %p2102_p13 = pnand %p4053_p11, %p4052_p9 }
 0x179   : > { %2238 = dma.done.wait (!%p2102_p13), %s1634_s5, 128  }
 0x17a   : > { %2240 = vsyncadd (!%p2102_p13), %s1634_s5, 4294967168  ;;  %p16_p5 = scmp.ge.s32.totalorder %s2321_s18, 4   ;;  %s4054_s9 = smov %s2247_s10 }
 0x17b   : > { %s4055_s10 = smov %s2251_s11  ;;  %s4056_s11 = smov %s2364_s8 }
 0x17c   : > { %s4057_s12 = smov %s2321_s18  ;;  %18 = sbr.rel (!%p16_p5) target bundleno = 6 (0x6), region = 78 }
 0x183   :  { %1639 = vsyncpa [#allocation3], 1 }
 0x184   :  { %1641 = vsyncpa [#allocation3 + $0x1], 1 }
 0x185   :  { %1642 = vsyncpa [#allocation4], 1 }
 0x186   :  { %1644 = vsyncpa [#allocation4 + $0x1], 1 }
 0x187   :  { %1645 = vsyncpa [#allocation5], 1 }
 0x188   :  { %1647 = vsyncpa [#allocation5 + $0x1], 1 }

</bundles_post_ra>
